<compile_context>
chip_gen: v7x
topology: tpu7x:2x2x1
jax: 0.10.0
libtpu: 0.0.40
codegen_flags: <defaults>
</compile_context>

<pallas_src>
import numpy as np
import jax
import jax.numpy as jnp
from jax.experimental import pallas as pl
from jax.experimental.pallas import tpu as pltpu


# ----------------------------------------------------------------------------
# Configuration (synthetic backbone / head, matches the original test setup)
# ----------------------------------------------------------------------------
N, C_IN, H, W = 2, 4, 16, 16
F0, F1 = 8, 16                 # block num_filters
UF0, UF1 = 8, 8                # num_upsample_filters
NUM_CLASS, NUM_ANCHORS, CODE_SIZE, DIR_BINS = 3, 2, 7, 2
C_X2D = UF0 + UF1
N_CLS = NUM_ANCHORS * NUM_CLASS      # 6
N_BOX = NUM_ANCHORS * CODE_SIZE      # 14
N_DIR = NUM_ANCHORS * DIR_BINS       # 4

# Geometry of the in-kernel canvases
_HW = H * W                      # 256 flat spatial (lane-dense)
_WP = W + 2                      # 18  padded row width (16x16 resolution)
_NP18 = (H + 2) * _WP            # 324 flattened 18x18 canvas
_L18 = (H - 1) * _WP + W         # 286 conv output chunk length @16x16
_HS, _WS = H // 2, W // 2        # 8, 8 (stride-2 resolution)
_WQ = _WS + 2                    # 10
_NP10 = (_HS + 2) * _WQ          # 100 flattened 10x10 canvas
_L10 = (_HS - 1) * _WQ + _WS     # 78  conv output chunk length @8x8


# ----------------------------------------------------------------------------
# Constant 0/1 selection matrices (built once, numpy -> device)
# ----------------------------------------------------------------------------
def _build_constants():
    # channel pad 4 -> 8 so every im2col piece is sublane (8) aligned
    e84 = np.zeros((8, C_IN), np.float32)
    e84[np.arange(C_IN), np.arange(C_IN)] = 1.0

    # flat 16x16  ->  18x18 canvas interior (zero ring)  [in-kernel padding]
    s_pad = np.zeros((_HW, _NP18), np.float32)
    for y in range(H):
        for x in range(W):
            s_pad[y * W + x, (y + 1) * _WP + (x + 1)] = 1.0

    # 18x18 canvas interior -> flat 16x16 (gather)
    s_flat18 = np.zeros((_NP18, _HW), np.float32)
    for r in range(1, H + 1):
        for c in range(1, W + 1):
            s_flat18[r * _WP + c, (r - 1) * W + (c - 1)] = 1.0

    # conv chunk (len 286, canvas pos 19+i) -> 18x18 canvas; masks ring garbage
    s_c18 = np.zeros((_L18, _NP18), np.float32)
    for i in range(_L18):
        p = (_WP + 1) + i
        if 1 <= (p % _WP) <= W:
            s_c18[i, p] = 1.0

    # stride-2 subsample: dense output pixel (2i,2j) -> 10x10 canvas interior
    s_down = np.zeros((_NP18, _NP10), np.float32)
    for i in range(_HS):
        for j in range(_WS):
            s_down[(2 * i + 1) * _WP + (2 * j + 1), (i + 1) * _WQ + (j + 1)] = 1.0
    s_c18_down = s_c18 @ s_down          # chunk@16x16 -> 10x10 canvas directly

    # conv chunk at 8x8 resolution -> 10x10 canvas
    s_c10 = np.zeros((_L10, _NP10), np.float32)
    for i in range(_L10):
        p = (_WQ + 1) + i
        if 1 <= (p % _WQ) <= _WS:
            s_c10[i, p] = 1.0

    # ConvTranspose2d(k=2,s=2) depth-to-space: 10x10-canvas interior -> flat 16x16
    s_up = np.zeros((4, _NP10, _HW), np.float32)
    for ki in range(2):
        for kj in range(2):
            ph = ki * 2 + kj
            for i in range(_HS):
                for j in range(_WS):
                    s_up[ph, (i + 1) * _WQ + (j + 1),
                         (2 * i + ki) * W + (2 * j + kj)] = 1.0

    return tuple(jnp.asarray(a) for a in
                 (e84, s_pad, s_c18, s_flat18, s_c18_down, s_c10, s_up))


# ----------------------------------------------------------------------------
# Fused Pallas kernel (one grid step == one batch element)
# ----------------------------------------------------------------------------
def _fused_kernel(x_ref,
                  e84_ref, s_pad_ref, s_c18_ref, s_flat18_ref, s_c18d_ref,
                  s_c10_ref, s_up_ref,
                  w_b0c0_ref, b_b0c0_ref, w_b0c1_ref, b_b0c1_ref,
                  w_d0_ref, b_d0_ref,
                  w_b1c0_ref, b_b1c0_ref, w_b1c1_ref, b_b1c1_ref,
                  w_d1_ref, b_d1_ref,
                  w_head_ref, b_head_ref,
                  x2d_ref, cls_ref, box_ref, dir_ref):
    dot = lambda a, b: jnp.dot(a, b, preferred_element_type=jnp.float32)

    def conv3x3(canvas, w2, bias, wp, chunk_len, scatter):
        # canvas : (Cin, Hp*Wp) zero-ring canvas (channels on sublanes)
        # w2     : (Cout, 9*Cin)  -- BN scale folded in
        # One im2col matmul over the whole spatial chunk, bias + ReLU, then a
        # selection-matmul scatter that simultaneously masks the row-wrap
        # garbage and re-inserts the zero ring (or does the stride-2 pick).
        pieces = [canvas[:, kh * wp + kw: kh * wp + kw + chunk_len]
                  for kh in range(3) for kw in range(3)]
        patch = jnp.concatenate(pieces, axis=0)                 # (9*Cin, L)
        y = jnp.maximum(dot(w2, patch) + bias, 0.0)             # (Cout, L)
        return dot(y, scatter)

    x = x_ref[0]                                                # (4, 256)
    x8 = dot(e84_ref[...], x)                                   # channel pad 4->8
    c18 = dot(x8, s_pad_ref[...])                               # (8, 324) canvas

    # ---- backbone block 0 (stride 1) ----
    h = conv3x3(c18, w_b0c0_ref[...], b_b0c0_ref[...], _WP, _L18, s_c18_ref[...])
    h1 = conv3x3(h, w_b0c1_ref[...], b_b0c1_ref[...], _WP, _L18, s_c18_ref[...])

    # ---- deblock 0: 1x1 conv + BN + ReLU on the 16x16 interior ----
    h1_flat = dot(h1, s_flat18_ref[...])                        # (8, 256)
    ups0 = jnp.maximum(dot(w_d0_ref[...], h1_flat) + b_d0_ref[...], 0.0)

    # ---- backbone block 1 (stride 2 folded into the scatter matrix) ----
    g = conv3x3(h1, w_b1c0_ref[...], b_b1c0_ref[...], _WP, _L18,
                s_c18d_ref[...])                                # (16, 100)
    h2 = conv3x3(g, w_b1c1_ref[...], b_b1c1_ref[...], _WQ, _L10,
                 s_c10_ref[...])                                # (16, 100)

    # ---- deblock 1: ConvTranspose2d(k=2,s=2) = 4 phase 1x1s + depth-to-space ----
    up = dot(dot(w_d1_ref[0], h2), s_up_ref[0])
    for ph in range(1, 4):
        up = up + dot(dot(w_d1_ref[ph], h2), s_up_ref[ph])
    ups1 = jnp.maximum(up + b_d1_ref[...], 0.0)                 # (8, 256)

    # ---- channel concat (torch.cat(ups, dim=1)) ----
    x2d = jnp.concatenate([ups0, ups1], axis=0)                 # (16, 256)
    x2d_ref[0] = x2d

    # ---- fused dense head: one matmul, sublane-aligned split on store ----
    preds = dot(w_head_ref[...], x2d) + b_head_ref[...]         # (32, 256)
    n_cls, n_box, n_dir = cls_ref.shape[1], box_ref.shape[1], dir_ref.shape[1]
    off_box = -(-n_cls // 8) * 8
    off_dir = off_box + (-(-n_box // 8) * 8)
    cls_ref[0] = preds[0:n_cls, :]
    box_ref[0] = preds[off_box:off_box + n_box, :]
    dir_ref[0] = preds[off_dir:off_dir + n_dir, :]


# ----------------------------------------------------------------------------
# Parameter / constant preparation (one-time, outside the kernel)
# ----------------------------------------------------------------------------
def prepare_params(P):
    consts = _build_constants()

    def pack3(w, scale, cin_pad=None):
        # HWIO (3,3,Cin,Cout) -> (Cout, 9*Cin) with tap-major columns,
        # folded BN scale on the output-channel rows.
        k, _, cin, cout = w.shape
        if cin_pad is not None and cin_pad > cin:
            w = jnp.pad(w, ((0, 0), (0, 0), (0, cin_pad - cin), (0, 0)))
        w2 = jnp.transpose(w, (3, 0, 1, 2)).reshape(cout, -1)
        return (scale[:, None] * w2).astype(jnp.float32)

    col = lambda v: jnp.asarray(v, jnp.float32).reshape(-1, 1)

    w_b0c0 = pack3(P['b0c0_w'], P['b0c0_s'], cin_pad=8)
    b_b0c0 = col(P['b0c0_b'])
    w_b0c1 = pack3(P['b0c1_w'], P['b0c1_s'])
    b_b0c1 = col(P['b0c1_b'])
    w_d0 = (P['d0_s'][:, None] * P['d0_w'][0, 0].T).astype(jnp.float32)
    b_d0 = col(P['d0_b'])
    w_b1c0 = pack3(P['b1c0_w'], P['b1c0_s'])
    b_b1c0 = col(P['b1c0_b'])
    w_b1c1 = pack3(P['b1c1_w'], P['b1c1_s'])
    b_b1c1 = col(P['b1c1_b'])
    # ConvTranspose2d weight (Cin, Cout, 2, 2) -> per-phase (Cout, Cin), scale folded
    w_d1 = jnp.stack([P['d1_s'][:, None] * P['d1_w'][:, :, ki, kj].T
                      for ki in range(2) for kj in range(2)], axis=0
                     ).astype(jnp.float32)                      # (4, 8, 16)
    b_d1 = col(P['d1_b'])

    # fused head weight with sublane-aligned segment offsets
    off_box = -(-N_CLS // 8) * 8
    off_dir = off_box + (-(-N_BOX // 8) * 8)
    n_head = off_dir + (-(-N_DIR // 8) * 8)
    w_head = jnp.zeros((n_head, C_X2D), jnp.float32)
    b_head = jnp.zeros((n_head, 1), jnp.float32)
    w_head = w_head.at[0:N_CLS].set(P['cls_w'][0, 0].T)
    w_head = w_head.at[off_box:off_box + N_BOX].set(P['box_w'][0, 0].T)
    w_head = w_head.at[off_dir:off_dir + N_DIR].set(P['dir_w'][0, 0].T)
    b_head = b_head.at[0:N_CLS, 0].set(P['cls_b'])
    b_head = b_head.at[off_box:off_box + N_BOX, 0].set(P['box_b'])
    b_head = b_head.at[off_dir:off_dir + N_DIR, 0].set(P['dir_b'])

    return consts + (w_b0c0, b_b0c0, w_b0c1, b_b0c1, w_d0, b_d0,
                     w_b1c0, b_b1c0, w_b1c1, b_b1c1, w_d1, b_d1,
                     w_head, b_head)


def _const_spec(a):
    if a.ndim == 2:
        return pl.BlockSpec(a.shape, lambda i: (0, 0))
    return pl.BlockSpec(a.shape, lambda i: (0, 0, 0))


# ----------------------------------------------------------------------------
# Bev_w_Head forward (single fused pallas_call)
# ----------------------------------------------------------------------------
def pallas_bev_w_head(spatial_features_nchw, prepped):
    n, cin, h, w = spatial_features_nchw.shape
    assert (h, w, cin) == (H, W, C_IN)
    hw = h * w
    x_flat = spatial_features_nchw.reshape(n, cin, hw).astype(jnp.float32)

    out_shape = (
        jax.ShapeDtypeStruct((n, C_X2D, hw), jnp.float32),
        jax.ShapeDtypeStruct((n, N_CLS, hw), jnp.float32),
        jax.ShapeDtypeStruct((n, N_BOX, hw), jnp.float32),
        jax.ShapeDtypeStruct((n, N_DIR, hw), jnp.float32),
    )
    out_specs = [
        pl.BlockSpec((1, C_X2D, hw), lambda i: (i, 0, 0)),
        pl.BlockSpec((1, N_CLS, hw), lambda i: (i, 0, 0)),
        pl.BlockSpec((1, N_BOX, hw), lambda i: (i, 0, 0)),
        pl.BlockSpec((1, N_DIR, hw), lambda i: (i, 0, 0)),
    ]
    x2d, cls_p, box_p, dir_p = pl.pallas_call(
        _fused_kernel,
        out_shape=out_shape,
        grid=(n,),
        in_specs=[pl.BlockSpec((1, cin, hw), lambda i: (i, 0, 0))]
                 + [_const_spec(a) for a in prepped],
        out_specs=out_specs,
        compiler_params=pltpu.CompilerParams(dimension_semantics=("parallel",)),
    )(x_flat, *prepped)

    # NOTE: the PyTorch forward's ret_dict['spatial_features_%dx'] bookkeeping
    # is local and not part of the returned tuple, so it is omitted.
    to_nchw = lambda t: t.reshape(n, t.shape[1], h, w)   # free metadata reshape
    return to_nchw(x2d), to_nchw(cls_p), to_nchw(box_p), to_nchw(dir_p)


# ----------------------------------------------------------------------------
# Pure-JAX reference (for the correctness check only)
# ----------------------------------------------------------------------------
def _ref_conv(x, w, stride, pad, scale, bias, relu):
    y = jax.lax.conv_general_dilated(
        x, w, (stride, stride), [(pad, pad), (pad, pad)],
        dimension_numbers=('NHWC', 'HWIO', 'NHWC'),
        precision=jax.lax.Precision.HIGHEST)
    y = y * scale + bias
    return jnp.maximum(y, 0.0) if relu else y


def _ref_deconv2(x, w_t, scale, bias):
    t = jnp.einsum('nhwi,iokl->nhkwlo', x, w_t,
                   precision=jax.lax.Precision.HIGHEST)
    n, hh, _, ww, _, co = t.shape
    y = t.reshape(n, 2 * hh, 2 * ww, co)
    y = y * scale + bias
    return jnp.maximum(y, 0.0)


def ref_bev_w_head(spatial_features_nchw, P):
    x = jnp.transpose(spatial_features_nchw, (0, 2, 3, 1)).astype(jnp.float32)
    ups = []
    h = _ref_conv(x, P['b0c0_w'], 1, 1, P['b0c0_s'], P['b0c0_b'], True)
    h = _ref_conv(h, P['b0c1_w'], 1, 1, P['b0c1_s'], P['b0c1_b'], True)
    ups.append(_ref_conv(h, P['d0_w'], 1, 0, P['d0_s'], P['d0_b'], True))
    h = _ref_conv(h, P['b1c0_w'], 2, 1, P['b1c0_s'], P['b1c0_b'], True)
    h = _ref_conv(h, P['b1c1_w'], 1, 1, P['b1c1_s'], P['b1c1_b'], True)
    ups.append(_ref_deconv2(h, P['d1_w'], P['d1_s'], P['d1_b']))
    x2d = jnp.concatenate(ups, axis=-1)
    ones = lambda c: jnp.ones((c,), jnp.float32)
    cls_preds = _ref_conv(x2d, P['cls_w'], 1, 0, ones(N_CLS), P['cls_b'], False)
    box_preds = _ref_conv(x2d, P['box_w'], 1, 0, ones(N_BOX), P['box_b'], False)
    dir_preds = _ref_conv(x2d, P['dir_w'], 1, 0, ones(N_DIR), P['dir_b'], False)
    to_nchw = lambda t: jnp.transpose(t, (0, 3, 1, 2))
    return to_nchw(x2d), to_nchw(cls_preds), to_nchw(box_preds), to_nchw(dir_preds)


# ----------------------------------------------------------------------------
# Deterministic parameter construction
# ----------------------------------------------------------------------------
class _KeyGen:
    def __init__(self, key):
        self.key = key

    def __call__(self):
        self.key, k = jax.random.split(self.key)
        return k


def build_params(kg):
    def conv_w(cin, cout, k):
        return 0.1 * jax.random.normal(kg(), (k, k, cin, cout), jnp.float32)

    def bn(c):  # fold eval-mode BatchNorm2d into scale/bias
        gamma = 1.0 + 0.1 * jax.random.normal(kg(), (c,), jnp.float32)
        beta = 0.1 * jax.random.normal(kg(), (c,), jnp.float32)
        mean = 0.1 * jax.random.normal(kg(), (c,), jnp.float32)
        var = 1.0 + 0.1 * jnp.abs(jax.random.normal(kg(), (c,), jnp.float32))
        s = gamma / jnp.sqrt(var + 1e-3)
        return s, beta - mean * s

    P = {}
    P['b0c0_w'] = conv_w(C_IN, F0, 3); P['b0c0_s'], P['b0c0_b'] = bn(F0)
    P['b0c1_w'] = conv_w(F0, F0, 3);   P['b0c1_s'], P['b0c1_b'] = bn(F0)
    P['d0_w'] = conv_w(F0, UF0, 1);    P['d0_s'], P['d0_b'] = bn(UF0)
    P['b1c0_w'] = conv_w(F0, F1, 3);   P['b1c0_s'], P['b1c0_b'] = bn(F1)
    P['b1c1_w'] = conv_w(F1, F1, 3);   P['b1c1_s'], P['b1c1_b'] = bn(F1)
    P['d1_w'] = 0.1 * jax.random.normal(kg(), (F1, UF1, 2, 2), jnp.float32)  # torch ConvT layout
    P['d1_s'], P['d1_b'] = bn(UF1)
    c2d = UF0 + UF1
    P['cls_w'] = conv_w(c2d, N_CLS, 1)
    P['cls_b'] = 0.1 * jax.random.normal(kg(), (N_CLS,), jnp.float32)
    P['box_w'] = conv_w(c2d, N_BOX, 1)
    P['box_b'] = 0.1 * jax.random.normal(kg(), (N_BOX,), jnp.float32)
    P['dir_w'] = conv_w(c2d, N_DIR, 1)
    P['dir_b'] = 0.1 * jax.random.normal(kg(), (N_DIR,), jnp.float32)
    return P


if __name__ == "__main__":
    kg = _KeyGen(jax.random.PRNGKey(0))
    P = build_params(kg)
    spatial_features = jax.random.normal(kg(), (N, C_IN, H, W), jnp.float32)  # NCHW

    prepped = prepare_params(P)                       # weights/constants, one-time
    fwd = jax.jit(pallas_bev_w_head)
    outs = fwd(spatial_features, prepped)
    outs = jax.block_until_ready(outs)

    refs = ref_bev_w_head(spatial_features, P)
    expected_shapes = [(N, C_X2D, H, W),
                       (N, N_CLS, H, W),
                       (N, N_BOX, H, W),
                       (N, N_DIR, H, W)]
    for o, r, es in zip(outs, refs, expected_shapes):
        assert o.shape == es and r.shape == es, (o.shape, r.shape, es)
        np.testing.assert_allclose(np.asarray(o), np.asarray(r), atol=2e-2, rtol=2e-2)

    print("KERNEL_OK")
</pallas_src>

<mosaic_0001>
module attributes {stable_mosaic.version = 11 : i64} {
  func.func @_fused_kernel(%arg0: i32, %arg1: memref<1x4x256xf32, #tpu.memory_space<vmem>>, %arg2: memref<8x4xf32, #tpu.memory_space<vmem>>, %arg3: memref<256x324xf32, #tpu.memory_space<vmem>>, %arg4: memref<286x324xf32, #tpu.memory_space<vmem>>, %arg5: memref<324x256xf32, #tpu.memory_space<vmem>>, %arg6: memref<286x100xf32, #tpu.memory_space<vmem>>, %arg7: memref<78x100xf32, #tpu.memory_space<vmem>>, %arg8: memref<4x100x256xf32, #tpu.memory_space<vmem>>, %arg9: memref<8x72xf32, #tpu.memory_space<vmem>>, %arg10: memref<8x1xf32, #tpu.memory_space<vmem>>, %arg11: memref<8x72xf32, #tpu.memory_space<vmem>>, %arg12: memref<8x1xf32, #tpu.memory_space<vmem>>, %arg13: memref<8x8xf32, #tpu.memory_space<vmem>>, %arg14: memref<8x1xf32, #tpu.memory_space<vmem>>, %arg15: memref<16x72xf32, #tpu.memory_space<vmem>>, %arg16: memref<16x1xf32, #tpu.memory_space<vmem>>, %arg17: memref<16x144xf32, #tpu.memory_space<vmem>>, %arg18: memref<16x1xf32, #tpu.memory_space<vmem>>, %arg19: memref<4x8x16xf32, #tpu.memory_space<vmem>>, %arg20: memref<8x1xf32, #tpu.memory_space<vmem>>, %arg21: memref<32x16xf32, #tpu.memory_space<vmem>>, %arg22: memref<32x1xf32, #tpu.memory_space<vmem>>, %arg23: memref<1x16x256xf32, #tpu.memory_space<vmem>>, %arg24: memref<1x6x256xf32, #tpu.memory_space<vmem>>, %arg25: memref<1x14x256xf32, #tpu.memory_space<vmem>>, %arg26: memref<1x4x256xf32, #tpu.memory_space<vmem>>) attributes {dimension_semantics = [#tpu.dimension_semantics<parallel>], iteration_bounds = array<i64: 2>, scalar_prefetch = 0 : i64, scratch_operands = 0 : i64, tpu.core_type = #tpu.core_type<tc>, window_params = [{transform_indices = @transform_0, window_bounds = array<i64: 1, 4, 256>}, {pipeline_mode = #tpu.pipeline_mode<synchronous>, transform_indices = @transform_1, window_bounds = array<i64: 8, 4>}, {pipeline_mode = #tpu.pipeline_mode<synchronous>, transform_indices = @transform_2, window_bounds = array<i64: 256, 324>}, {pipeline_mode = #tpu.pipeline_mode<synchronous>, transform_indices = @transform_3, window_bounds = array<i64: 286, 324>}, {pipeline_mode = #tpu.pipeline_mode<synchronous>, transform_indices = @transform_4, window_bounds = array<i64: 324, 256>}, {pipeline_mode = #tpu.pipeline_mode<synchronous>, transform_indices = @transform_5, window_bounds = array<i64: 286, 100>}, {pipeline_mode = #tpu.pipeline_mode<synchronous>, transform_indices = @transform_6, window_bounds = array<i64: 78, 100>}, {pipeline_mode = #tpu.pipeline_mode<synchronous>, transform_indices = @transform_7, window_bounds = array<i64: 4, 100, 256>}, {pipeline_mode = #tpu.pipeline_mode<synchronous>, transform_indices = @transform_8, window_bounds = array<i64: 8, 72>}, {pipeline_mode = #tpu.pipeline_mode<synchronous>, transform_indices = @transform_9, window_bounds = array<i64: 8, 1>}, {pipeline_mode = #tpu.pipeline_mode<synchronous>, transform_indices = @transform_10, window_bounds = array<i64: 8, 72>}, {pipeline_mode = #tpu.pipeline_mode<synchronous>, transform_indices = @transform_11, window_bounds = array<i64: 8, 1>}, {pipeline_mode = #tpu.pipeline_mode<synchronous>, transform_indices = @transform_12, window_bounds = array<i64: 8, 8>}, {pipeline_mode = #tpu.pipeline_mode<synchronous>, transform_indices = @transform_13, window_bounds = array<i64: 8, 1>}, {pipeline_mode = #tpu.pipeline_mode<synchronous>, transform_indices = @transform_14, window_bounds = array<i64: 16, 72>}, {pipeline_mode = #tpu.pipeline_mode<synchronous>, transform_indices = @transform_15, window_bounds = array<i64: 16, 1>}, {pipeline_mode = #tpu.pipeline_mode<synchronous>, transform_indices = @transform_16, window_bounds = array<i64: 16, 144>}, {pipeline_mode = #tpu.pipeline_mode<synchronous>, transform_indices = @transform_17, window_bounds = array<i64: 16, 1>}, {pipeline_mode = #tpu.pipeline_mode<synchronous>, transform_indices = @transform_18, window_bounds = array<i64: 4, 8, 16>}, {pipeline_mode = #tpu.pipeline_mode<synchronous>, transform_indices = @transform_19, window_bounds = array<i64: 8, 1>}, {pipeline_mode = #tpu.pipeline_mode<synchronous>, transform_indices = @transform_20, window_bounds = array<i64: 32, 16>}, {pipeline_mode = #tpu.pipeline_mode<synchronous>, transform_indices = @transform_21, window_bounds = array<i64: 32, 1>}, {transform_indices = @transform_22, window_bounds = array<i64: 1, 16, 256>}, {transform_indices = @transform_23, window_bounds = array<i64: 1, 6, 256>}, {transform_indices = @transform_24, window_bounds = array<i64: 1, 14, 256>}, {transform_indices = @transform_25, window_bounds = array<i64: 1, 4, 256>}]} {
    %c0 = arith.constant 0 : index
    %c0_0 = arith.constant 0 : index
    %c0_1 = arith.constant 0 : index
    %0 = vector.load %arg1[%c0, %c0_0, %c0_1] : memref<1x4x256xf32, #tpu.memory_space<vmem>>, vector<1x4x256xf32>
    %1 = vector.shape_cast %0 : vector<1x4x256xf32> to vector<4x256xf32>
    %c0_2 = arith.constant 0 : index
    %c0_3 = arith.constant 0 : index
    %2 = vector.load %arg2[%c0_2, %c0_3] : memref<8x4xf32, #tpu.memory_space<vmem>>, vector<8x4xf32>
    %cst = arith.constant dense<0.000000e+00> : vector<8x256xf32>
    %3 = tpu.matmul %2, %1, %cst {dimension_numbers = #tpu.dot_dimension_numbers<[1], [0], [0], [1], [0, 0, 1, 1], [], []>} : vector<8x4xf32>, vector<4x256xf32>, vector<8x256xf32> -> vector<8x256xf32>
    %c0_4 = arith.constant 0 : index
    %c0_5 = arith.constant 0 : index
    %4 = vector.load %arg3[%c0_4, %c0_5] : memref<256x324xf32, #tpu.memory_space<vmem>>, vector<256x324xf32>
    %cst_6 = arith.constant dense<0.000000e+00> : vector<8x324xf32>
    %5 = tpu.matmul %3, %4, %cst_6 {dimension_numbers = #tpu.dot_dimension_numbers<[1], [0], [0], [1], [0, 0, 1, 1], [], []>} : vector<8x256xf32>, vector<256x324xf32>, vector<8x324xf32> -> vector<8x324xf32>
    %c0_7 = arith.constant 0 : index
    %c0_8 = arith.constant 0 : index
    %6 = vector.load %arg9[%c0_7, %c0_8] : memref<8x72xf32, #tpu.memory_space<vmem>>, vector<8x72xf32>
    %c0_9 = arith.constant 0 : index
    %c0_10 = arith.constant 0 : index
    %7 = vector.load %arg10[%c0_9, %c0_10] : memref<8x1xf32, #tpu.memory_space<vmem>>, vector<8x1xf32>
    %c0_11 = arith.constant 0 : index
    %c0_12 = arith.constant 0 : index
    %8 = vector.load %arg4[%c0_11, %c0_12] : memref<286x324xf32, #tpu.memory_space<vmem>>, vector<286x324xf32>
    %9 = vector.extract_strided_slice %5 {offsets = [0, 0], sizes = [8, 286], strides = [1, 1]} : vector<8x324xf32> to vector<8x286xf32>
    %10 = vector.extract_strided_slice %5 {offsets = [0, 1], sizes = [8, 286], strides = [1, 1]} : vector<8x324xf32> to vector<8x286xf32>
    %11 = vector.extract_strided_slice %5 {offsets = [0, 2], sizes = [8, 286], strides = [1, 1]} : vector<8x324xf32> to vector<8x286xf32>
    %12 = vector.extract_strided_slice %5 {offsets = [0, 18], sizes = [8, 286], strides = [1, 1]} : vector<8x324xf32> to vector<8x286xf32>
    %13 = vector.extract_strided_slice %5 {offsets = [0, 19], sizes = [8, 286], strides = [1, 1]} : vector<8x324xf32> to vector<8x286xf32>
    %14 = vector.extract_strided_slice %5 {offsets = [0, 20], sizes = [8, 286], strides = [1, 1]} : vector<8x324xf32> to vector<8x286xf32>
    %15 = vector.extract_strided_slice %5 {offsets = [0, 36], sizes = [8, 286], strides = [1, 1]} : vector<8x324xf32> to vector<8x286xf32>
    %16 = vector.extract_strided_slice %5 {offsets = [0, 37], sizes = [8, 286], strides = [1, 1]} : vector<8x324xf32> to vector<8x286xf32>
    %17 = vector.extract_strided_slice %5 {offsets = [0, 38], sizes = [8, 286], strides = [1, 1]} : vector<8x324xf32> to vector<8x286xf32>
    %18 = tpu.concatenate %9, %10, %11, %12, %13, %14, %15, %16, %17 in 0 : vector<8x286xf32>, vector<8x286xf32>, vector<8x286xf32>, vector<8x286xf32>, vector<8x286xf32>, vector<8x286xf32>, vector<8x286xf32>, vector<8x286xf32>, vector<8x286xf32> -> vector<72x286xf32>
    %cst_13 = arith.constant dense<0.000000e+00> : vector<8x286xf32>
    %19 = tpu.matmul %6, %18, %cst_13 {dimension_numbers = #tpu.dot_dimension_numbers<[1], [0], [0], [1], [0, 0, 1, 1], [], []>} : vector<8x72xf32>, vector<72x286xf32>, vector<8x286xf32> -> vector<8x286xf32>
    %20 = vector.broadcast %7 : vector<8x1xf32> to vector<8x286xf32>
    %21 = arith.addf %19, %20 : vector<8x286xf32>
    %cst_14 = arith.constant 0.000000e+00 : f32
    %22 = vector.broadcast %cst_14 : f32 to vector<8x286xf32>
    %23 = arith.maximumf %21, %22 : vector<8x286xf32>
    %cst_15 = arith.constant dense<0.000000e+00> : vector<8x324xf32>
    %24 = tpu.matmul %23, %8, %cst_15 {dimension_numbers = #tpu.dot_dimension_numbers<[1], [0], [0], [1], [0, 0, 1, 1], [], []>} : vector<8x286xf32>, vector<286x324xf32>, vector<8x324xf32> -> vector<8x324xf32>
    %c0_16 = arith.constant 0 : index
    %c0_17 = arith.constant 0 : index
    %25 = vector.load %arg11[%c0_16, %c0_17] : memref<8x72xf32, #tpu.memory_space<vmem>>, vector<8x72xf32>
    %c0_18 = arith.constant 0 : index
    %c0_19 = arith.constant 0 : index
    %26 = vector.load %arg12[%c0_18, %c0_19] : memref<8x1xf32, #tpu.memory_space<vmem>>, vector<8x1xf32>
    %c0_20 = arith.constant 0 : index
    %c0_21 = arith.constant 0 : index
    %27 = vector.load %arg4[%c0_20, %c0_21] : memref<286x324xf32, #tpu.memory_space<vmem>>, vector<286x324xf32>
    %28 = vector.extract_strided_slice %24 {offsets = [0, 0], sizes = [8, 286], strides = [1, 1]} : vector<8x324xf32> to vector<8x286xf32>
    %29 = vector.extract_strided_slice %24 {offsets = [0, 1], sizes = [8, 286], strides = [1, 1]} : vector<8x324xf32> to vector<8x286xf32>
    %30 = vector.extract_strided_slice %24 {offsets = [0, 2], sizes = [8, 286], strides = [1, 1]} : vector<8x324xf32> to vector<8x286xf32>
    %31 = vector.extract_strided_slice %24 {offsets = [0, 18], sizes = [8, 286], strides = [1, 1]} : vector<8x324xf32> to vector<8x286xf32>
    %32 = vector.extract_strided_slice %24 {offsets = [0, 19], sizes = [8, 286], strides = [1, 1]} : vector<8x324xf32> to vector<8x286xf32>
    %33 = vector.extract_strided_slice %24 {offsets = [0, 20], sizes = [8, 286], strides = [1, 1]} : vector<8x324xf32> to vector<8x286xf32>
    %34 = vector.extract_strided_slice %24 {offsets = [0, 36], sizes = [8, 286], strides = [1, 1]} : vector<8x324xf32> to vector<8x286xf32>
    %35 = vector.extract_strided_slice %24 {offsets = [0, 37], sizes = [8, 286], strides = [1, 1]} : vector<8x324xf32> to vector<8x286xf32>
    %36 = vector.extract_strided_slice %24 {offsets = [0, 38], sizes = [8, 286], strides = [1, 1]} : vector<8x324xf32> to vector<8x286xf32>
    %37 = tpu.concatenate %28, %29, %30, %31, %32, %33, %34, %35, %36 in 0 : vector<8x286xf32>, vector<8x286xf32>, vector<8x286xf32>, vector<8x286xf32>, vector<8x286xf32>, vector<8x286xf32>, vector<8x286xf32>, vector<8x286xf32>, vector<8x286xf32> -> vector<72x286xf32>
    %cst_22 = arith.constant dense<0.000000e+00> : vector<8x286xf32>
    %38 = tpu.matmul %25, %37, %cst_22 {dimension_numbers = #tpu.dot_dimension_numbers<[1], [0], [0], [1], [0, 0, 1, 1], [], []>} : vector<8x72xf32>, vector<72x286xf32>, vector<8x286xf32> -> vector<8x286xf32>
    %39 = vector.broadcast %26 : vector<8x1xf32> to vector<8x286xf32>
    %40 = arith.addf %38, %39 : vector<8x286xf32>
    %cst_23 = arith.constant 0.000000e+00 : f32
    %41 = vector.broadcast %cst_23 : f32 to vector<8x286xf32>
    %42 = arith.maximumf %40, %41 : vector<8x286xf32>
    %cst_24 = arith.constant dense<0.000000e+00> : vector<8x324xf32>
    %43 = tpu.matmul %42, %27, %cst_24 {dimension_numbers = #tpu.dot_dimension_numbers<[1], [0], [0], [1], [0, 0, 1, 1], [], []>} : vector<8x286xf32>, vector<286x324xf32>, vector<8x324xf32> -> vector<8x324xf32>
    %c0_25 = arith.constant 0 : index
    %c0_26 = arith.constant 0 : index
    %44 = vector.load %arg5[%c0_25, %c0_26] : memref<324x256xf32, #tpu.memory_space<vmem>>, vector<324x256xf32>
    %cst_27 = arith.constant dense<0.000000e+00> : vector<8x256xf32>
    %45 = tpu.matmul %43, %44, %cst_27 {dimension_numbers = #tpu.dot_dimension_numbers<[1], [0], [0], [1], [0, 0, 1, 1], [], []>} : vector<8x324xf32>, vector<324x256xf32>, vector<8x256xf32> -> vector<8x256xf32>
    %c0_28 = arith.constant 0 : index
    %c0_29 = arith.constant 0 : index
    %46 = vector.load %arg13[%c0_28, %c0_29] : memref<8x8xf32, #tpu.memory_space<vmem>>, vector<8x8xf32>
    %cst_30 = arith.constant dense<0.000000e+00> : vector<8x256xf32>
    %47 = tpu.matmul %46, %45, %cst_30 {dimension_numbers = #tpu.dot_dimension_numbers<[1], [0], [0], [1], [0, 0, 1, 1], [], []>} : vector<8x8xf32>, vector<8x256xf32>, vector<8x256xf32> -> vector<8x256xf32>
    %c0_31 = arith.constant 0 : index
    %c0_32 = arith.constant 0 : index
    %48 = vector.load %arg14[%c0_31, %c0_32] : memref<8x1xf32, #tpu.memory_space<vmem>>, vector<8x1xf32>
    %49 = vector.broadcast %48 : vector<8x1xf32> to vector<8x256xf32>
    %50 = arith.addf %47, %49 : vector<8x256xf32>
    %cst_33 = arith.constant 0.000000e+00 : f32
    %51 = vector.broadcast %cst_33 : f32 to vector<8x256xf32>
    %52 = arith.maximumf %50, %51 : vector<8x256xf32>
    %c0_34 = arith.constant 0 : index
    %c0_35 = arith.constant 0 : index
    %53 = vector.load %arg15[%c0_34, %c0_35] : memref<16x72xf32, #tpu.memory_space<vmem>>, vector<16x72xf32>
    %c0_36 = arith.constant 0 : index
    %c0_37 = arith.constant 0 : index
    %54 = vector.load %arg16[%c0_36, %c0_37] : memref<16x1xf32, #tpu.memory_space<vmem>>, vector<16x1xf32>
    %c0_38 = arith.constant 0 : index
    %c0_39 = arith.constant 0 : index
    %55 = vector.load %arg6[%c0_38, %c0_39] : memref<286x100xf32, #tpu.memory_space<vmem>>, vector<286x100xf32>
    %56 = vector.extract_strided_slice %43 {offsets = [0, 0], sizes = [8, 286], strides = [1, 1]} : vector<8x324xf32> to vector<8x286xf32>
    %57 = vector.extract_strided_slice %43 {offsets = [0, 1], sizes = [8, 286], strides = [1, 1]} : vector<8x324xf32> to vector<8x286xf32>
    %58 = vector.extract_strided_slice %43 {offsets = [0, 2], sizes = [8, 286], strides = [1, 1]} : vector<8x324xf32> to vector<8x286xf32>
    %59 = vector.extract_strided_slice %43 {offsets = [0, 18], sizes = [8, 286], strides = [1, 1]} : vector<8x324xf32> to vector<8x286xf32>
    %60 = vector.extract_strided_slice %43 {offsets = [0, 19], sizes = [8, 286], strides = [1, 1]} : vector<8x324xf32> to vector<8x286xf32>
    %61 = vector.extract_strided_slice %43 {offsets = [0, 20], sizes = [8, 286], strides = [1, 1]} : vector<8x324xf32> to vector<8x286xf32>
    %62 = vector.extract_strided_slice %43 {offsets = [0, 36], sizes = [8, 286], strides = [1, 1]} : vector<8x324xf32> to vector<8x286xf32>
    %63 = vector.extract_strided_slice %43 {offsets = [0, 37], sizes = [8, 286], strides = [1, 1]} : vector<8x324xf32> to vector<8x286xf32>
    %64 = vector.extract_strided_slice %43 {offsets = [0, 38], sizes = [8, 286], strides = [1, 1]} : vector<8x324xf32> to vector<8x286xf32>
    %65 = tpu.concatenate %56, %57, %58, %59, %60, %61, %62, %63, %64 in 0 : vector<8x286xf32>, vector<8x286xf32>, vector<8x286xf32>, vector<8x286xf32>, vector<8x286xf32>, vector<8x286xf32>, vector<8x286xf32>, vector<8x286xf32>, vector<8x286xf32> -> vector<72x286xf32>
    %cst_40 = arith.constant dense<0.000000e+00> : vector<16x286xf32>
    %66 = tpu.matmul %53, %65, %cst_40 {dimension_numbers = #tpu.dot_dimension_numbers<[1], [0], [0], [1], [0, 0, 1, 1], [], []>} : vector<16x72xf32>, vector<72x286xf32>, vector<16x286xf32> -> vector<16x286xf32>
    %67 = vector.broadcast %54 : vector<16x1xf32> to vector<16x286xf32>
    %68 = arith.addf %66, %67 : vector<16x286xf32>
    %cst_41 = arith.constant 0.000000e+00 : f32
    %69 = vector.broadcast %cst_41 : f32 to vector<16x286xf32>
    %70 = arith.maximumf %68, %69 : vector<16x286xf32>
    %cst_42 = arith.constant dense<0.000000e+00> : vector<16x100xf32>
    %71 = tpu.matmul %70, %55, %cst_42 {dimension_numbers = #tpu.dot_dimension_numbers<[1], [0], [0], [1], [0, 0, 1, 1], [], []>} : vector<16x286xf32>, vector<286x100xf32>, vector<16x100xf32> -> vector<16x100xf32>
    %c0_43 = arith.constant 0 : index
    %c0_44 = arith.constant 0 : index
    %72 = vector.load %arg17[%c0_43, %c0_44] : memref<16x144xf32, #tpu.memory_space<vmem>>, vector<16x144xf32>
    %c0_45 = arith.constant 0 : index
    %c0_46 = arith.constant 0 : index
    %73 = vector.load %arg18[%c0_45, %c0_46] : memref<16x1xf32, #tpu.memory_space<vmem>>, vector<16x1xf32>
    %c0_47 = arith.constant 0 : index
    %c0_48 = arith.constant 0 : index
    %74 = vector.load %arg7[%c0_47, %c0_48] : memref<78x100xf32, #tpu.memory_space<vmem>>, vector<78x100xf32>
    %75 = vector.extract_strided_slice %71 {offsets = [0, 0], sizes = [16, 78], strides = [1, 1]} : vector<16x100xf32> to vector<16x78xf32>
    %76 = vector.extract_strided_slice %71 {offsets = [0, 1], sizes = [16, 78], strides = [1, 1]} : vector<16x100xf32> to vector<16x78xf32>
    %77 = vector.extract_strided_slice %71 {offsets = [0, 2], sizes = [16, 78], strides = [1, 1]} : vector<16x100xf32> to vector<16x78xf32>
    %78 = vector.extract_strided_slice %71 {offsets = [0, 10], sizes = [16, 78], strides = [1, 1]} : vector<16x100xf32> to vector<16x78xf32>
    %79 = vector.extract_strided_slice %71 {offsets = [0, 11], sizes = [16, 78], strides = [1, 1]} : vector<16x100xf32> to vector<16x78xf32>
    %80 = vector.extract_strided_slice %71 {offsets = [0, 12], sizes = [16, 78], strides = [1, 1]} : vector<16x100xf32> to vector<16x78xf32>
    %81 = vector.extract_strided_slice %71 {offsets = [0, 20], sizes = [16, 78], strides = [1, 1]} : vector<16x100xf32> to vector<16x78xf32>
    %82 = vector.extract_strided_slice %71 {offsets = [0, 21], sizes = [16, 78], strides = [1, 1]} : vector<16x100xf32> to vector<16x78xf32>
    %83 = vector.extract_strided_slice %71 {offsets = [0, 22], sizes = [16, 78], strides = [1, 1]} : vector<16x100xf32> to vector<16x78xf32>
    %84 = tpu.concatenate %75, %76, %77, %78, %79, %80, %81, %82, %83 in 0 : vector<16x78xf32>, vector<16x78xf32>, vector<16x78xf32>, vector<16x78xf32>, vector<16x78xf32>, vector<16x78xf32>, vector<16x78xf32>, vector<16x78xf32>, vector<16x78xf32> -> vector<144x78xf32>
    %cst_49 = arith.constant dense<0.000000e+00> : vector<16x78xf32>
    %85 = tpu.matmul %72, %84, %cst_49 {dimension_numbers = #tpu.dot_dimension_numbers<[1], [0], [0], [1], [0, 0, 1, 1], [], []>} : vector<16x144xf32>, vector<144x78xf32>, vector<16x78xf32> -> vector<16x78xf32>
    %86 = vector.broadcast %73 : vector<16x1xf32> to vector<16x78xf32>
    %87 = arith.addf %85, %86 : vector<16x78xf32>
    %cst_50 = arith.constant 0.000000e+00 : f32
    %88 = vector.broadcast %cst_50 : f32 to vector<16x78xf32>
    %89 = arith.maximumf %87, %88 : vector<16x78xf32>
    %cst_51 = arith.constant dense<0.000000e+00> : vector<16x100xf32>
    %90 = tpu.matmul %89, %74, %cst_51 {dimension_numbers = #tpu.dot_dimension_numbers<[1], [0], [0], [1], [0, 0, 1, 1], [], []>} : vector<16x78xf32>, vector<78x100xf32>, vector<16x100xf32> -> vector<16x100xf32>
    %c0_52 = arith.constant 0 : index
    %c0_53 = arith.constant 0 : index
    %c0_54 = arith.constant 0 : index
    %91 = vector.load %arg19[%c0_52, %c0_53, %c0_54] : memref<4x8x16xf32, #tpu.memory_space<vmem>>, vector<1x8x16xf32>
    %92 = vector.shape_cast %91 : vector<1x8x16xf32> to vector<8x16xf32>
    %cst_55 = arith.constant dense<0.000000e+00> : vector<8x100xf32>
    %93 = tpu.matmul %92, %90, %cst_55 {dimension_numbers = #tpu.dot_dimension_numbers<[1], [0], [0], [1], [0, 0, 1, 1], [], []>} : vector<8x16xf32>, vector<16x100xf32>, vector<8x100xf32> -> vector<8x100xf32>
    %c0_56 = arith.constant 0 : index
    %c0_57 = arith.constant 0 : index
    %c0_58 = arith.constant 0 : index
    %94 = vector.load %arg8[%c0_56, %c0_57, %c0_58] : memref<4x100x256xf32, #tpu.memory_space<vmem>>, vector<1x100x256xf32>
    %95 = vector.shape_cast %94 : vector<1x100x256xf32> to vector<100x256xf32>
    %cst_59 = arith.constant dense<0.000000e+00> : vector<8x256xf32>
    %96 = tpu.matmul %93, %95, %cst_59 {dimension_numbers = #tpu.dot_dimension_numbers<[1], [0], [0], [1], [0, 0, 1, 1], [], []>} : vector<8x100xf32>, vector<100x256xf32>, vector<8x256xf32> -> vector<8x256xf32>
    %c1 = arith.constant 1 : index
    %c0_60 = arith.constant 0 : index
    %c0_61 = arith.constant 0 : index
    %97 = vector.load %arg19[%c1, %c0_60, %c0_61] : memref<4x8x16xf32, #tpu.memory_space<vmem>>, vector<1x8x16xf32>
    %98 = vector.shape_cast %97 : vector<1x8x16xf32> to vector<8x16xf32>
    %cst_62 = arith.constant dense<0.000000e+00> : vector<8x100xf32>
    %99 = tpu.matmul %98, %90, %cst_62 {dimension_numbers = #tpu.dot_dimension_numbers<[1], [0], [0], [1], [0, 0, 1, 1], [], []>} : vector<8x16xf32>, vector<16x100xf32>, vector<8x100xf32> -> vector<8x100xf32>
    %c1_63 = arith.constant 1 : index
    %c0_64 = arith.constant 0 : index
    %c0_65 = arith.constant 0 : index
    %100 = vector.load %arg8[%c1_63, %c0_64, %c0_65] : memref<4x100x256xf32, #tpu.memory_space<vmem>>, vector<1x100x256xf32>
    %101 = vector.shape_cast %100 : vector<1x100x256xf32> to vector<100x256xf32>
    %cst_66 = arith.constant dense<0.000000e+00> : vector<8x256xf32>
    %102 = tpu.matmul %99, %101, %cst_66 {dimension_numbers = #tpu.dot_dimension_numbers<[1], [0], [0], [1], [0, 0, 1, 1], [], []>} : vector<8x100xf32>, vector<100x256xf32>, vector<8x256xf32> -> vector<8x256xf32>
    %103 = arith.addf %96, %102 : vector<8x256xf32>
    %c2 = arith.constant 2 : index
    %c0_67 = arith.constant 0 : index
    %c0_68 = arith.constant 0 : index
    %104 = vector.load %arg19[%c2, %c0_67, %c0_68] : memref<4x8x16xf32, #tpu.memory_space<vmem>>, vector<1x8x16xf32>
    %105 = vector.shape_cast %104 : vector<1x8x16xf32> to vector<8x16xf32>
    %cst_69 = arith.constant dense<0.000000e+00> : vector<8x100xf32>
    %106 = tpu.matmul %105, %90, %cst_69 {dimension_numbers = #tpu.dot_dimension_numbers<[1], [0], [0], [1], [0, 0, 1, 1], [], []>} : vector<8x16xf32>, vector<16x100xf32>, vector<8x100xf32> -> vector<8x100xf32>
    %c2_70 = arith.constant 2 : index
    %c0_71 = arith.constant 0 : index
    %c0_72 = arith.constant 0 : index
    %107 = vector.load %arg8[%c2_70, %c0_71, %c0_72] : memref<4x100x256xf32, #tpu.memory_space<vmem>>, vector<1x100x256xf32>
    %108 = vector.shape_cast %107 : vector<1x100x256xf32> to vector<100x256xf32>
    %cst_73 = arith.constant dense<0.000000e+00> : vector<8x256xf32>
    %109 = tpu.matmul %106, %108, %cst_73 {dimension_numbers = #tpu.dot_dimension_numbers<[1], [0], [0], [1], [0, 0, 1, 1], [], []>} : vector<8x100xf32>, vector<100x256xf32>, vector<8x256xf32> -> vector<8x256xf32>
    %110 = arith.addf %103, %109 : vector<8x256xf32>
    %c3 = arith.constant 3 : index
    %c0_74 = arith.constant 0 : index
    %c0_75 = arith.constant 0 : index
    %111 = vector.load %arg19[%c3, %c0_74, %c0_75] : memref<4x8x16xf32, #tpu.memory_space<vmem>>, vector<1x8x16xf32>
    %112 = vector.shape_cast %111 : vector<1x8x16xf32> to vector<8x16xf32>
    %cst_76 = arith.constant dense<0.000000e+00> : vector<8x100xf32>
    %113 = tpu.matmul %112, %90, %cst_76 {dimension_numbers = #tpu.dot_dimension_numbers<[1], [0], [0], [1], [0, 0, 1, 1], [], []>} : vector<8x16xf32>, vector<16x100xf32>, vector<8x100xf32> -> vector<8x100xf32>
    %c3_77 = arith.constant 3 : index
    %c0_78 = arith.constant 0 : index
    %c0_79 = arith.constant 0 : index
    %114 = vector.load %arg8[%c3_77, %c0_78, %c0_79] : memref<4x100x256xf32, #tpu.memory_space<vmem>>, vector<1x100x256xf32>
    %115 = vector.shape_cast %114 : vector<1x100x256xf32> to vector<100x256xf32>
    %cst_80 = arith.constant dense<0.000000e+00> : vector<8x256xf32>
    %116 = tpu.matmul %113, %115, %cst_80 {dimension_numbers = #tpu.dot_dimension_numbers<[1], [0], [0], [1], [0, 0, 1, 1], [], []>} : vector<8x100xf32>, vector<100x256xf32>, vector<8x256xf32> -> vector<8x256xf32>
    %117 = arith.addf %110, %116 : vector<8x256xf32>
    %c0_81 = arith.constant 0 : index
    %c0_82 = arith.constant 0 : index
    %118 = vector.load %arg20[%c0_81, %c0_82] : memref<8x1xf32, #tpu.memory_space<vmem>>, vector<8x1xf32>
    %119 = vector.broadcast %118 : vector<8x1xf32> to vector<8x256xf32>
    %120 = arith.addf %117, %119 : vector<8x256xf32>
    %cst_83 = arith.constant 0.000000e+00 : f32
    %121 = vector.broadcast %cst_83 : f32 to vector<8x256xf32>
    %122 = arith.maximumf %120, %121 : vector<8x256xf32>
    %123 = tpu.concatenate %52, %122 in 0 : vector<8x256xf32>, vector<8x256xf32> -> vector<16x256xf32>
    %c0_84 = arith.constant 0 : index
    %c0_85 = arith.constant 0 : index
    %c0_86 = arith.constant 0 : index
    %124 = vector.load %arg23[%c0_84, %c0_85, %c0_86] : memref<1x16x256xf32, #tpu.memory_space<vmem>>, vector<1x16x256xf32>
    %125 = vector.shape_cast %124 : vector<1x16x256xf32> to vector<16x256xf32>
    %126 = vector.shape_cast %123 : vector<16x256xf32> to vector<1x16x256xf32>
    tpu.vector_store %arg23[%c0_84, %c0_85, %c0_86], %126 {strides = array<i32>} : memref<1x16x256xf32, #tpu.memory_space<vmem>>, vector<1x16x256xf32>,
    %c0_87 = arith.constant 0 : index
    %c0_88 = arith.constant 0 : index
    %127 = vector.load %arg21[%c0_87, %c0_88] : memref<32x16xf32, #tpu.memory_space<vmem>>, vector<32x16xf32>
    %cst_89 = arith.constant dense<0.000000e+00> : vector<32x256xf32>
    %128 = tpu.matmul %127, %123, %cst_89 {dimension_numbers = #tpu.dot_dimension_numbers<[1], [0], [0], [1], [0, 0, 1, 1], [], []>} : vector<32x16xf32>, vector<16x256xf32>, vector<32x256xf32> -> vector<32x256xf32>
    %c0_90 = arith.constant 0 : index
    %c0_91 = arith.constant 0 : index
    %129 = vector.load %arg22[%c0_90, %c0_91] : memref<32x1xf32, #tpu.memory_space<vmem>>, vector<32x1xf32>
    %130 = vector.broadcast %129 : vector<32x1xf32> to vector<32x256xf32>
    %131 = arith.addf %128, %130 : vector<32x256xf32>
    %132 = vector.extract_strided_slice %131 {offsets = [0, 0], sizes = [6, 256], strides = [1, 1]} : vector<32x256xf32> to vector<6x256xf32>
    %c0_92 = arith.constant 0 : index
    %c0_93 = arith.constant 0 : index
    %c0_94 = arith.constant 0 : index
    %133 = vector.load %arg24[%c0_92, %c0_93, %c0_94] : memref<1x6x256xf32, #tpu.memory_space<vmem>>, vector<1x6x256xf32>
    %134 = vector.shape_cast %133 : vector<1x6x256xf32> to vector<6x256xf32>
    %135 = vector.shape_cast %132 : vector<6x256xf32> to vector<1x6x256xf32>
    tpu.vector_store %arg24[%c0_92, %c0_93, %c0_94], %135 {strides = array<i32>} : memref<1x6x256xf32, #tpu.memory_space<vmem>>, vector<1x6x256xf32>,
    %136 = vector.extract_strided_slice %131 {offsets = [8, 0], sizes = [14, 256], strides = [1, 1]} : vector<32x256xf32> to vector<14x256xf32>
    %c0_95 = arith.constant 0 : index
    %c0_96 = arith.constant 0 : index
    %c0_97 = arith.constant 0 : index
    %137 = vector.load %arg25[%c0_95, %c0_96, %c0_97] : memref<1x14x256xf32, #tpu.memory_space<vmem>>, vector<1x14x256xf32>
    %138 = vector.shape_cast %137 : vector<1x14x256xf32> to vector<14x256xf32>
    %139 = vector.shape_cast %136 : vector<14x256xf32> to vector<1x14x256xf32>
    tpu.vector_store %arg25[%c0_95, %c0_96, %c0_97], %139 {strides = array<i32>} : memref<1x14x256xf32, #tpu.memory_space<vmem>>, vector<1x14x256xf32>,
    %140 = vector.extract_strided_slice %131 {offsets = [24, 0], sizes = [4, 256], strides = [1, 1]} : vector<32x256xf32> to vector<4x256xf32>
    %c0_98 = arith.constant 0 : index
    %c0_99 = arith.constant 0 : index
    %c0_100 = arith.constant 0 : index
    %141 = vector.load %arg26[%c0_98, %c0_99, %c0_100] : memref<1x4x256xf32, #tpu.memory_space<vmem>>, vector<1x4x256xf32>
    %142 = vector.shape_cast %141 : vector<1x4x256xf32> to vector<4x256xf32>
    %143 = vector.shape_cast %140 : vector<4x256xf32> to vector<1x4x256xf32>
    tpu.vector_store %arg26[%c0_98, %c0_99, %c0_100], %143 {strides = array<i32>} : memref<1x4x256xf32, #tpu.memory_space<vmem>>, vector<1x4x256xf32>,
    return
  }
  func.func @transform_0(%arg0: i32) -> (i32, i32, i32) {
    %c0_i32 = arith.constant 0 : i32
    %c0_i32_0 = arith.constant 0 : i32
    %c0_i32_1 = arith.constant 0 : i32
    return %arg0, %c0_i32, %c0_i32_0 : i32, i32, i32
  }
  func.func @transform_1(%arg0: i32) -> (i32, i32) {
    %c0_i32 = arith.constant 0 : i32
    %c0_i32_0 = arith.constant 0 : i32
    %c0_i32_1 = arith.constant 0 : i32
    return %c0_i32, %c0_i32_0 : i32, i32
  }
  func.func @transform_2(%arg0: i32) -> (i32, i32) {
    %c0_i32 = arith.constant 0 : i32
    %c0_i32_0 = arith.constant 0 : i32
    %c0_i32_1 = arith.constant 0 : i32
    return %c0_i32, %c0_i32_0 : i32, i32
  }
  func.func @transform_3(%arg0: i32) -> (i32, i32) {
    %c0_i32 = arith.constant 0 : i32
    %c0_i32_0 = arith.constant 0 : i32
    %c0_i32_1 = arith.constant 0 : i32
    return %c0_i32, %c0_i32_0 : i32, i32
  }
  func.func @transform_4(%arg0: i32) -> (i32, i32) {
    %c0_i32 = arith.constant 0 : i32
    %c0_i32_0 = arith.constant 0 : i32
    %c0_i32_1 = arith.constant 0 : i32
    return %c0_i32, %c0_i32_0 : i32, i32
  }
  func.func @transform_5(%arg0: i32) -> (i32, i32) {
    %c0_i32 = arith.constant 0 : i32
    %c0_i32_0 = arith.constant 0 : i32
    %c0_i32_1 = arith.constant 0 : i32
    return %c0_i32, %c0_i32_0 : i32, i32
  }
  func.func @transform_6(%arg0: i32) -> (i32, i32) {
    %c0_i32 = arith.constant 0 : i32
    %c0_i32_0 = arith.constant 0 : i32
    %c0_i32_1 = arith.constant 0 : i32
    return %c0_i32, %c0_i32_0 : i32, i32
  }
  func.func @transform_7(%arg0: i32) -> (i32, i32, i32) {
    %c0_i32 = arith.constant 0 : i32
    %c0_i32_0 = arith.constant 0 : i32
    %c0_i32_1 = arith.constant 0 : i32
    %c0_i32_2 = arith.constant 0 : i32
    return %c0_i32, %c0_i32_0, %c0_i32_1 : i32, i32, i32
  }
  func.func @transform_8(%arg0: i32) -> (i32, i32) {
    %c0_i32 = arith.constant 0 : i32
    %c0_i32_0 = arith.constant 0 : i32
    %c0_i32_1 = arith.constant 0 : i32
    return %c0_i32, %c0_i32_0 : i32, i32
  }
  func.func @transform_9(%arg0: i32) -> (i32, i32) {
    %c0_i32 = arith.constant 0 : i32
    %c0_i32_0 = arith.constant 0 : i32
    %c0_i32_1 = arith.constant 0 : i32
    return %c0_i32, %c0_i32_0 : i32, i32
  }
  func.func @transform_10(%arg0: i32) -> (i32, i32) {
    %c0_i32 = arith.constant 0 : i32
    %c0_i32_0 = arith.constant 0 : i32
    %c0_i32_1 = arith.constant 0 : i32
    return %c0_i32, %c0_i32_0 : i32, i32
  }
  func.func @transform_11(%arg0: i32) -> (i32, i32) {
    %c0_i32 = arith.constant 0 : i32
    %c0_i32_0 = arith.constant 0 : i32
    %c0_i32_1 = arith.constant 0 : i32
    return %c0_i32, %c0_i32_0 : i32, i32
  }
  func.func @transform_12(%arg0: i32) -> (i32, i32) {
    %c0_i32 = arith.constant 0 : i32
    %c0_i32_0 = arith.constant 0 : i32
    %c0_i32_1 = arith.constant 0 : i32
    return %c0_i32, %c0_i32_0 : i32, i32
  }
  func.func @transform_13(%arg0: i32) -> (i32, i32) {
    %c0_i32 = arith.constant 0 : i32
    %c0_i32_0 = arith.constant 0 : i32
    %c0_i32_1 = arith.constant 0 : i32
    return %c0_i32, %c0_i32_0 : i32, i32
  }
  func.func @transform_14(%arg0: i32) -> (i32, i32) {
    %c0_i32 = arith.constant 0 : i32
    %c0_i32_0 = arith.constant 0 : i32
    %c0_i32_1 = arith.constant 0 : i32
    return %c0_i32, %c0_i32_0 : i32, i32
  }
  func.func @transform_15(%arg0: i32) -> (i32, i32) {
    %c0_i32 = arith.constant 0 : i32
    %c0_i32_0 = arith.constant 0 : i32
    %c0_i32_1 = arith.constant 0 : i32
    return %c0_i32, %c0_i32_0 : i32, i32
  }
  func.func @transform_16(%arg0: i32) -> (i32, i32) {
    %c0_i32 = arith.constant 0 : i32
    %c0_i32_0 = arith.constant 0 : i32
    %c0_i32_1 = arith.constant 0 : i32
    return %c0_i32, %c0_i32_0 : i32, i32
  }
  func.func @transform_17(%arg0: i32) -> (i32, i32) {
    %c0_i32 = arith.constant 0 : i32
    %c0_i32_0 = arith.constant 0 : i32
    %c0_i32_1 = arith.constant 0 : i32
    return %c0_i32, %c0_i32_0 : i32, i32
  }
  func.func @transform_18(%arg0: i32) -> (i32, i32, i32) {
    %c0_i32 = arith.constant 0 : i32
    %c0_i32_0 = arith.constant 0 : i32
    %c0_i32_1 = arith.constant 0 : i32
    %c0_i32_2 = arith.constant 0 : i32
    return %c0_i32, %c0_i32_0, %c0_i32_1 : i32, i32, i32
  }
  func.func @transform_19(%arg0: i32) -> (i32, i32) {
    %c0_i32 = arith.constant 0 : i32
    %c0_i32_0 = arith.constant 0 : i32
    %c0_i32_1 = arith.constant 0 : i32
    return %c0_i32, %c0_i32_0 : i32, i32
  }
  func.func @transform_20(%arg0: i32) -> (i32, i32) {
    %c0_i32 = arith.constant 0 : i32
    %c0_i32_0 = arith.constant 0 : i32
    %c0_i32_1 = arith.constant 0 : i32
    return %c0_i32, %c0_i32_0 : i32, i32
  }
  func.func @transform_21(%arg0: i32) -> (i32, i32) {
    %c0_i32 = arith.constant 0 : i32
    %c0_i32_0 = arith.constant 0 : i32
    %c0_i32_1 = arith.constant 0 : i32
    return %c0_i32, %c0_i32_0 : i32, i32
  }
  func.func @transform_22(%arg0: i32) -> (i32, i32, i32) {
    %c0_i32 = arith.constant 0 : i32
    %c0_i32_0 = arith.constant 0 : i32
    %c0_i32_1 = arith.constant 0 : i32
    return %arg0, %c0_i32, %c0_i32_0 : i32, i32, i32
  }
  func.func @transform_23(%arg0: i32) -> (i32, i32, i32) {
    %c0_i32 = arith.constant 0 : i32
    %c0_i32_0 = arith.constant 0 : i32
    %c0_i32_1 = arith.constant 0 : i32
    return %arg0, %c0_i32, %c0_i32_0 : i32, i32, i32
  }
  func.func @transform_24(%arg0: i32) -> (i32, i32, i32) {
    %c0_i32 = arith.constant 0 : i32
    %c0_i32_0 = arith.constant 0 : i32
    %c0_i32_1 = arith.constant 0 : i32
    return %arg0, %c0_i32, %c0_i32_0 : i32, i32, i32
  }
  func.func @transform_25(%arg0: i32) -> (i32, i32, i32) {
    %c0_i32 = arith.constant 0 : i32
    %c0_i32_0 = arith.constant 0 : i32
    %c0_i32_1 = arith.constant 0 : i32
    return %arg0, %c0_i32, %c0_i32_0 : i32, i32, i32
  }
}

</mosaic_0001>

<bundles_post_ra>
// kernel: pallas_bev_w_head.1
= control target key start
LH: loop header
LB: loop body
LE: loop exit
PB: predicated region body
PF: predicated region fallthrough
CT: control target
= control target key end

     0   :  { %s5928_s29 = smov 0   ;;  %s7920_s0 = inlined_call_operand.vmem [shape: f32[2,4,256], index: 0, kind: input, shape index: {}]   ;;  %s7921_s1 = inlined_call_operand.vmem [shape: f32[8,4], index: 1, kind: input, shape index: {}]   ;;  %s7922_s2 = inlined_call_operand.vmem [shape: f32[256,324], index: 2, kind: input, shape index: {}]   ;;  %s7923_s3 = inlined_call_operand.vmem [shape: f32[286,324], index: 3, kind: input, shape index: {}]   ;;  %s7924_s4 = inlined_call_operand.vmem [shape: f32[324,256], index: 4, kind: input, shape index: {}]   ;;  %s7925_s5 = inlined_call_operand.vmem [shape: f32[286,100], index: 5, kind: input, shape index: {}]   ;;  %s7926_s6 = inlined_call_operand.vmem [shape: f32[78,100], index: 6, kind: input, shape index: {}]   ;;  %s7927_s7 = inlined_call_operand.vmem [shape: f32[4,100,256], index: 7, kind: input, shape index: {}]   ;;  %s7928_s8 = inlined_call_operand.vmem [shape: f32[8,72], index: 8, kind: input, shape index: {}]   ;;  %s7929_s9 = inlined_call_operand.vmem [shape: f32[8,1], index: 9, kind: input, shape index: {}]   ;;  %s7930_s10 = inlined_call_operand.vmem [shape: f32[8,72], index: 10, kind: input, shape index: {}]   ;;  %s7931_s11 = inlined_call_operand.vmem [shape: f32[8,1], index: 11, kind: input, shape index: {}]   ;;  %s7932_s12 = inlined_call_operand.vmem [shape: f32[8,8], index: 12, kind: input, shape index: {}]   ;;  %s7933_s13 = inlined_call_operand.vmem [shape: f32[8,1], index: 13, kind: input, shape index: {}]   ;;  %s7934_s14 = inlined_call_operand.vmem [shape: f32[16,72], index: 14, kind: input, shape index: {}]   ;;  %s7935_s15 = inlined_call_operand.vmem [shape: f32[16,1], index: 15, kind: input, shape index: {}]   ;;  %s7936_s16 = inlined_call_operand.vmem [shape: f32[16,144], index: 16, kind: input, shape index: {}]   ;;  %s7937_s17 = inlined_call_operand.vmem [shape: f32[16,1], index: 17, kind: input, shape index: {}]   ;;  %s7938_s18 = inlined_call_operand.vmem [shape: f32[4,8,16], index: 18, kind: input, shape index: {}]   ;;  %s7939_s19 = inlined_call_operand.vmem [shape: f32[8,1], index: 19, kind: input, shape index: {}]   ;;  %s7940_s20 = inlined_call_operand.vmem [shape: f32[32,16], index: 20, kind: input, shape index: {}]   ;;  %s7941_s21 = inlined_call_operand.vmem [shape: f32[32,1], index: 21, kind: input, shape index: {}]   ;;  %s7942_s22 = inlined_call_operand.vmem [shape: f32[2,16,256], index: 22, kind: output, shape index: {0}]   ;;  %s7943_s23 = inlined_call_operand.vmem [shape: f32[2,6,256], index: 23, kind: output, shape index: {1}]   ;;  %s7944_s24 = inlined_call_operand.vmem [shape: f32[2,14,256], index: 24, kind: output, shape index: {2}]   ;;  %s7945_s25 = inlined_call_operand.vmem [shape: f32[2,4,256], index: 25, kind: output, shape index: {3}]  }
   0x1   :  { %7977 = sst [smem:[#allocation4_spill]] %s7920_s0 }
   0x2   :  { %7978 = sst [smem:[#allocation5_spill]] %s7921_s1 }
   0x3   :  { %7979 = sst [smem:[#allocation6_spill]] %s7922_s2 }
   0x4   :  { %7980 = sst [smem:[#allocation7_spill]] %s7923_s3 }
   0x5   :  { %7981 = sst [smem:[#allocation8_spill]] %s7924_s4 }
   0x6   :  { %7982 = sst [smem:[#allocation9_spill]] %s7925_s5 }
   0x7   :  { %7983 = sst [smem:[#allocation10_spill]] %s7926_s6 }
   0x8   :  { %7984 = sst [smem:[#allocation11_spill]] %s7927_s7 }
   0x9   :  { %7985 = sst [smem:[#allocation12_spill]] %s7928_s8 }
   0xa   :  { %7986 = sst [smem:[#allocation13_spill]] %s7929_s9 }
   0xb   :  { %7987 = sst [smem:[#allocation14_spill]] %s7930_s10 }
   0xc   :  { %7988 = sst [smem:[#allocation15_spill]] %s7931_s11 }
   0xd   :  { %7989 = sst [smem:[#allocation16_spill]] %s7943_s23 }
   0xe   :  { %7990 = sst [smem:[#allocation17_spill]] %s7944_s24 }
   0xf   :  { %7991 = sst [smem:[#allocation18_spill]] %s7945_s25 }
  0x10 LB: > { %7992 = sst [smem:[#allocation2_spill]] %s5778_s29  ;;  %s4376_s2 = sadd.s32 4294967295, %s5778_s29   ;;  %s5778_s29 = sphi %s5928_s29, %s36_s29  }
  0x11   : > { %p4380_p0 = scmp.ge.s32.totalorder %s5778_s29, 1  ;;  %p694_p1 = scmp.lt.s32.totalorder %s5778_s29, 3 }
  0x13   : > { %p695_p2 = pnand %p4380_p0, %p694_p1 }
  0x15   : > { %698 = sbr.rel (%p695_p2) target bundleno = 3601 (0xe11), region = 108 }
  0x1c   : > { %p777_p3 = scmp.lt.s32.totalorder %s4376_s2, 1  ;;  %s7993_s7 = sld [smem:[#allocation6_spill]]  ;;  %v7969_v1 = vmov 0.0   ;;  %vm810_vm0 = vcmask 1043456   ;;  %vm806_vm1 = vcmask 31744   ;;  %vm1266_vm2 = vcmask 900096  }
  0x1d   : > { %879 = vmatprep.mubr.f32.mxu0 %v7969_v1  ;;  %s7994_s0 = sld [smem:[#allocation4_spill]]  ;;  %s7963_s30 = smov 127   ;;  %vm1242_vm3 = vcmask 1039360   ;;  %vm1254_vm4 = vcmask 1031168   ;;  %vm1290_vm5 = vcmask 883712   ;;  %vm1278_vm6 = vcmask 891904  }
  0x1e   : > { %s8025_s2 = smov (!%p777_p3, %s4376_s2), 1  ;;  %s7953_s3 = smov 108   ;;  %vm1314_vm7 = vcmask 744448   ;;  %vm1302_vm8 = vcmask 752640   ;;  %vm1326_vm9 = vcmask 736256   ;;  %vm1337_vm10 = vcmask 588800  }
  0x1f   : > { %s7952_s28 = sshll.u32 %s8025_s2, 3  ;;  %s7967_s26 = smov 126   ;;  %vm5791_vm11 = vmmov 0   ;;  %vm1489_vm12 = vcmask 1045504   ;;  %vm5792_vm13 = vmmov 1   ;;  %vm1485_vm15 = vcmask 244736  }
  0x20   : > { %s7961_s1 = smov 109   ;;  %s7959_s8 = smov 92   ;;  %vm6810_vm14 = vmpackc.low %vm1489_vm12, %vm5792_vm13 }
  0x21   : > { %s7957_s27 = smov 91   ;;  %s7965_s4 = smov 90  }
  0x22   : > { %v887_v0 = vld [vmem:[%s7993_s7 + $0x8] sm:$0xff]  ;;  %v890_v2 = vld [vmem:[%s7993_s7 + $0x20] sm:$0xff]  ;;  %v889_v4 = vld [vmem:[%s7993_s7 + $0x18] sm:$0xff]  ;;  %s7998_s9 = sld [smem:[#allocation12_spill]]  ;;  %s8012_s11 = sld [smem:[#allocation15_spill]] }
  0x23   : > { %v886_v3 = vld [vmem:[%s7993_s7] sm:$0xff]  ;;  %v4893_v5 = vpack.c.bf16 %v890_v2, %v887_v0  ;;  %v893_v7 = vld [vmem:[%s7993_s7 + $0x38] sm:$0xff]  ;;  %v896_v8 = vld [vmem:[%s7993_s7 + $0x50] sm:$0xff]  ;;  %s781_s6 = scalar_lea.vmem %s7994_s0, %s7952_s28  ;;  %s7996_s0 = sld [smem:[#allocation13_spill]] }
  0x24   : > { %v4895_v6 = vpack.c.bf16 %v889_v4, %v886_v3  ;;  %v892_v9 = vld [vmem:[%s7993_s7 + $0x30] sm:$0xff]  ;;  %v4897_v10 = vpack.c.bf16 %v896_v8, %v893_v7  ;;  %v895_v11 = vld [vmem:[%s7993_s7 + $0x48] sm:$0xff]  ;;  %v902_v13 = vld [vmem:[%s7993_s7 + $0x80] sm:$0xff]  ;;  %s8004_s28 = smov 126   ;;  %s8013_s10 = sld [smem:[#allocation14_spill]] }
  0x25   : > { %v899_v12 = vld [vmem:[%s7993_s7 + $0x68] sm:$0xff]  ;;  %4894 = vmatprep.subr.bf16.mxu1 %v4893_v5  ;;  %v4899_v14 = vpack.c.bf16 %v895_v11, %v892_v9  ;;  %v802_v15 = vld [vmem:[%s781_s6] sm:$0xff]  ;;  %v901_v18 = vld [vmem:[%s7993_s7 + $0x78] sm:$0xff]  ;;  %s7995_s6 = sld [smem:[#allocation5_spill]]  ;;  %s8016_s25 = sld [smem:[#allocation9_spill]] }
  0x26   : > { %4896 = vmatpush1.bf16.msra.mxu1 %v4895_v6  ;;  %v4901_v16 = vpack.c.bf16 %v902_v13, %v899_v12  ;;  %v898_v17 = vld [vmem:[%s7993_s7 + $0x60] sm:$0xff]  ;;  %v805_v19 = vcombine.high %v802_v15, %v802_v15  ;;  %v905_v20 = vld [vmem:[%s7993_s7 + $0x98] sm:$0xff]  ;;  %v908_v21 = vld [vmem:[%s7993_s7 + $0xb0] sm:$0xff]  ;;  %s5793_s24 = smov 118   ;;  %s8019_s23 = sld [smem:[#allocation16_spill]] }
  0x27   : > { %4898 = vmatprep.subr.bf16.mxu1 %v4897_v10  ;;  %v4903_v23 = vpack.c.bf16 %v901_v18, %v898_v17  ;;  %v4905_v24 = vpack.c.bf16 %v908_v21, %v905_v20  ;;  %v904_v25 = vld [vmem:[%s7993_s7 + $0x90] sm:$0xff]  ;;  %v907_v26 = vld [vmem:[%s7993_s7 + $0xa8] sm:$0xff]  ;;  %v914_v28 = vld [vmem:[%s7993_s7 + $0xe0] sm:$0xff] }
  0x28   : > { %4391 = vmatprep.subr.msk.mxu0 %vm810_vm0, %v805_v19  ;;  %v911_v27 = vld [vmem:[%s7993_s7 + $0xc8] sm:$0xff]  ;;  %v936_v29 = vld [vmem:[%s7993_s7 + $0x190] sm:$0xff]  ;;  %v4907_v31 = vpack.c.bf16 %v907_v26, %v904_v25  ;;  %v910_v32 = vld [vmem:[%s7993_s7 + $0xc0] sm:$0xff] }
  0x29   : > { %4392 = vmatpush1.msk.msra.mxu0 %vm810_vm0, %v802_v15  ;;  %v939_v30 = vld [vmem:[%s7993_s7 + $0x1a8] sm:$0xff]  ;;  %v888_v34 = vld [vmem:[%s7993_s7 + $0x10] sm:$0xff]  ;;  %v4909_v35 = vpack.c.bf16 %v914_v28, %v911_v27  ;;  %v913_v36 = vld [vmem:[%s7993_s7 + $0xd8] sm:$0xff] }
  0x2a   : > { %4900 = vmatpush1.bf16.msra.mxu1 %v4899_v14  ;;  %v4957_v33 = vpack.c.bf16 %v939_v30, %v936_v29  ;;  %v917_v37 = vld [vmem:[%s7993_s7 + $0xf8] sm:$0xff]  ;;  %v891_v38 = vld [vmem:[%s7993_s7 + $0x28] sm:$0xff]  ;;  %v920_v39 = vld [vmem:[%s7993_s7 + $0x110] sm:$0xff]  ;;  %v4911_v46 = vpack.c.bf16 %v913_v36, %v910_v32 }
  0x2b   : > { %v803_v22 = vld [vmem:[%s7995_s6] sm:$0xff]  ;;  %4902 = vmatprep.subr.bf16.mxu1 %v4901_v16  ;;  %v4959_v40 = vpack.c.bf16 %v891_v38, %v888_v34  ;;  %v945_v42 = vld [vmem:[%s7993_s7 + $0x1d8] sm:$0xff]  ;;  %v916_v47 = vld [vmem:[%s7993_s7 + $0xf0] sm:$0xff]  ;;  %v4913_v50 = vpack.c.bf16 %v920_v39, %v917_v37  ;;  %s7955_s6 = smov 110  }
  0x2c   : > { %4393 = vmatmul.mubr.msk.f32.vlgmr.msra.gmra.mrb[0].mxu0 %vm806_vm1, %v803_v22  ;;  %4958 = vmatprep.subr.bf16.mxu0 %v4957_v33  ;;  %v942_v41 = vld [vmem:[%s7993_s7 + $0x1c0] sm:$0xff]  ;;  %v897_v45 = vld [vmem:[%s7993_s7 + $0x58] sm:$0xff]  ;;  %v948_v49 = vld [vmem:[%s7993_s7 + $0x1f0] sm:$0xff]  ;;  %vm2393_vm1 = vcmask 556032  }
  0x2d   : > { %v4961_v43 = vpack.c.bf16 %v945_v42, %v942_v41  ;;  %v894_v44 = vld [vmem:[%s7993_s7 + $0x40] sm:$0xff]  ;;  %4960 = vmatpush3.bf16.msra.mxu0 %v4959_v40  ;;  %v919_v51 = vld [vmem:[%s7993_s7 + $0x108] sm:$0xff]  ;;  %v900_v56 = vld [vmem:[%s7993_s7 + $0x70] sm:$0xff] }
  0x2e   : > { %4904 = vmatpush1.bf16.msra.mxu1 %v4903_v23  ;;  %v4963_v48 = vpack.c.bf16 %v897_v45, %v894_v44  ;;  %v923_v52 = vld [vmem:[%s7993_s7 + $0x128] sm:$0xff]  ;;  %v926_v54 = vld [vmem:[%s7993_s7 + $0x140] sm:$0xff]  ;;  %v957_v59 = vld [vmem:[%s7993_s7 + $0x238] sm:$0xff]  ;;  %v4915_v60 = vpack.c.bf16 %v919_v51, %v916_v47 }
  0x2f   : > { %4906 = vmatprep.subr.bf16.mxu1 %v4905_v24  ;;  %4962 = vmatprep.subr.bf16.mxu0 %v4961_v43  ;;  %v951_v53 = vld [vmem:[%s7993_s7 + $0x208] sm:$0xff]  ;;  %v954_v58 = vld [vmem:[%s7993_s7 + $0x220] sm:$0xff]  ;;  %v925_v62 = vld [vmem:[%s7993_s7 + $0x138] sm:$0xff]  ;;  %v4917_v0 = vpack.c.bf16 %v926_v54, %v923_v52 }
  0x30   : > { %v4965_v55 = vpack.c.bf16 %v951_v53, %v948_v49  ;;  %v903_v57 = vld [vmem:[%s7993_s7 + $0x88] sm:$0xff]  ;;  %v922_v61 = vld [vmem:[%s7993_s7 + $0x120] sm:$0xff]  ;;  %v929_v2 = vld [vmem:[%s7993_s7 + $0x158] sm:$0xff]  ;;  %v4969_v3 = vpack.c.bf16 %v957_v59, %v954_v58 }
  0x31   : > { %4964 = vmatpush3.bf16.msra.mxu0 %v4963_v48  ;;  %v4967_v63 = vpack.c.bf16 %v903_v57, %v900_v56  ;;  %v906_v4 = vld [vmem:[%s7993_s7 + $0xa0] sm:$0xff]  ;;  %v909_v5 = vld [vmem:[%s7993_s7 + $0xb8] sm:$0xff]  ;;  %v932_v6 = vld [vmem:[%s7993_s7 + $0x170] sm:$0xff]  ;;  %v4919_v9 = vpack.c.bf16 %v925_v62, %v922_v61 }
  0x32   : > { %4908 = vmatpush1.bf16.msra.mxu1 %v4907_v31  ;;  %4966 = vmatprep.subr.bf16.mxu0 %v4965_v55  ;;  %v960_v7 = vld [vmem:[%s7993_s7 + $0x250] sm:$0xff]  ;;  %v963_v8 = vld [vmem:[%s7993_s7 + $0x268] sm:$0xff]  ;;  %v4971_v12 = vpack.c.bf16 %v909_v5, %v906_v4  ;;  %v4921_v13 = vpack.c.bf16 %v932_v6, %v929_v2  ;;  %v938_v18 = vld [vmem:[%s7993_s7 + $0x1a0] sm:$0xff] }
  0x33   : > { %4910 = vmatprep.subr.bf16.mxu1 %v4909_v35  ;;  %v928_v10 = vld [vmem:[%s7993_s7 + $0x150] sm:$0xff]  ;;  %v931_v11 = vld [vmem:[%s7993_s7 + $0x168] sm:$0xff]  ;;  %v4973_v15 = vpack.c.bf16 %v963_v8, %v960_v7  ;;  %v966_v19 = vld [vmem:[%s7993_s7 + $0x280] sm:$0xff] }
  0x34   : > { %v935_v14 = vld [vmem:[%s7993_s7 + $0x188] sm:$0xff]  ;;  %v912_v16 = vld [vmem:[%s7993_s7 + $0xd0] sm:$0xff]  ;;  %v969_v20 = vld [vmem:[%s7993_s7 + $0x298] sm:$0xff]  ;;  %v4923_v21 = vpack.c.bf16 %v931_v11, %v928_v10 }
  0x35   : > { %4968 = vmatpush3.bf16.msra.mxu0 %v4967_v63  ;;  %v915_v17 = vld [vmem:[%s7993_s7 + $0xe8] sm:$0xff]  ;;  %v934_v22 = vld [vmem:[%s7993_s7 + $0x180] sm:$0xff]  ;;  %v937_v23 = vld [vmem:[%s7993_s7 + $0x198] sm:$0xff]  ;;  %v4925_v25 = vpack.c.bf16 %v938_v18, %v935_v14  ;;  %v4977_v27 = vpack.c.bf16 %v969_v20, %v966_v19 }
  0x36   : > { %4912 = vmatpush1.bf16.msra.mxu1 %v4911_v46  ;;  %4970 = vmatprep.subr.bf16.mxu0 %v4969_v3  ;;  %v4975_v24 = vpack.c.bf16 %v915_v17, %v912_v16  ;;  %v941_v26 = vld [vmem:[%s7993_s7 + $0x1b8] sm:$0xff]  ;;  %v918_v28 = vld [vmem:[%s7993_s7 + $0x100] sm:$0xff]  ;;  %v944_v30 = vld [vmem:[%s7993_s7 + $0x1d0] sm:$0xff]  ;;  %v4927_v33 = vpack.c.bf16 %v937_v23, %v934_v22 }
  0x37   : > { %4914 = vmatprep.subr.bf16.mxu1 %v4913_v50  ;;  %v921_v29 = vld [vmem:[%s7993_s7 + $0x118] sm:$0xff]  ;;  %v972_v31 = vld [vmem:[%s7993_s7 + $0x2b0] sm:$0xff]  ;;  %v975_v32 = vld [vmem:[%s7993_s7 + $0x2c8] sm:$0xff]  ;;  %v4929_v37 = vpack.c.bf16 %v944_v30, %v941_v26 }
  0x38   : > { %v940_v34 = vld [vmem:[%s7993_s7 + $0x1b0] sm:$0xff]  ;;  %v943_v35 = vld [vmem:[%s7993_s7 + $0x1c8] sm:$0xff]  ;;  %v4979_v36 = vpack.c.bf16 %v921_v29, %v918_v28  ;;  %v4981_v39 = vpack.c.bf16 %v975_v32, %v972_v31  ;;  %v950_v42 = vld [vmem:[%s7993_s7 + $0x200] sm:$0xff] }
  0x39   : > { %4972 = vmatpush3.bf16.msra.mxu0 %v4971_v12  ;;  %v947_v38 = vld [vmem:[%s7993_s7 + $0x1e8] sm:$0xff]  ;;  %v924_v40 = vld [vmem:[%s7993_s7 + $0x130] sm:$0xff]  ;;  %v978_v43 = vld [vmem:[%s7993_s7 + $0x2e0] sm:$0xff]  ;;  %v4931_v45 = vpack.c.bf16 %v943_v35, %v940_v34 }
  0x3a   : > { %4916 = vmatpush1.bf16.msra.mxu1 %v4915_v60  ;;  %4974 = vmatprep.subr.bf16.mxu0 %v4973_v15  ;;  %v927_v41 = vld [vmem:[%s7993_s7 + $0x148] sm:$0xff]  ;;  %v981_v44 = vld [vmem:[%s7993_s7 + $0x2f8] sm:$0xff]  ;;  %v4933_v47 = vpack.c.bf16 %v950_v42, %v947_v38  ;;  %v946_v48 = vld [vmem:[%s7993_s7 + $0x1e0] sm:$0xff] }
  0x3b   : > { %4918 = vmatprep.subr.bf16.mxu1 %v4917_v0  ;;  %v4983_v46 = vpack.c.bf16 %v927_v41, %v924_v40  ;;  %v949_v49 = vld [vmem:[%s7993_s7 + $0x1f8] sm:$0xff]  ;;  %v4985_v50 = vpack.c.bf16 %v981_v44, %v978_v43  ;;  %v956_v52 = vld [vmem:[%s7993_s7 + $0x230] sm:$0xff]  ;;  %v955_v56 = vld [vmem:[%s7993_s7 + $0x228] sm:$0xff] }
  0x3c   : > { %v953_v51 = vld [vmem:[%s7993_s7 + $0x218] sm:$0xff]  ;;  %v4935_v53 = vpack.c.bf16 %v949_v49, %v946_v48  ;;  %v952_v55 = vld [vmem:[%s7993_s7 + $0x210] sm:$0xff]  ;;  %v959_v57 = vld [vmem:[%s7993_s7 + $0x248] sm:$0xff] }
  0x3d   : > { %4976 = vmatpush3.bf16.msra.mxu0 %v4975_v24  ;;  %v4937_v54 = vpack.c.bf16 %v956_v52, %v953_v51  ;;  %v962_v58 = vld [vmem:[%s7993_s7 + $0x260] sm:$0xff]  ;;  %v4939_v59 = vpack.c.bf16 %v955_v56, %v952_v55  ;;  %v961_v62 = vld [vmem:[%s7993_s7 + $0x258] sm:$0xff]  ;;  %v968_v0 = vld [vmem:[%s7993_s7 + $0x290] sm:$0xff] }
  0x3e   : > { %4920 = vmatpush1.bf16.msra.mxu1 %v4919_v9  ;;  %4978 = vmatprep.subr.bf16.mxu0 %v4977_v27  ;;  %v4941_v60 = vpack.c.bf16 %v962_v58, %v959_v57  ;;  %v958_v61 = vld [vmem:[%s7993_s7 + $0x240] sm:$0xff]  ;;  %v965_v63 = vld [vmem:[%s7993_s7 + $0x278] sm:$0xff]  ;;  %v964_v4 = vld [vmem:[%s7993_s7 + $0x270] sm:$0xff] }
  0x3f   : > { %4922 = vmatprep.subr.bf16.mxu1 %v4921_v13  ;;  %v4943_v2 = vpack.c.bf16 %v961_v62, %v958_v61  ;;  %v4945_v3 = vpack.c.bf16 %v968_v0, %v965_v63  ;;  %v967_v5 = vld [vmem:[%s7993_s7 + $0x288] sm:$0xff]  ;;  %v974_v7 = vld [vmem:[%s7993_s7 + $0x2c0] sm:$0xff]  ;;  %v973_v11 = vld [vmem:[%s7993_s7 + $0x2b8] sm:$0xff] }
  0x40   : > { %v971_v6 = vld [vmem:[%s7993_s7 + $0x2a8] sm:$0xff]  ;;  %v4947_v8 = vpack.c.bf16 %v967_v5, %v964_v4  ;;  %v970_v10 = vld [vmem:[%s7993_s7 + $0x2a0] sm:$0xff]  ;;  %v977_v12 = vld [vmem:[%s7993_s7 + $0x2d8] sm:$0xff] }
  0x41   : > { %4980 = vmatpush3.bf16.msra.mxu0 %v4979_v36  ;;  %v4949_v9 = vpack.c.bf16 %v974_v7, %v971_v6  ;;  %v980_v13 = vld [vmem:[%s7993_s7 + $0x2f0] sm:$0xff]  ;;  %v4951_v14 = vpack.c.bf16 %v973_v11, %v970_v10  ;;  %v979_v17 = vld [vmem:[%s7993_s7 + $0x2e8] sm:$0xff]  ;;  %v930_v18 = vld [vmem:[%s7993_s7 + $0x160] sm:$0xff] }
  0x42   : > { %4924 = vmatpush1.bf16.msra.mxu1 %v4923_v21  ;;  %4982 = vmatprep.subr.bf16.mxu0 %v4981_v39  ;;  %v4953_v15 = vpack.c.bf16 %v980_v13, %v977_v12  ;;  %v976_v16 = vld [vmem:[%s7993_s7 + $0x2d0] sm:$0xff]  ;;  %v933_v20 = vld [vmem:[%s7993_s7 + $0x178] sm:$0xff]  ;;  %v1124_v30 = vld [vmem:[%s7996_s0] sm:$0xff]  ;;  %s8015_s0 = sld [smem:[#allocation8_spill]] }
  0x43   : > { %4926 = vmatprep.subr.bf16.mxu1 %v4925_v25  ;;  %v4955_v19 = vpack.c.bf16 %v979_v17, %v976_v16  ;;  %v4987_v21 = vpack.c.bf16 %v933_v20, %v930_v18 }
  0x45   : > { %4984 = vmatpush3.bf16.msra.mxu0 %v4983_v46 }
  0x46   : > { %4928 = vmatpush1.bf16.msra.mxu1 %v4927_v33  ;;  %4986 = vmatprep.subr.bf16.mxu0 %v4985_v50  ;;  %v5789_v33 = vmov 0  }
  0x47   : > { %4930 = vmatprep.subr.bf16.mxu1 %v4929_v37  ;;  %5659 = vset.pattern.permute.xlu1 %v5789_v33 }
  0x48   : > { %5730 = vset.pattern.permute.xlu0 %v5789_v33 }
  0x49   : > { %4988 = vmatpush3.bf16.msra.mxu0 %v4987_v21 }
  0x4a   : > { %4932 = vmatpush1.bf16.msra.mxu1 %v4931_v45 }
  0x4b   : > { %4934 = vmatprep.subr.bf16.mxu1 %v4933_v47 }
  0x4e   : > { %4936 = vmatpush1.bf16.msra.mxu1 %v4935_v53 }
  0x4f   : > { %4938 = vmatprep.subr.bf16.mxu1 %v4937_v54 }
  0x52   : > { %4940 = vmatpush1.bf16.msra.mxu1 %v4939_v59 }
  0x53   : > { %4942 = vmatprep.subr.bf16.mxu1 %v4941_v60 }
  0x56   : > { %4944 = vmatpush1.bf16.msra.mxu1 %v4943_v2 }
  0x57   : > { %4946 = vmatprep.subr.bf16.mxu1 %v4945_v3 }
  0x5a   : > { %4948 = vmatpush1.bf16.msra.mxu1 %v4947_v8 }
  0x5b   : > { %4950 = vmatprep.subr.bf16.mxu1 %v4949_v9 }
  0x5e   : > { %4952 = vmatpush1.bf16.msra.mxu1 %v4951_v14 }
  0x5f   : > { %4954 = vmatprep.subr.bf16.mxu1 %v4953_v15 }
  0x62   : > { %4956 = vmatpush1.bf16.msra.mxu1 %v4955_v19 }
  0xff   : > { %v881_v22 = vpop.f32.mrb[0].mxu0 }
 0x100   : > { %v883_v23 = vpop.f32.mrb[1].mxu0 }
 0x101   : > { %1046 = vmatprep.mubr.f32.mxu1 %v883_v23  ;;  %1117 = vmatprep.mubr.f32.mxu0 %v883_v23 }
 0x102   : > { %1047 = vmatmul.mubr.f32.vlgmr.msra.gmra.mrb[0].mxu1 %v881_v22  ;;  %1118 = vmatmul.mubr.f32.vlgmr.msra.gmra.mrb[2].mxu0 %v881_v22 }
 0x103   : > { %1405 = vmatprep.mubr.f32.mxu0 %v7969_v1 }
 0x1d5   : > { %v6239_v24 = vpop.f32.mrb[0].mxu1  ;;  %v4564_v25 = vpop.f32.mrb[2].mxu0 }
 0x1d6   : > { %v4565_v26 = vpop.f32.mrb[3].mxu0  ;;  %1260 = vrot.lane.b32.xlu1 %v6239_v24, %s7955_s6  ;;  %1236 = vrot.lane.b32.xlu0 %v6239_v24, %s7963_s30  ;;  %v6245_v27 = vpop.f32.mrb[1].mxu1 }
 0x1d7   : > { %v6247_v28 = vadd.f32 %v4565_v26, %v4564_v25 }
 0x1d9   : > { %v5629_v29 = vpack.i.bf16 %v6247_v28, %v6245_v27 }
 0x1da   : > { %1284 = vrot.lane.b32.xlu1 %v6239_v24, %s7953_s3  ;;  %1248 = vrot.lane.b32.xlu0 %v6239_v24, %s7967_s26 }
 0x1de   : > { %1272 = vrot.lane.b32.xlu0 %v6239_v24, %s7961_s1  ;;  %5630 = vrot.lane.b32.xlu1 %v5629_v29, %s7967_s26  ;;  %s8010_s26 = smov 91  }
 0x1e2   : > { %5635 = vrot.lane.b32.xlu1 %v5629_v29, %s7955_s6  ;;  %5625 = vrot.lane.b32.xlu0 %v5629_v29, %s7963_s30  ;;  %s7997_s6 = sld [smem:[#allocation7_spill]]  ;;  %s8008_s30 = smov 92  }
 0x1e6   : > { %5645 = vrot.lane.b32.xlu1 %v5629_v29, %s7953_s3  ;;  %1296 = vrot.lane.b32.xlu0 %v6239_v24, %s7959_s8  ;;  %s8005_s3 = smov 127  }
 0x1e8   : > { %v1126_v31 = vld [vmem:[%s7997_s6 + $0x8] sm:$0xff]  ;;  %v1129_v32 = vld [vmem:[%s7997_s6 + $0x20] sm:$0xff]  ;;  %v1128_v36 = vld [vmem:[%s7997_s6 + $0x18] sm:$0xff] }
 0x1e9   : > { %v6283_v34 = vpack.c.bf16 %v1129_v32, %v1126_v31  ;;  %v1125_v35 = vld [vmem:[%s7997_s6] sm:$0xff]  ;;  %v1132_v37 = vld [vmem:[%s7997_s6 + $0x38] sm:$0xff]  ;;  %v1135_v39 = vld [vmem:[%s7997_s6 + $0x50] sm:$0xff] }
 0x1ea   : > { %5655 = vrot.lane.b32.xlu1 %v5629_v29, %s7957_s27  ;;  %5640 = vrot.lane.b32.xlu0 %v5629_v29, %s7961_s1  ;;  %v6294_v38 = vpack.c.bf16 %v1128_v36, %v1125_v35  ;;  %v1131_v40 = vld [vmem:[%s7997_s6 + $0x30] sm:$0xff]  ;;  %v1134_v41 = vld [vmem:[%s7997_s6 + $0x48] sm:$0xff]  ;;  %v6306_v42 = vpack.c.bf16 %v1135_v39, %v1132_v37  ;;  %s8009_s1 = smov 108  }
 0x1eb   : > { %5018 = vmatprep.subr.bf16.mxu1 %v6283_v34  ;;  %v1138_v43 = vld [vmem:[%s7997_s6 + $0x68] sm:$0xff]  ;;  %v1141_v44 = vld [vmem:[%s7997_s6 + $0x80] sm:$0xff]  ;;  %v6315_v45 = vpack.c.bf16 %v1134_v41, %v1131_v40  ;;  %v1140_v48 = vld [vmem:[%s7997_s6 + $0x78] sm:$0xff] }
 0x1ec   : > { %5020 = vmatpush1.bf16.msra.mxu1 %v6294_v38  ;;  %v6318_v46 = vpack.c.bf16 %v1141_v44, %v1138_v43  ;;  %v1137_v47 = vld [vmem:[%s7997_s6 + $0x60] sm:$0xff]  ;;  %v1144_v49 = vld [vmem:[%s7997_s6 + $0x98] sm:$0xff]  ;;  %v1147_v50 = vld [vmem:[%s7997_s6 + $0xb0] sm:$0xff] }
 0x1ed   : > { %5022 = vmatprep.subr.bf16.mxu1 %v6306_v42  ;;  %v6333_v51 = vpack.c.bf16 %v1140_v48, %v1137_v47  ;;  %v6336_v52 = vpack.c.bf16 %v1147_v50, %v1144_v49  ;;  %v1143_v53 = vld [vmem:[%s7997_s6 + $0x90] sm:$0xff]  ;;  %v1146_v54 = vld [vmem:[%s7997_s6 + $0xa8] sm:$0xff]  ;;  %v1153_v56 = vld [vmem:[%s7997_s6 + $0xe0] sm:$0xff] }
 0x1ee   : > { %1308 = vrot.lane.b32.xlu1 %v6239_v24, %s7957_s27  ;;  %5650 = vrot.lane.b32.xlu0 %v5629_v29, %s7959_s8  ;;  %v1150_v55 = vld [vmem:[%s7997_s6 + $0xc8] sm:$0xff]  ;;  %v6351_v57 = vpack.c.bf16 %v1146_v54, %v1143_v53  ;;  %v1149_v59 = vld [vmem:[%s7997_s6 + $0xc0] sm:$0xff]  ;;  %s8006_s8 = smov 109   ;;  %s8007_s27 = smov 110  }
 0x1ef   : > { %v6354_v58 = vpack.c.bf16 %v1153_v56, %v1150_v55  ;;  %v1152_v60 = vld [vmem:[%s7997_s6 + $0xd8] sm:$0xff]  ;;  %v1159_v62 = vld [vmem:[%s7997_s6 + $0x110] sm:$0xff]  ;;  %v1158_v3 = vld [vmem:[%s7997_s6 + $0x108] sm:$0xff] }
 0x1f0   : > { %5024 = vmatpush1.bf16.msra.mxu1 %v6315_v45  ;;  %v1156_v61 = vld [vmem:[%s7997_s6 + $0xf8] sm:$0xff]  ;;  %v6369_v63 = vpack.c.bf16 %v1152_v60, %v1149_v59  ;;  %v1155_v2 = vld [vmem:[%s7997_s6 + $0xf0] sm:$0xff]  ;;  %v1162_v4 = vld [vmem:[%s7997_s6 + $0x128] sm:$0xff] }
 0x1f1   : > { %5026 = vmatprep.subr.bf16.mxu1 %v6318_v46  ;;  %v6372_v0 = vpack.c.bf16 %v1159_v62, %v1156_v61  ;;  %v1165_v5 = vld [vmem:[%s7997_s6 + $0x140] sm:$0xff]  ;;  %v6387_v6 = vpack.c.bf16 %v1158_v3, %v1155_v2  ;;  %v1164_v9 = vld [vmem:[%s7997_s6 + $0x138] sm:$0xff]  ;;  %v1171_v11 = vld [vmem:[%s7997_s6 + $0x170] sm:$0xff] }
 0x1f2   : > { %1324 = vrot.lane.b32.xlu1 %v6247_v28, %s7965_s4  ;;  %1322 = vrot.lane.b32.xlu0 %v6245_v27, %s7965_s4  ;;  %v6390_v7 = vpack.c.bf16 %v1165_v5, %v1162_v4  ;;  %v1161_v8 = vld [vmem:[%s7997_s6 + $0x120] sm:$0xff]  ;;  %v1168_v10 = vld [vmem:[%s7997_s6 + $0x158] sm:$0xff] }
 0x1f3   : > { %v6405_v12 = vpack.c.bf16 %v1164_v9, %v1161_v8  ;;  %v6408_v13 = vpack.c.bf16 %v1171_v11, %v1168_v10  ;;  %v1167_v14 = vld [vmem:[%s7997_s6 + $0x150] sm:$0xff]  ;;  %v1170_v15 = vld [vmem:[%s7997_s6 + $0x168] sm:$0xff]  ;;  %v1177_v17 = vld [vmem:[%s7997_s6 + $0x1a0] sm:$0xff] }
 0x1f4   : > { %5028 = vmatpush1.bf16.msra.mxu1 %v6333_v51  ;;  %v1174_v16 = vld [vmem:[%s7997_s6 + $0x188] sm:$0xff]  ;;  %v6423_v18 = vpack.c.bf16 %v1170_v15, %v1167_v14  ;;  %v1173_v20 = vld [vmem:[%s7997_s6 + $0x180] sm:$0xff]  ;;  %v1176_v21 = vld [vmem:[%s7997_s6 + $0x198] sm:$0xff] }
 0x1f5   : > { %5030 = vmatprep.subr.bf16.mxu1 %v6336_v52  ;;  %v6426_v19 = vpack.c.bf16 %v1177_v17, %v1174_v16  ;;  %v1180_v22 = vld [vmem:[%s7997_s6 + $0x1b8] sm:$0xff]  ;;  %v1183_v23 = vld [vmem:[%s7997_s6 + $0x1d0] sm:$0xff]  ;;  %v6441_v25 = vpack.c.bf16 %v1176_v21, %v1173_v20  ;;  %v1186_v31 = vld [vmem:[%s7997_s6 + $0x1e8] sm:$0xff] }
 0x1f6   : > { %1320 = vrot.lane.b32.xlu0 %v6239_v24, %s7965_s4  ;;  %1334 = vperm.xlu1 %5659, %v1124_v30   ;;  %v6444_v26 = vpack.c.bf16 %v1183_v23, %v1180_v22  ;;  %v1179_v29 = vld [vmem:[%s7997_s6 + $0x1b0] sm:$0xff]  ;;  %v1182_v30 = vld [vmem:[%s7997_s6 + $0x1c8] sm:$0xff]  ;;  %v1189_v32 = vld [vmem:[%s7997_s6 + $0x200] sm:$0xff]  ;;  %s8011_s4 = smov 90  }
 0x1f7   : > { %v6459_v33 = vpack.c.bf16 %v1182_v30, %v1179_v29  ;;  %v6462_v35 = vpack.c.bf16 %v1189_v32, %v1186_v31  ;;  %v1185_v36 = vld [vmem:[%s7997_s6 + $0x1e0] sm:$0xff]  ;;  %v1188_v37 = vld [vmem:[%s7997_s6 + $0x1f8] sm:$0xff]  ;;  %v1195_v40 = vld [vmem:[%s7997_s6 + $0x230] sm:$0xff] }
 0x1f8   : > { %5032 = vmatpush1.bf16.msra.mxu1 %v6351_v57  ;;  %v1192_v39 = vld [vmem:[%s7997_s6 + $0x218] sm:$0xff]  ;;  %v6477_v41 = vpack.c.bf16 %v1188_v37, %v1185_v36  ;;  %v1191_v44 = vld [vmem:[%s7997_s6 + $0x210] sm:$0xff]  ;;  %v1194_v47 = vld [vmem:[%s7997_s6 + $0x228] sm:$0xff] }
 0x1f9   : > { %5034 = vmatprep.subr.bf16.mxu1 %v6354_v58  ;;  %v6480_v43 = vpack.c.bf16 %v1195_v40, %v1192_v39  ;;  %v1198_v48 = vld [vmem:[%s7997_s6 + $0x248] sm:$0xff]  ;;  %v1201_v49 = vld [vmem:[%s7997_s6 + $0x260] sm:$0xff]  ;;  %v6495_v50 = vpack.c.bf16 %v1194_v47, %v1191_v44  ;;  %v1200_v55 = vld [vmem:[%s7997_s6 + $0x258] sm:$0xff] }
 0x1fa   : > { %v6498_v53 = vpack.c.bf16 %v1201_v49, %v1198_v48  ;;  %v1197_v54 = vld [vmem:[%s7997_s6 + $0x240] sm:$0xff]  ;;  %v1204_v56 = vld [vmem:[%s7997_s6 + $0x278] sm:$0xff]  ;;  %v1207_v59 = vld [vmem:[%s7997_s6 + $0x290] sm:$0xff] }
 0x1fb   : > { %v6513_v60 = vpack.c.bf16 %v1200_v55, %v1197_v54  ;;  %v6516_v61 = vpack.c.bf16 %v1207_v59, %v1204_v56  ;;  %v1203_v62 = vld [vmem:[%s7997_s6 + $0x270] sm:$0xff]  ;;  %v1206_v2 = vld [vmem:[%s7997_s6 + $0x288] sm:$0xff]  ;;  %v1213_v4 = vld [vmem:[%s7997_s6 + $0x2c0] sm:$0xff] }
 0x1fc   : > { %5036 = vmatpush1.bf16.msra.mxu1 %v6369_v63  ;;  %v1210_v3 = vld [vmem:[%s7997_s6 + $0x2a8] sm:$0xff]  ;;  %v6531_v5 = vpack.c.bf16 %v1206_v2, %v1203_v62 }
 0x1fd   : > { %5038 = vmatprep.subr.bf16.mxu1 %v6372_v0  ;;  %v6534_v8 = vpack.c.bf16 %v1213_v4, %v1210_v3 }
 0x200   : > { %5040 = vmatpush1.bf16.msra.mxu1 %v6387_v6 }
 0x201   : > { %5042 = vmatprep.subr.bf16.mxu1 %v6390_v7 }
 0x204   : > { %5044 = vmatpush1.bf16.msra.mxu1 %v6405_v12 }
 0x205   : > { %5046 = vmatprep.subr.bf16.mxu1 %v6408_v13 }
 0x208   : > { %5048 = vmatpush1.bf16.msra.mxu1 %v6423_v18 }
 0x209   : > { %5050 = vmatprep.subr.bf16.mxu1 %v6426_v19 }
 0x20c   : > { %5052 = vmatpush1.bf16.msra.mxu1 %v6441_v25 }
 0x20d   : > { %5054 = vmatprep.subr.bf16.mxu1 %v6444_v26 }
 0x210   : > { %5056 = vmatpush1.bf16.msra.mxu1 %v6459_v33 }
 0x211   : > { %5058 = vmatprep.subr.bf16.mxu1 %v6462_v35 }
 0x214   : > { %5060 = vmatpush1.bf16.msra.mxu1 %v6477_v41 }
 0x215   : > { %5062 = vmatprep.subr.bf16.mxu1 %v6480_v43 }
 0x218   : > { %5064 = vmatpush1.bf16.msra.mxu1 %v6495_v50 }
 0x219   : > { %5066 = vmatprep.subr.bf16.mxu1 %v6498_v53 }
 0x21c   : > { %5068 = vmatpush1.bf16.msra.mxu1 %v6513_v60 }
 0x21d   : > { %5070 = vmatprep.subr.bf16.mxu1 %v6516_v61 }
 0x220   : > { %5072 = vmatpush1.bf16.msra.mxu1 %v6531_v5 }
 0x221   : > { %5074 = vmatprep.subr.bf16.mxu1 %v6534_v8 }
 0x248   : > { %v1261_v9 = vpop.permute.xlu1 %1260  ;;  %v1237_v10 = vpop.permute.xlu0 %1236 }
 0x24c   : > { %v1285_v11 = vpop.permute.xlu1 %1284  ;;  %v1249_v14 = vpop.permute.xlu0 %1248 }
 0x250   : > { %v1273_v15 = vpop.permute.xlu0 %1272  ;;  %v6538_v16 = vpop.permute.xlu1 %5630 }
 0x251   : > { %v5633_v30 = vunpack.i.h.bf16 %v6538_v16  ;;  %v5632_v31 = vunpack.i.l.bf16 %v6538_v16  ;;  %v1127_v16 = vld [vmem:[%s7997_s6 + $0x10] sm:$0xff] }
 0x253   : > { %v1256_v54 = vsel %vm1254_vm4, %v5632_v31, %v5633_v30  ;;  %v1255_v62 = vsel %vm1254_vm4, %v1249_v14, %v5632_v31 }
 0x254   : > { %v6540_v17 = vpop.permute.xlu1 %5635  ;;  %v6542_v20 = vpop.permute.xlu0 %5625 }
 0x255   : > { %v5638_v21 = vunpack.i.h.bf16 %v6540_v17  ;;  %v5637_v22 = vunpack.i.l.bf16 %v6540_v17  ;;  %v5628_v23 = vunpack.i.h.bf16 %v6542_v20  ;;  %v5627_v29 = vunpack.i.l.bf16 %v6542_v20  ;;  %v1130_v17 = vld [vmem:[%s7997_s6 + $0x28] sm:$0xff] }
 0x257   : > { %v1243_v32 = vsel %vm1242_vm3, %v1237_v10, %v5627_v29  ;;  %v1244_v40 = vsel %vm1242_vm3, %v5627_v29, %v5628_v23  ;;  %v1268_v44 = vsel %vm1266_vm2, %v5637_v22, %v5638_v21 }
 0x258   : > { %v4991_v36 = vpack.c.bf16 %v1243_v32, %v6239_v24  ;;  %v6552_v37 = vpop.permute.xlu1 %5645  ;;  %v1297_v39 = vpop.permute.xlu0 %1296  ;;  %v4989_v47 = vpack.c.bf16 %v1244_v40, %v6245_v27  ;;  %v1267_v24 = vsel %vm1266_vm2, %v1261_v9, %v5637_v22  ;;  %v4993_v55 = vpack.c.bf16 %v1268_v44, %v1256_v54 }
 0x259   : > { %v5648_v48 = vunpack.i.h.bf16 %v6552_v37  ;;  %v5647_v49 = vunpack.i.l.bf16 %v6552_v37  ;;  %v4995_v3 = vpack.c.bf16 %v1267_v24, %v1255_v62 }
 0x25a   : > { %4990 = vmatprep.subr.bf16.mxu0 %v4989_v47 }
 0x25b   : > { %4992 = vmatpush1.bf16.msra.mxu0 %v4991_v36  ;;  %v1291_v4 = vsel %vm1290_vm5, %v1285_v11, %v5647_v49  ;;  %v1292_v10 = vsel %vm1290_vm5, %v5647_v49, %v5648_v48 }
 0x25c   : > { %v5656_v56 = vpop.permute.xlu1 %5655  ;;  %v5641_v59 = vpop.permute.xlu0 %5640  ;;  %4994 = vmatprep.subr.bf16.mxu0 %v4993_v55 }
 0x25d   : > { %v5643_v27 = vunpack.i.h.bf16 %v5641_v59  ;;  %v5642_v2 = vunpack.i.l.bf16 %v5641_v59  ;;  %v5658_v20 = vunpack.i.h.bf16 %v5656_v56  ;;  %v5657_v29 = vunpack.i.l.bf16 %v5656_v56 }
 0x25f   : > { %v1279_v9 = vsel %vm1278_vm6, %v1273_v15, %v5642_v2  ;;  %v1280_v22 = vsel %vm1278_vm6, %v5642_v2, %v5643_v27  ;;  %4996 = vmatpush1.bf16.msra.mxu0 %v4995_v3  ;;  %v1316_v15 = vsel %vm1314_vm7, %v5657_v29, %v5658_v20  ;;  %v5006_v2 = vpack.c.bf16 %v5628_v23, %v6247_v28 }
 0x260   : > { %v4999_v32 = vpack.c.bf16 %v1291_v4, %v1279_v9  ;;  %v1309_v36 = vpop.permute.xlu1 %1308  ;;  %v5651_v14 = vpop.permute.xlu0 %5650  ;;  %v4997_v31 = vpack.c.bf16 %v1292_v10, %v1280_v22  ;;  %v7971_v3 = vmov 0.0|0.0   ;;  %v5009_v4 = vpack.c.bf16 %v5638_v21, %v5633_v30  ;;  %v1175_v10 = vld [vmem:[%s7997_s6 + $0x190] sm:$0xff]  ;;  %v1181_v21 = vld [vmem:[%s7997_s6 + $0x1c0] sm:$0xff]  ;;  %v1184_v30 = vld [vmem:[%s7997_s6 + $0x1d8] sm:$0xff] }
 0x261   : > { %v5653_v37 = vunpack.i.h.bf16 %v5651_v14  ;;  %v5652_v40 = vunpack.i.l.bf16 %v5651_v14  ;;  %v1315_v11 = vsel %vm1314_vm7, %v1309_v36, %v5657_v29  ;;  %v5012_v28 = vpack.c.bf16 %v5648_v48, %v5643_v27  ;;  %v1178_v29 = vld [vmem:[%s7997_s6 + $0x1a8] sm:$0xff]  ;;  %v1133_v9 = vld [vmem:[%s7997_s6 + $0x40] sm:$0xff]  ;;  %v1136_v22 = vld [vmem:[%s7997_s6 + $0x58] sm:$0xff] }
 0x262   : > { %4998 = vmatprep.subr.bf16.mxu0 %v4997_v31  ;;  %v6610_v48 = vpack.c.bf16 %v1178_v29, %v1175_v10  ;;  %v6612_v27 = vpack.c.bf16 %v1130_v17, %v1127_v16  ;;  %v1190_v36 = vld [vmem:[%s7997_s6 + $0x208] sm:$0xff]  ;;  %v6631_v14 = vpack.c.bf16 %v1136_v22, %v1133_v9  ;;  %v1157_v10 = vld [vmem:[%s7997_s6 + $0x100] sm:$0xff]  ;;  %v1160_v29 = vld [vmem:[%s7997_s6 + $0x118] sm:$0xff] }
 0x263   : > { %v1303_v44 = vsel %vm1302_vm8, %v1297_v39, %v5652_v40  ;;  %v1304_v47 = vsel %vm1302_vm8, %v5652_v40, %v5653_v37  ;;  %5000 = vmatpush1.bf16.msra.mxu0 %v4999_v32  ;;  %v1123_v39 = vld [vmem:[%s7998_s9] sm:$0xff]  ;;  %v5015_v23 = vpack.c.bf16 %v5658_v20, %v5653_v37  ;;  %v6614_v20 = vpack.c.bf16 %v1184_v30, %v1181_v21  ;;  %v1187_v32 = vld [vmem:[%s7997_s6 + $0x1f0] sm:$0xff]  ;;  %v1142_v40 = vld [vmem:[%s7997_s6 + $0x88] sm:$0xff]  ;;  %s5796_s9 = smov 117  }
 0x264   : > { %v5003_v49 = vpack.c.bf16 %v1315_v11, %v1303_v44  ;;  %v1323_v54 = vpop.permute.xlu0 %1322  ;;  %v5001_v24 = vpack.c.bf16 %v1316_v15, %v1304_v47  ;;  %v1325_v55 = vpop.permute.xlu1 %1324  ;;  %v6634_v31 = vpack.c.bf16 %v1190_v36, %v1187_v32  ;;  %v1139_v37 = vld [vmem:[%s7997_s6 + $0x70] sm:$0xff]  ;;  %v1193_v11 = vld [vmem:[%s7997_s6 + $0x220] sm:$0xff]  ;;  %v1196_v44 = vld [vmem:[%s7997_s6 + $0x238] sm:$0xff]  ;;  %v6703_v21 = vpack.c.bf16 %v1160_v29, %v1157_v10 }
 0x265   : > { %v1328_v59 = vsel %vm1326_vm9, %v1323_v54, %v1325_v55  ;;  %v6649_v47 = vpack.c.bf16 %v1142_v40, %v1139_v37  ;;  %v6652_v15 = vpack.c.bf16 %v1196_v44, %v1193_v11  ;;  %v1211_v16 = vld [vmem:[%s7997_s6 + $0x2b0] sm:$0xff]  ;;  %v1214_v17 = vld [vmem:[%s7997_s6 + $0x2c8] sm:$0xff]  ;;  %v1209_v9 = vld [vmem:[%s7997_s6 + $0x2a0] sm:$0xff] }
 0x266   : > { %5002 = vmatprep.subr.bf16.mxu0 %v5001_v24  ;;  %v1199_v24 = vld [vmem:[%s7997_s6 + $0x250] sm:$0xff]  ;;  %v6706_v30 = vpack.c.bf16 %v1214_v17, %v1211_v16  ;;  %v1212_v22 = vld [vmem:[%s7997_s6 + $0x2b8] sm:$0xff]  ;;  %v1166_v37 = vld [vmem:[%s7997_s6 + $0x148] sm:$0xff] }
 0x267   : > { %5004 = vmatpush1.bf16.msra.mxu0 %v5003_v49  ;;  %v1145_v49 = vld [vmem:[%s7997_s6 + $0xa0] sm:$0xff]  ;;  %v1163_v32 = vld [vmem:[%s7997_s6 + $0x130] sm:$0xff]  ;;  %v6719_v36 = vpack.c.bf16 %v1212_v22, %v1209_v9  ;;  %v1216_v11 = vld [vmem:[%s7997_s6 + $0x2d8] sm:$0xff] }
 0x268   : > { %v1321_v56 = vpop.permute.xlu0 %1320  ;;  %1357 = vmatprep.subr.mxu0 %v1328_v59  ;;  %v6724_v40 = vpack.c.bf16 %v1166_v37, %v1163_v32  ;;  %v1219_v44 = vld [vmem:[%s7997_s6 + $0x2f0] sm:$0xff]  ;;  %v1172_v10 = vld [vmem:[%s7997_s6 + $0x178] sm:$0xff]  ;;  %v1222_v16 = vld [vmem:[%s7997_s6 + $0x308] sm:$0xff] }
 0x269   : > { %v1327_v62 = vsel %vm1326_vm9, %v1321_v56, %v1323_v54  ;;  %v1148_v54 = vld [vmem:[%s7997_s6 + $0xb8] sm:$0xff]  ;;  %5076 = vmatpush1.bf16.msra.mxu1 %v6719_v36  ;;  %v1225_v17 = vld [vmem:[%s7997_s6 + $0x320] sm:$0xff] }
 0x26a   : > { %v6667_v56 = vpack.c.bf16 %v1148_v54, %v1145_v49  ;;  %v1217_v49 = vld [vmem:[%s7997_s6 + $0x2e0] sm:$0xff]  ;;  %v6737_v54 = vpack.c.bf16 %v1219_v44, %v1216_v11  ;;  %v6771_v9 = vpack.c.bf16 %v1225_v17, %v1222_v16 }
 0x26b   : > { %1358 = vmatpush1.msra.mxu0 %v1327_v62  ;;  %v1151_v62 = vld [vmem:[%s7997_s6 + $0xd0] sm:$0xff]  ;;  %v1221_v37 = vld [vmem:[%s7997_s6 + $0x300] sm:$0xff] }
 0x26c   : > { %4394 = vmatmul.mubr.msk.f32.vlgmr.msra.gmra.mrb[4].mxu0 %vm1337_vm10, %v1123_v39  ;;  %5005 = vmatprep.subr.bf16.mxu0 %v7971_v3 }
 0x26d   : > { %5007 = vmatpush3.bf16.msra.mxu0 %v5006_v2  ;;  %4764 = vmatprep.mubr.msk.f32.mxu0 %vm5791_vm11, %v7969_v1  ;;  %v1205_v2 = vld [vmem:[%s7997_s6 + $0x280] sm:$0xff] }
 0x26e   : > { %5008 = vmatprep.subr.bf16.mxu0 %v7971_v3  ;;  %5078 = vmatprep.subr.bf16.mxu1 %v6737_v54 }
 0x271   : > { %5010 = vmatpush3.bf16.msra.mxu0 %v5009_v4  ;;  %v1208_v4 = vld [vmem:[%s7997_s6 + $0x298] sm:$0xff] }
 0x272   : > { %5011 = vmatprep.subr.bf16.mxu0 %v7971_v3 }
 0x275   : > { %5013 = vmatpush3.bf16.msra.mxu0 %v5012_v28  ;;  %v1335_v22 = vpop.permute.xlu1 %1334 }
 0x276   : > { %5014 = vmatprep.subr.bf16.mxu0 %v7971_v3 }
 0x279   : > { %5016 = vmatpush3.bf16.msra.mxu0 %v5015_v23  ;;  %v6688_v23 = vpack.c.bf16 %v1208_v4, %v1205_v2  ;;  %v1169_v4 = vld [vmem:[%s7997_s6 + $0x160] sm:$0xff] }
 0x27a   : > { %4762 = vmatprep.subr.mxu0 %v7969_v1  ;;  %v6759_v29 = vpack.c.bf16 %v1172_v10, %v1169_v4  ;;  %v1228_v4 = vld [vmem:[%s7997_s6 + $0x338] sm:$0xff]  ;;  %v1231_v10 = vld [vmem:[%s7997_s6 + $0x350] sm:$0x3f] }
 0x27c   : > { %7999 = vst [vmem:[#allocation3_spill] sm:$0xff] %v6759_v29 }
 0x27d   : > { %4763 = vmatpush3.msra.mxu0 %v1325_v55  ;;  %v1202_v55 = vld [vmem:[%s7997_s6 + $0x268] sm:$0xff] }
 0x27e   : > { %4765 = vmatmul.mubr.msk.f32.vlgmr.msra.gmra.mrb[6].mxu0 %vm1337_vm10, %v1123_v39  ;;  %5092 = vmatprep.subr.bf16.mxu0 %v6610_v48  ;;  %v6670_v59 = vpack.c.bf16 %v1202_v55, %v1199_v24  ;;  %v1154_v39 = vld [vmem:[%s7997_s6 + $0xe8] sm:$0xff]  ;;  %v1220_v24 = vld [vmem:[%s7997_s6 + $0x2f8] sm:$0xff]  ;;  %v1215_v55 = vld [vmem:[%s7997_s6 + $0x2d0] sm:$0xff] }
 0x27f   : > { %5094 = vmatpush3.bf16.msra.mxu0 %v6612_v27  ;;  %v6685_v28 = vpack.c.bf16 %v1154_v39, %v1151_v62  ;;  %v1218_v62 = vld [vmem:[%s7997_s6 + $0x2e8] sm:$0xff]  ;;  %v6748_v39 = vpack.c.bf16 %v1220_v24, %v1217_v49  ;;  %v1224_v49 = vld [vmem:[%s7997_s6 + $0x318] sm:$0xff]  ;;  %v1223_v24 = vld [vmem:[%s7997_s6 + $0x310] sm:$0xff] }
 0x280   : > { %5096 = vmatprep.subr.bf16.mxu0 %v6614_v20  ;;  %v6750_v2 = vpack.c.bf16 %v1218_v62, %v1215_v55  ;;  %v1226_v55 = vld [vmem:[%s7997_s6 + $0x328] sm:$0xff] }
 0x281   : > { %v6794_v1 = vpack.c.bf16 %v1226_v55, %v1223_v24 }
 0x282   : > { %5080 = vmatpush1.bf16.msra.mxu1 %v6750_v2 }
 0x283   : > { %5098 = vmatpush3.bf16.msra.mxu0 %v6631_v14  ;;  %5082 = vmatprep.subr.bf16.mxu1 %v6771_v9 }
 0x284   : > { %5100 = vmatprep.subr.bf16.mxu0 %v6634_v31 }
 0x287   : > { %5102 = vmatpush3.bf16.msra.mxu0 %v6649_v47 }
 0x288   : > { %5104 = vmatprep.subr.bf16.mxu0 %v6652_v15 }
 0x28b   : > { %5106 = vmatpush3.bf16.msra.mxu0 %v6667_v56 }
 0x28c   : > { %5108 = vmatprep.subr.bf16.mxu0 %v6670_v59 }
 0x28f   : > { %5110 = vmatpush3.bf16.msra.mxu0 %v6685_v28 }
 0x290   : > { %5112 = vmatprep.subr.bf16.mxu0 %v6688_v23 }
 0x293   : > { %5114 = vmatpush3.bf16.msra.mxu0 %v6703_v21 }
 0x294   : > { %5116 = vmatprep.subr.bf16.mxu0 %v6706_v30 }
 0x297   : > { %5118 = vmatpush3.bf16.msra.mxu0 %v6724_v40 }
 0x298   : > { %5120 = vmatprep.subr.bf16.mxu0 %v6748_v39 }
 0x29b   : > { %5122 = vmatpush3.bf16.msra.mxu0 %v6759_v29  ;;  %v1230_v29 = vld [vmem:[%s7997_s6 + $0x348] sm:$0x3f] }
 0x29c   : > { %5123 = vmatprep.subr.bf16.mxu0 %v7971_v3  ;;  %v1227_v3 = vld [vmem:[%s7997_s6 + $0x330] sm:$0xff] }
 0x29d   : > { %v6816_v24 = vpack.c.bf16 %v1230_v29, %v1227_v3 }
 0x33f   : > { %v1407_v32 = vpop.f32.mrb[4].mxu0 }
 0x340   : > { %v1408_v11 = vadd.f32 %v1407_v32, %v1335_v22  ;;  %v1409_v44 = vpop.f32.mrb[5].mxu0  ;;  %v6792_v32 = vpack.c.bf16 %v1224_v49, %v1221_v37  ;;  %v1232_v37 = vld [vmem:[%s7997_s6 + $0x358] sm:$0x3f] }
 0x341   : > { %v1410_v62 = vadd.f32 %v1409_v44, %v1335_v22  ;;  %v6799_v44 = vpack.c.bf16 %v1231_v10, %v1228_v4  ;;  %v8003_v4 = vmov 0.0  }
 0x342   : > { %v1482_v16 = vmax.f32 %v1408_v11, 0.0  ;;  %v1229_v11 = vld [vmem:[%s7997_s6 + $0x340] sm:$0xff]  ;;  %s5794_s6 = smov 116  }
 0x343   : > { %v1483_v17 = vmax.f32 %v1410_v62, 0.0  ;;  %v6818_v55 = vpack.c.bf16 %v1232_v37, %v1229_v11  ;;  %v8002_v62 = vmov 0.0|0.0  }
 0x345   : > { %1563 = vmatprep.mubr.f32.mxu1 %v1483_v17  ;;  %1705 = vmatprep.mubr.f32.mxu0 %v1483_v17 }
 0x346   : > { %1564 = vmatmul.mubr.f32.vlgmr.msra.gmra.mrb[2].mxu1 %v1482_v16  ;;  %1706 = vmatmul.mubr.f32.vlgmr.msra.gmra.mrb[8].mxu0 %v1482_v16 }
 0x347   : > { %5084 = vmatpush1.bf16.msra.mxu1 %v6792_v32  ;;  %5125 = vmatpush3.bf16.msra.mxu0 %v6794_v1 }
 0x348   : > { %5087 = vmatprep.subr.msk.bf16.mxu1 %vm6810_vm14, %v6799_v44  ;;  %5126 = vmatprep.subr.bf16.mxu0 %v8002_v62 }
 0x349   : > { %1634 = vmatprep.mubr.f32.mxu1 %v8003_v4  ;;  %4775 = vmatprep.mubr.msk.f32.mxu0 %vm5791_vm11, %v8003_v4 }
 0x34b   : > { %5090 = vmatpush1.bf16.msk.msra.mxu1 %vm6810_vm14, %v6816_v24  ;;  %5129 = vmatpush3.bf16.msk.msra.mxu0 %vm6810_vm14, %v6818_v55 }
 0x34c   : > { %5159 = vmatprep.subr.bf16.mxu1 %v6283_v34 }
 0x351   : > { %v1478_v3 = vpop.f32.mrb[6].mxu0 }
 0x352   : > { %v1479_v29 = vadd.f32 %v1478_v3, %v1335_v22  ;;  %v4766_v10 = vpop.f32.mrb[7].mxu0 }
 0x354   : > { %v1484_v16 = vmax.f32 %v1479_v29, 0.0 }
 0x356   : > { %4398 = vmatmul.mubr.msk.f32.vlgmr.msra.gmra.mrb[2].mxu1 %vm1485_vm15, %v1484_v16  ;;  %4776 = vmatmul.mubr.msk.f32.vlgmr.msra.gmra.mrb[10].mxu0 %vm1485_vm15, %v1484_v16 }
 0x357   : > { %1946 = vmatprep.mubr.f32.mxu0 %v8003_v4  ;;  %5161 = vmatpush1.bf16.msra.mxu1 %v6294_v38 }
 0x358   : > { %5163 = vmatprep.subr.bf16.mxu1 %v6306_v42 }
 0x35b   : > { %5165 = vmatpush1.bf16.msra.mxu1 %v6315_v45 }
 0x35c   : > { %5167 = vmatprep.subr.bf16.mxu1 %v6318_v46 }
 0x35f   : > { %5169 = vmatpush1.bf16.msra.mxu1 %v6333_v51 }
 0x360   : > { %5171 = vmatprep.subr.bf16.mxu1 %v6336_v52 }
 0x363   : > { %5173 = vmatpush1.bf16.msra.mxu1 %v6351_v57 }
 0x364   : > { %5175 = vmatprep.subr.bf16.mxu1 %v6354_v58 }
 0x367   : > { %5177 = vmatpush1.bf16.msra.mxu1 %v6369_v63  ;;  %v1782_v63 = vld [vmem:[%s8012_s11] sm:$0xff] }
 0x368   : > { %5179 = vmatprep.subr.bf16.mxu1 %v6372_v0 }
 0x36b   : > { %5181 = vmatpush1.bf16.msra.mxu1 %v6387_v6 }
 0x36c   : > { %5183 = vmatprep.subr.bf16.mxu1 %v6390_v7 }
 0x36f   : > { %5185 = vmatpush1.bf16.msra.mxu1 %v6405_v12 }
 0x370   : > { %5187 = vmatprep.subr.bf16.mxu1 %v6408_v13 }
 0x373   : > { %5189 = vmatpush1.bf16.msra.mxu1 %v6423_v18 }
 0x374   : > { %5191 = vmatprep.subr.bf16.mxu1 %v6426_v19 }
 0x377   : > { %5193 = vmatpush1.bf16.msra.mxu1 %v6441_v25 }
 0x378   : > { %5195 = vmatprep.subr.bf16.mxu1 %v6444_v26 }
 0x37b   : > { %5197 = vmatpush1.bf16.msra.mxu1 %v6459_v33 }
 0x37c   : > { %5199 = vmatprep.subr.bf16.mxu1 %v6462_v35 }
 0x37f   : > { %5201 = vmatpush1.bf16.msra.mxu1 %v6477_v41 }
 0x380   : > { %5203 = vmatprep.subr.bf16.mxu1 %v6480_v43 }
 0x383   : > { %5205 = vmatpush1.bf16.msra.mxu1 %v6495_v50 }
 0x384   : > { %5207 = vmatprep.subr.bf16.mxu1 %v6498_v53 }
 0x387   : > { %5209 = vmatpush1.bf16.msra.mxu1 %v6513_v60 }
 0x388   : > { %5211 = vmatprep.subr.bf16.mxu1 %v6516_v61 }
 0x38b   : > { %5213 = vmatpush1.bf16.msra.mxu1 %v6531_v5 }
 0x38c   : > { %5215 = vmatprep.subr.bf16.mxu1 %v6534_v8 }
 0x38f   : > { %5217 = vmatpush1.bf16.msra.mxu1 %v6719_v36 }
 0x390   : > { %5219 = vmatprep.subr.bf16.mxu1 %v6737_v54 }
 0x393   : > { %5221 = vmatpush1.bf16.msra.mxu1 %v6750_v2 }
 0x394   : > { %5223 = vmatprep.subr.bf16.mxu1 %v6771_v9 }
 0x419   : > { %v4609_v34 = vpop.f32.mrb[8].mxu0 }
 0x41a   : > { %v4610_v38 = vpop.f32.mrb[9].mxu0 }
 0x41b   : > { %v4611_v42 = vadd.f32 %v4610_v38, %v4609_v34 }
 0x429   : > { %v1636_v45 = vpop.f32.mrb[2].mxu1  ;;  %v1777_v46 = vpop.f32.mrb[10].mxu0 }
 0x42a   : > { %v6869_v51 = vadd.f32 %v4611_v42, %v1777_v46  ;;  %v4777_v52 = vpop.f32.mrb[11].mxu0  ;;  %1797 = vrot.lane.b32.xlu0 %v1636_v45, %s8004_s28  ;;  %1786 = vrot.lane.b32.xlu1 %v1636_v45, %s8005_s3  ;;  %v1638_v57 = vpop.f32.mrb[3].mxu1 }
 0x42c   : > { %v5670_v58 = vpack.i.bf16 %v6869_v51, %v1638_v57 }
 0x42e   : > { %1819 = vrot.lane.b32.xlu0 %v1636_v45, %s8006_s8  ;;  %1808 = vrot.lane.b32.xlu1 %v1636_v45, %s8007_s27 }
 0x432   : > { %1841 = vrot.lane.b32.xlu0 %v1636_v45, %s8008_s30  ;;  %1830 = vrot.lane.b32.xlu1 %v1636_v45, %s8009_s1 }
 0x436   : > { %5671 = vrot.lane.b32.xlu1 %v5670_v58, %s8007_s27  ;;  %5661 = vrot.lane.b32.xlu0 %v5670_v58, %s8005_s3 }
 0x43a   : > { %5681 = vrot.lane.b32.xlu1 %v5670_v58, %s8009_s1  ;;  %5666 = vrot.lane.b32.xlu0 %v5670_v58, %s8004_s28 }
 0x43e   : > { %5691 = vrot.lane.b32.xlu1 %v5670_v58, %s8010_s26  ;;  %5676 = vrot.lane.b32.xlu0 %v5670_v58, %s8006_s8 }
 0x442   : > { %1852 = vrot.lane.b32.xlu1 %v1636_v45, %s8010_s26  ;;  %5686 = vrot.lane.b32.xlu0 %v5670_v58, %s8008_s30 }
 0x446   : > { %1867 = vrot.lane.b32.xlu1 %v6869_v51, %s8011_s4  ;;  %1865 = vrot.lane.b32.xlu0 %v1638_v57, %s8011_s4 }
 0x44a   : > { %1876 = vperm.xlu1 %5659, %v1782_v63   ;;  %1863 = vrot.lane.b32.xlu0 %v1636_v45, %s8011_s4 }
 0x49c   : > { %v1798_v0 = vpop.permute.xlu0 %1797  ;;  %v1787_v6 = vpop.permute.xlu1 %1786 }
 0x4a0   : > { %v1820_v7 = vpop.permute.xlu0 %1819  ;;  %v1809_v12 = vpop.permute.xlu1 %1808 }
 0x4a4   : > { %v1842_v13 = vpop.permute.xlu0 %1841  ;;  %v1831_v18 = vpop.permute.xlu1 %1830 }
 0x4a8   : > { %v6893_v19 = vpop.permute.xlu1 %5671  ;;  %v5662_v25 = vpop.permute.xlu0 %5661 }
 0x4a9   : > { %v5664_v26 = vunpack.i.h.bf16 %v5662_v25  ;;  %v5663_v33 = vunpack.i.l.bf16 %v5662_v25  ;;  %v5674_v35 = vunpack.i.h.bf16 %v6893_v19  ;;  %v5673_v41 = vunpack.i.l.bf16 %v6893_v19 }
 0x4ab   : > { %v1792_v43 = vsel %vm1242_vm3, %v1787_v6, %v5663_v33  ;;  %v1793_v50 = vsel %vm1242_vm3, %v5663_v33, %v5664_v26  ;;  %v1814_v9 = vsel %vm1266_vm2, %v1809_v12, %v5673_v41  ;;  %v1815_v11 = vsel %vm1266_vm2, %v5673_v41, %v5674_v35 }
 0x4ac   : > { %v5132_v53 = vpack.c.bf16 %v1792_v43, %v1636_v45  ;;  %v5682_v60 = vpop.permute.xlu1 %5681  ;;  %v5667_v61 = vpop.permute.xlu0 %5666  ;;  %v5130_v5 = vpack.c.bf16 %v1793_v50, %v1638_v57 }
 0x4ad   : > { %v5669_v8 = vunpack.i.h.bf16 %v5667_v61  ;;  %v5668_v36 = vunpack.i.l.bf16 %v5667_v61  ;;  %v5684_v54 = vunpack.i.h.bf16 %v5682_v60  ;;  %v5683_v2 = vunpack.i.l.bf16 %v5682_v60 }
 0x4ae   : > { %5131 = vmatprep.subr.bf16.mxu0 %v5130_v5 }
 0x4af   : > { %v1803_v22 = vsel %vm1254_vm4, %v1798_v0, %v5668_v36  ;;  %5133 = vmatpush1.bf16.msra.mxu0 %v5132_v53  ;;  %v1804_v17 = vsel %vm1254_vm4, %v5668_v36, %v5669_v8  ;;  %v1836_v38 = vsel %vm1290_vm5, %v1831_v18, %v5683_v2  ;;  %v1837_v42 = vsel %vm1290_vm5, %v5683_v2, %v5684_v54 }
 0x4b0   : > { %v5136_v37 = vpack.c.bf16 %v1814_v9, %v1803_v22  ;;  %v5692_v3 = vpop.permute.xlu1 %5691  ;;  %v5677_v29 = vpop.permute.xlu0 %5676  ;;  %v5134_v10 = vpack.c.bf16 %v1815_v11, %v1804_v17  ;;  %v5147_v36 = vpack.c.bf16 %v5664_v26, %v6869_v51  ;;  %v5150_v2 = vpack.c.bf16 %v5674_v35, %v5669_v8  ;;  %v2315_v35 = vld [vmem:[%s8015_s0 + $0x20] sm:$0xff]  ;;  %v2317_v8 = vld [vmem:[%s8015_s0 + $0x30] sm:$0xff]  ;;  %v2322_v22 = vld [vmem:[%s8015_s0 + $0x58] sm:$0xff] }
 0x4b1   : > { %v5679_v16 = vunpack.i.h.bf16 %v5677_v29  ;;  %v5678_v34 = vunpack.i.l.bf16 %v5677_v29  ;;  %v5694_v45 = vunpack.i.h.bf16 %v5692_v3  ;;  %v5693_v46 = vunpack.i.l.bf16 %v5692_v3  ;;  %v2321_v3 = vld [vmem:[%s8015_s0 + $0x50] sm:$0xff]  ;;  %v2324_v29 = vld [vmem:[%s8015_s0 + $0x68] sm:$0xff] }
 0x4b2   : > { %5135 = vmatprep.subr.bf16.mxu0 %v5134_v10  ;;  %v5277_v17 = vpack.c.bf16 %v2317_v8, %v2315_v35  ;;  %v2326_v10 = vld [vmem:[%s8015_s0 + $0x78] sm:$0xff]  ;;  %v2357_v35 = vld [vmem:[%s8015_s0 + $0x170] sm:$0xff] }
 0x4b3   : > { %v1825_v52 = vsel %vm1278_vm6, %v1820_v7, %v5678_v34  ;;  %5137 = vmatpush1.bf16.msra.mxu0 %v5136_v37  ;;  %v1826_v57 = vsel %vm1278_vm6, %v5678_v34, %v5679_v16  ;;  %v1859_v41 = vsel %vm1314_vm7, %v5693_v46, %v5694_v45  ;;  %v5153_v9 = vpack.c.bf16 %v5684_v54, %v5679_v16  ;;  %v2320_v54 = vld [vmem:[%s8015_s0 + $0x48] sm:$0xff]  ;;  %v2319_v37 = vld [vmem:[%s8015_s0 + $0x40] sm:$0xff] }
 0x4b4   : > { %v5140_v58 = vpack.c.bf16 %v1836_v38, %v1825_v52  ;;  %v1853_v63 = vpop.permute.xlu1 %1852  ;;  %v5687_v0 = vpop.permute.xlu0 %5686  ;;  %v5138_v6 = vpack.c.bf16 %v1837_v42, %v1826_v57  ;;  %v5279_v11 = vpack.c.bf16 %v2322_v22, %v2320_v54  ;;  %v5281_v16 = vpack.c.bf16 %v2321_v3, %v2319_v37  ;;  %v2323_v38 = vld [vmem:[%s8015_s0 + $0x60] sm:$0xff]  ;;  %v2325_v42 = vld [vmem:[%s8015_s0 + $0x70] sm:$0xff]  ;;  %v2360_v54 = vld [vmem:[%s8015_s0 + $0x188] sm:$0xff] }
 0x4b5   : > { %v5689_v12 = vunpack.i.h.bf16 %v5687_v0  ;;  %v5688_v19 = vunpack.i.l.bf16 %v5687_v0  ;;  %v1858_v25 = vsel %vm1314_vm7, %v1853_v63, %v5693_v46  ;;  %v5283_v34 = vpack.c.bf16 %v2326_v10, %v2324_v29  ;;  %v2330_v46 = vld [vmem:[%s8015_s0 + $0x98] sm:$0xff]  ;;  %v2329_v63 = vld [vmem:[%s8015_s0 + $0x90] sm:$0xff]  ;;  %v2332_v0 = vld [vmem:[%s8015_s0 + $0xa8] sm:$0xff] }
 0x4b6   : > { %5139 = vmatprep.subr.bf16.mxu0 %v5138_v6  ;;  %v5285_v52 = vpack.c.bf16 %v2325_v42, %v2323_v38  ;;  %v2334_v6 = vld [vmem:[%s8015_s0 + $0xb8] sm:$0xff]  ;;  %v2361_v37 = vld [vmem:[%s8015_s0 + $0x190] sm:$0xff]  ;;  %v2364_v29 = vld [vmem:[%s8015_s0 + $0x1a8] sm:$0xff] }
 0x4b7   : > { %v1847_v18 = vsel %vm1302_vm8, %v1842_v13, %v5688_v19  ;;  %5141 = vmatpush1.bf16.msra.mxu0 %v5140_v58  ;;  %v1848_v33 = vsel %vm1302_vm8, %v5688_v19, %v5689_v12  ;;  %v1781_v13 = vld [vmem:[%s8013_s10] sm:$0xff]  ;;  %v5156_v51 = vpack.c.bf16 %v5694_v45, %v5689_v12  ;;  %v2328_v45 = vld [vmem:[%s8015_s0 + $0x88] sm:$0xff]  ;;  %v5291_v19 = vpack.c.bf16 %v2334_v6, %v2332_v0  ;;  %v2362_v22 = vld [vmem:[%s8015_s0 + $0x198] sm:$0xff] }
 0x4b8   : > { %v5144_v7 = vpack.c.bf16 %v1858_v25, %v1847_v18  ;;  %v1868_v43 = vpop.permute.xlu1 %1867  ;;  %v1866_v50 = vpop.permute.xlu0 %1865  ;;  %v5142_v53 = vpack.c.bf16 %v1859_v41, %v1848_v33  ;;  %v5287_v57 = vpack.c.bf16 %v2330_v46, %v2328_v45  ;;  %v2327_v58 = vld [vmem:[%s8015_s0 + $0x80] sm:$0xff]  ;;  %v2333_v18 = vld [vmem:[%s8015_s0 + $0xb0] sm:$0xff]  ;;  %v2336_v33 = vld [vmem:[%s8015_s0 + $0xc8] sm:$0xff] }
 0x4b9   : > { %v1870_v60 = vsel %vm1326_vm9, %v1866_v50, %v1868_v43  ;;  %v5289_v12 = vpack.c.bf16 %v2329_v63, %v2327_v58  ;;  %v2331_v25 = vld [vmem:[%s8015_s0 + $0xa0] sm:$0xff]  ;;  %v2338_v41 = vld [vmem:[%s8015_s0 + $0xd8] sm:$0xff]  ;;  %v2365_v38 = vld [vmem:[%s8015_s0 + $0x1b0] sm:$0xff] }
 0x4ba   : > { %5143 = vmatprep.subr.bf16.mxu0 %v5142_v53  ;;  %v2337_v53 = vld [vmem:[%s8015_s0 + $0xd0] sm:$0xff]  ;;  %v2366_v10 = vld [vmem:[%s8015_s0 + $0x1b8] sm:$0xff]  ;;  %v2368_v42 = vld [vmem:[%s8015_s0 + $0x1c8] sm:$0xff] }
 0x4bb   : > { %5145 = vmatpush1.bf16.msra.mxu0 %v5144_v7  ;;  %v5293_v7 = vpack.c.bf16 %v2333_v18, %v2331_v25  ;;  %v2370_v45 = vld [vmem:[%s8015_s0 + $0x1d8] sm:$0xff]  ;;  %v2369_v58 = vld [vmem:[%s8015_s0 + $0x1d0] sm:$0xff]  ;;  %v2372_v63 = vld [vmem:[%s8015_s0 + $0x1e8] sm:$0xff] }
 0x4bc   : > { %v1864_v61 = vpop.permute.xlu0 %1863  ;;  %1898 = vmatprep.subr.mxu0 %v1870_v60  ;;  %v2340_v60 = vld [vmem:[%s8015_s0 + $0xe8] sm:$0xff]  ;;  %v2374_v0 = vld [vmem:[%s8015_s0 + $0x1f8] sm:$0xff]  ;;  %v2373_v25 = vld [vmem:[%s8015_s0 + $0x1f0] sm:$0xff] }
 0x4bd   : > { %v1869_v5 = vsel %vm1326_vm9, %v1864_v61, %v1866_v50  ;;  %v2335_v50 = vld [vmem:[%s8015_s0 + $0xc0] sm:$0xff]  ;;  %v2342_v61 = vld [vmem:[%s8015_s0 + $0xf8] sm:$0xff] }
 0x4bf   : > { %1899 = vmatpush1.msra.mxu0 %v1869_v5  ;;  %v5297_v5 = vpack.c.bf16 %v2337_v53, %v2335_v50 }
 0x4c0   : > { %4401 = vmatmul.mubr.msk.f32.vlgmr.msra.gmra.mrb[12].mxu0 %vm1337_vm10, %v1781_v13  ;;  %5146 = vmatprep.subr.bf16.mxu0 %v8002_v62 }
 0x4c1   : > { %5148 = vmatpush3.bf16.msra.mxu0 %v5147_v36  ;;  %4796 = vmatprep.mubr.msk.f32.mxu0 %vm5791_vm11, %v8003_v4  ;;  %v2339_v36 = vld [vmem:[%s8015_s0 + $0xe0] sm:$0xff] }
 0x4c2   : > { %5149 = vmatprep.subr.bf16.mxu0 %v8002_v62 }
 0x4c5   : > { %5151 = vmatpush3.bf16.msra.mxu0 %v5150_v2  ;;  %v2341_v2 = vld [vmem:[%s8015_s0 + $0xf0] sm:$0xff] }
 0x4c6   : > { %5152 = vmatprep.subr.bf16.mxu0 %v8002_v62 }
 0x4c9   : > { %5154 = vmatpush3.bf16.msra.mxu0 %v5153_v9  ;;  %v2344_v9 = vld [vmem:[%s8015_s0 + $0x108] sm:$0xff] }
 0x4ca   : > { %5155 = vmatprep.subr.bf16.mxu0 %v8002_v62 }
 0x4cd   : > { %5157 = vmatpush3.bf16.msra.mxu0 %v5156_v51  ;;  %v2346_v51 = vld [vmem:[%s8015_s0 + $0x118] sm:$0xff] }
 0x4ce   : > { %4794 = vmatprep.subr.mxu0 %v8003_v4 }
 0x4d1   : > { %4795 = vmatpush3.msra.mxu0 %v1868_v43  ;;  %v5295_v43 = vpack.c.bf16 %v2338_v41, %v2336_v33  ;;  %v2376_v33 = vld [vmem:[%s8015_s0 + $0x208] sm:$0xff]  ;;  %v2378_v41 = vld [vmem:[%s8015_s0 + $0x218] sm:$0xff] }
 0x4d2   : > { %4797 = vmatmul.mubr.msk.f32.vlgmr.msra.gmra.mrb[14].mxu0 %vm1337_vm10, %v1781_v13  ;;  %5233 = vmatprep.subr.bf16.mxu0 %v6610_v48  ;;  %v8014_v48 = vld [vmem:[#allocation3_spill] sm:$0xff]  ;;  %v5299_v13 = vpack.c.bf16 %v2342_v61, %v2340_v60  ;;  %v2377_v61 = vld [vmem:[%s8015_s0 + $0x210] sm:$0xff] }
 0x4d3   : > { %5235 = vmatpush3.bf16.msra.mxu0 %v6612_v27  ;;  %v1877_v27 = vpop.permute.xlu1 %1876  ;;  %v2375_v60 = vld [vmem:[%s8015_s0 + $0x200] sm:$0xff] }
 0x4d4   : > { %5237 = vmatprep.subr.bf16.mxu0 %v6614_v20 }
 0x4d7   : > { %5239 = vmatpush3.bf16.msra.mxu0 %v6631_v14 }
 0x4d8   : > { %5241 = vmatprep.subr.bf16.mxu0 %v6634_v31 }
 0x4db   : > { %5243 = vmatpush3.bf16.msra.mxu0 %v6649_v47 }
 0x4dc   : > { %5245 = vmatprep.subr.bf16.mxu0 %v6652_v15 }
 0x4df   : > { %5247 = vmatpush3.bf16.msra.mxu0 %v6667_v56 }
 0x4e0   : > { %5249 = vmatprep.subr.bf16.mxu0 %v6670_v59  ;;  %v2312_v59 = vld [vmem:[%s8015_s0 + $0x8] sm:$0xff] }
 0x4e3   : > { %5251 = vmatpush3.bf16.msra.mxu0 %v6685_v28  ;;  %v2314_v28 = vld [vmem:[%s8015_s0 + $0x18] sm:$0xff] }
 0x4e4   : > { %5253 = vmatprep.subr.bf16.mxu0 %v6688_v23  ;;  %v5271_v23 = vpack.c.bf16 %v2314_v28, %v2312_v59  ;;  %v2347_v59 = vld [vmem:[%s8015_s0 + $0x120] sm:$0xff]  ;;  %v2349_v28 = vld [vmem:[%s8015_s0 + $0x130] sm:$0xff] }
 0x4e7   : > { %5255 = vmatpush3.bf16.msra.mxu0 %v6703_v21  ;;  %v2313_v21 = vld [vmem:[%s8015_s0 + $0x10] sm:$0xff] }
 0x4e8   : > { %5257 = vmatprep.subr.bf16.mxu0 %v6706_v30 }
 0x4eb   : > { %5259 = vmatpush3.bf16.msra.mxu0 %v6724_v40  ;;  %v2316_v40 = vld [vmem:[%s8015_s0 + $0x28] sm:$0xff] }
 0x4ec   : > { %5261 = vmatprep.subr.bf16.mxu0 %v6748_v39  ;;  %v2318_v39 = vld [vmem:[%s8015_s0 + $0x38] sm:$0xff] }
 0x4ed   : > { %v5275_v26 = vpack.c.bf16 %v2318_v39, %v2316_v40  ;;  %v2351_v40 = vld [vmem:[%s8015_s0 + $0x140] sm:$0xff]  ;;  %v2353_v39 = vld [vmem:[%s8015_s0 + $0x150] sm:$0xff] }
 0x4ef   : > { %5263 = vmatpush3.bf16.msra.mxu0 %v8014_v48  ;;  %v5301_v48 = vpack.c.bf16 %v2341_v2, %v2339_v36 }
 0x4f0   : > { %5264 = vmatprep.subr.bf16.mxu0 %v8002_v62 }
 0x593   : > { %v1948_v20 = vpop.f32.mrb[12].mxu0 }
 0x594   : > { %v1949_v14 = vadd.f32 %v1948_v20, %v1877_v27  ;;  %v1950_v31 = vpop.f32.mrb[13].mxu0  ;;  %v2343_v20 = vld [vmem:[%s8015_s0 + $0x100] sm:$0xff] }
 0x595   : > { %v1951_v47 = vadd.f32 %v1950_v31, %v1877_v27  ;;  %v2348_v31 = vld [vmem:[%s8015_s0 + $0x128] sm:$0xff] }
 0x596   : > { %v2023_v56 = vmax.f32 %v1949_v14, 0.0  ;;  %v2345_v14 = vld [vmem:[%s8015_s0 + $0x110] sm:$0xff] }
 0x597   : > { %v2024_v15 = vmax.f32 %v1951_v47, 0.0  ;;  %v2350_v47 = vld [vmem:[%s8015_s0 + $0x138] sm:$0xff] }
 0x599   : > { %2093 = vmatprep.mubr.f32.mxu1 %v2024_v15  ;;  %2235 = vmatprep.mubr.f32.mxu0 %v2024_v15  ;;  %v5305_v15 = vpack.c.bf16 %v2345_v14, %v2343_v20  ;;  %v2379_v20 = vld [vmem:[%s8015_s0 + $0x220] sm:$0xff]  ;;  %v2381_v14 = vld [vmem:[%s8015_s0 + $0x230] sm:$0xff] }
 0x59a   : > { %2094 = vmatmul.mubr.f32.vlgmr.msra.gmra.mrb[4].mxu1 %v2023_v56  ;;  %2236 = vmatmul.mubr.f32.vlgmr.msra.gmra.mrb[16].mxu0 %v2023_v56  ;;  %v5307_v56 = vpack.c.bf16 %v2350_v47, %v2348_v31  ;;  %v2384_v47 = vld [vmem:[%s8015_s0 + $0x248] sm:$0xff] }
 0x59b   : > { %5225 = vmatpush1.bf16.msra.mxu1 %v6792_v32  ;;  %5266 = vmatpush3.bf16.msra.mxu0 %v6794_v1  ;;  %v2311_v1 = vld [vmem:[%s8015_s0] sm:$0xff] }
 0x59c   : > { %5228 = vmatprep.subr.msk.bf16.mxu1 %vm6810_vm14, %v6799_v44  ;;  %5267 = vmatprep.subr.bf16.mxu0 %v8002_v62 }
 0x59d   : > { %2164 = vmatprep.mubr.f32.mxu1 %v8003_v4  ;;  %4807 = vmatprep.mubr.msk.f32.mxu0 %vm5791_vm11, %v8003_v4 }
 0x59f   : > { %5231 = vmatpush1.bf16.msk.msra.mxu1 %vm6810_vm14, %v6816_v24  ;;  %5270 = vmatpush3.bf16.msk.msra.mxu0 %vm6810_vm14, %v6818_v55  ;;  %v5273_v24 = vpack.c.bf16 %v2313_v21, %v2311_v1  ;;  %v2354_v1 = vld [vmem:[%s8015_s0 + $0x158] sm:$0xff]  ;;  %v5309_v21 = vpack.c.bf16 %v2349_v28, %v2347_v59  ;;  %v2383_v59 = vld [vmem:[%s8015_s0 + $0x240] sm:$0xff]  ;;  %v2385_v28 = vld [vmem:[%s8015_s0 + $0x250] sm:$0xff] }
 0x5a0   : > { %5272 = vmatprep.subr.bf16.mxu0 %v5271_v23  ;;  %v2352_v23 = vld [vmem:[%s8015_s0 + $0x148] sm:$0xff] }
 0x5a5   : > { %v2019_v30 = vpop.f32.mrb[14].mxu0 }
 0x5a6   : > { %v2020_v32 = vadd.f32 %v2019_v30, %v1877_v27  ;;  %v4798_v44 = vpop.f32.mrb[15].mxu0  ;;  %v5303_v27 = vpack.c.bf16 %v2346_v51, %v2344_v9  ;;  %v5311_v30 = vpack.c.bf16 %v2354_v1, %v2352_v23  ;;  %v5337_v9 = vpack.c.bf16 %v2377_v61, %v2375_v60  ;;  %v2388_v1 = vld [vmem:[%s8015_s0 + $0x268] sm:$0xff] }
 0x5a7   : > { %v2358_v44 = vld [vmem:[%s8015_s0 + $0x178] sm:$0xff] }
 0x5a8   : > { %v2025_v55 = vmax.f32 %v2020_v32, 0.0  ;;  %v2356_v32 = vld [vmem:[%s8015_s0 + $0x168] sm:$0xff] }
 0x5aa   : > { %4405 = vmatmul.mubr.msk.f32.vlgmr.msra.gmra.mrb[4].mxu1 %vm1485_vm15, %v2025_v55  ;;  %4808 = vmatmul.mubr.msk.f32.vlgmr.msra.gmra.mrb[18].mxu0 %vm1485_vm15, %v2025_v55  ;;  %v5315_v55 = vpack.c.bf16 %v2358_v44, %v2356_v32 }
 0x5ab   : > { %5274 = vmatpush1.bf16.msra.mxu0 %v5273_v24  ;;  %2839 = vmatprep.mubr.f32.mxu1 %v8003_v4  ;;  %v5313_v24 = vpack.c.bf16 %v2353_v39, %v2351_v40  ;;  %v2387_v40 = vld [vmem:[%s8015_s0 + $0x260] sm:$0xff]  ;;  %v2389_v39 = vld [vmem:[%s8015_s0 + $0x270] sm:$0xff] }
 0x5ac   : > { %5276 = vmatprep.subr.bf16.mxu0 %v5275_v26  ;;  %v2355_v26 = vld [vmem:[%s8015_s0 + $0x160] sm:$0xff] }
 0x5ad   : > { %v5317_v8 = vpack.c.bf16 %v2357_v35, %v2355_v26  ;;  %v2391_v26 = vld [vmem:[%s8015_s0 + $0x280] sm:$0xf] }
 0x5ae   : > { %v2631_v35 = vld [vmem:[%s7935_s15] sm:$0xff] }
 0x5af   : > { %5278 = vmatpush1.bf16.msra.mxu0 %v5277_v17  ;;  %v5319_v17 = vpack.c.bf16 %v2362_v22, %v2360_v54 }
 0x5b0   : > { %5280 = vmatprep.subr.bf16.mxu0 %v5279_v11  ;;  %v2359_v11 = vld [vmem:[%s8015_s0 + $0x180] sm:$0xff] }
 0x5b1   : > { %v5321_v3 = vpack.c.bf16 %v2361_v37, %v2359_v11 }
 0x5b3   : > { %5282 = vmatpush1.bf16.msra.mxu0 %v5281_v16  ;;  %v2363_v16 = vld [vmem:[%s8015_s0 + $0x1a0] sm:$0xff] }
 0x5b4   : > { %5284 = vmatprep.subr.bf16.mxu0 %v5283_v34  ;;  %v5323_v34 = vpack.c.bf16 %v2366_v10, %v2364_v29  ;;  %v5325_v46 = vpack.c.bf16 %v2365_v38, %v2363_v16 }
 0x5b7   : > { %5286 = vmatpush1.bf16.msra.mxu0 %v5285_v52  ;;  %v5327_v52 = vpack.c.bf16 %v2370_v45, %v2368_v42 }
 0x5b8   : > { %5288 = vmatprep.subr.bf16.mxu0 %v5287_v57  ;;  %v2367_v57 = vld [vmem:[%s8015_s0 + $0x1c0] sm:$0xff] }
 0x5b9   : > { %v5329_v6 = vpack.c.bf16 %v2369_v58, %v2367_v57 }
 0x5bb   : > { %5290 = vmatpush1.bf16.msra.mxu0 %v5289_v12  ;;  %v5331_v12 = vpack.c.bf16 %v2374_v0, %v2372_v63 }
 0x5bc   : > { %5292 = vmatprep.subr.bf16.mxu0 %v5291_v19  ;;  %v2371_v19 = vld [vmem:[%s8015_s0 + $0x1e0] sm:$0xff] }
 0x5bd   : > { %v5333_v18 = vpack.c.bf16 %v2373_v25, %v2371_v19 }
 0x5bf   : > { %5294 = vmatpush1.bf16.msra.mxu0 %v5293_v7  ;;  %v5335_v7 = vpack.c.bf16 %v2378_v41, %v2376_v33 }
 0x5c0   : > { %5296 = vmatprep.subr.bf16.mxu0 %v5295_v43 }
 0x5c3   : > { %5298 = vmatpush1.bf16.msra.mxu0 %v5297_v5  ;;  %v2380_v5 = vld [vmem:[%s8015_s0 + $0x228] sm:$0xff] }
 0x5c4   : > { %5300 = vmatprep.subr.bf16.mxu0 %v5299_v13  ;;  %v2382_v13 = vld [vmem:[%s8015_s0 + $0x238] sm:$0xff] }
 0x5c5   : > { %v5339_v31 = vpack.c.bf16 %v2382_v13, %v2380_v5 }
 0x5c7   : > { %5302 = vmatpush1.bf16.msra.mxu0 %v5301_v48 }
 0x5c8   : > { %5304 = vmatprep.subr.bf16.mxu0 %v5303_v27 }
 0x5cb   : > { %5306 = vmatpush1.bf16.msra.mxu0 %v5305_v15  ;;  %v2386_v15 = vld [vmem:[%s8015_s0 + $0x258] sm:$0xff] }
 0x5cc   : > { %5308 = vmatprep.subr.bf16.mxu0 %v5307_v56  ;;  %v5341_v56 = vpack.c.bf16 %v2381_v14, %v2379_v20  ;;  %v5343_v23 = vpack.c.bf16 %v2386_v15, %v2384_v47 }
 0x5cf   : > { %5310 = vmatpush1.bf16.msra.mxu0 %v5309_v21  ;;  %v2390_v21 = vld [vmem:[%s8015_s0 + $0x278] sm:$0xff] }
 0x5d0   : > { %5312 = vmatprep.subr.bf16.mxu0 %v5311_v30  ;;  %v5345_v30 = vpack.c.bf16 %v2385_v28, %v2383_v59  ;;  %v5347_v32 = vpack.c.bf16 %v2390_v21, %v2388_v1 }
 0x5d3   : > { %5314 = vmatpush1.bf16.msra.mxu0 %v5313_v24  ;;  %v5349_v24 = vpack.c.bf16 %v2389_v39, %v2387_v40 }
 0x5d4   : > { %5316 = vmatprep.subr.bf16.mxu0 %v5315_v55  ;;  %v2392_v55 = vld [vmem:[%s8015_s0 + $0x288] sm:$0xf] }
 0x5d7   : > { %5318 = vmatpush1.bf16.msra.mxu0 %v5317_v8  ;;  %v2632_v8 = vld [vmem:[%s7935_s15 + $0x8] sm:$0xff] }
 0x5d8   : > { %5320 = vmatprep.subr.bf16.mxu0 %v5319_v17 }
 0x5db   : > { %5322 = vmatpush1.bf16.msra.mxu0 %v5321_v3 }
 0x5dc   : > { %5324 = vmatprep.subr.bf16.mxu0 %v5323_v34 }
 0x5df   : > { %5326 = vmatpush1.bf16.msra.mxu0 %v5325_v46 }
 0x5e0   : > { %5328 = vmatprep.subr.bf16.mxu0 %v5327_v52 }
 0x5e3   : > { %5330 = vmatpush1.bf16.msra.mxu0 %v5329_v6 }
 0x5e4   : > { %5332 = vmatprep.subr.bf16.mxu0 %v5331_v12 }
 0x5e7   : > { %5334 = vmatpush1.bf16.msra.mxu0 %v5333_v18 }
 0x5e8   : > { %5336 = vmatprep.subr.bf16.mxu0 %v5335_v7 }
 0x66d   : > { %v4659_v43 = vpop.f32.mrb[16].mxu0 }
 0x66e   : > { %v4660_v50 = vpop.f32.mrb[17].mxu0 }
 0x66f   : > { %v4661_v53 = vadd.f32 %v4660_v50, %v4659_v43 }
 0x67d   : > { %v7171_v36 = vpop.f32.mrb[4].mxu1  ;;  %v2307_v2 = vpop.f32.mrb[18].mxu0 }
 0x67e   : > { %v7173_v51 = vadd.f32 %v4661_v53, %v2307_v2  ;;  %v4809_v48 = vpop.f32.mrb[19].mxu0  ;;  %2682 = vrot.lane.b32.xlu0 %v7171_v36, %s8004_s28  ;;  %2671 = vrot.lane.b32.xlu1 %v7171_v36, %s8005_s3  ;;  %v7179_v27 = vpop.f32.mrb[5].mxu1 }
 0x67f   : > { %2467 = vmatprep.mubr.f32.mxu0 %v7179_v27 }
 0x680   : > { %2468 = vmatmul.mubr.f32.vlgmr.msra.gmra.mrb[20].mxu0 %v7171_v36  ;;  %v5705_v44 = vpack.i.bf16 %v7173_v51, %v7179_v27 }
 0x681   : > { %5338 = vmatpush1.bf16.msra.mxu0 %v5337_v9  ;;  %2538 = vmatprep.mubr.f32.mxu0 %v8003_v4 }
 0x682   : > { %2704 = vrot.lane.b32.xlu0 %v7171_v36, %s8006_s8  ;;  %2693 = vrot.lane.b32.xlu1 %v7171_v36, %s8007_s27 }
 0x683   : > { %5340 = vmatprep.subr.bf16.mxu0 %v5339_v31 }
 0x685   : > { %5342 = vmatpush1.bf16.msra.mxu0 %v5341_v56 }
 0x686   : > { %2726 = vrot.lane.b32.xlu0 %v7171_v36, %s8008_s30  ;;  %2715 = vrot.lane.b32.xlu1 %v7171_v36, %s8009_s1 }
 0x687   : > { %5344 = vmatprep.subr.bf16.mxu0 %v5343_v23 }
 0x689   : > { %5346 = vmatpush1.bf16.msra.mxu0 %v5345_v30 }
 0x68a   : > { %5706 = vrot.lane.b32.xlu1 %v5705_v44, %s8007_s27  ;;  %5696 = vrot.lane.b32.xlu0 %v5705_v44, %s8005_s3  ;;  %s5795_s27 = smov 107  }
 0x68b   : > { %5348 = vmatprep.subr.bf16.mxu0 %v5347_v32 }
 0x68d   : > { %5350 = vmatpush1.bf16.msra.mxu0 %v5349_v24  ;;  %v2629_v24 = vld [vmem:[%s7934_s14] sm:$0xff] }
 0x68e   : > { %5716 = vrot.lane.b32.xlu1 %v5705_v44, %s8009_s1  ;;  %5701 = vrot.lane.b32.xlu0 %v5705_v44, %s8004_s28 }
 0x68f   : > { %4408 = vmatprep.subr.msk.mxu0 %vm810_vm0, %v2392_v55 }
 0x691   : > { %4409 = vmatpush1.msk.msra.mxu0 %vm810_vm0, %v2391_v26 }
 0x692   : > { %4410 = vmatmul.mubr.msk.f32.vlgmr.msra.gmra.mrb[20].mxu0 %vm2393_vm1, %v7173_v51  ;;  %5726 = vrot.lane.b32.xlu1 %v5705_v44, %s8010_s26 }
 0x693   : > { %5711 = vrot.lane.b32.xlu0 %v5705_v44, %s8006_s8  ;;  %2620 = vmatprep.mubr.f32.mxu0 %v8003_v4  ;;  %s8022_s8 = sld [smem:[#allocation18_spill]] }
 0x696   : > { %2737 = vrot.lane.b32.xlu1 %v7171_v36, %s8010_s26  ;;  %s5797_s26 = smov 106  }
 0x697   : > { %5721 = vrot.lane.b32.xlu0 %v5705_v44, %s8008_s30 }
 0x69a   : > { %2752 = vrot.lane.b32.xlu1 %v7173_v51, %s8011_s4 }
 0x69b   : > { %2750 = vrot.lane.b32.xlu0 %v7179_v27, %s8011_s4 }
 0x69e   : > { %2761 = vperm.xlu1 %5659, %v2631_v35   ;;  %v2630_v35 = vld [vmem:[%s7934_s14 + $0x8] sm:$0xff] }
 0x69f   : > { %2748 = vrot.lane.b32.xlu0 %v7171_v36, %s8011_s4  ;;  %s8018_s4 = sld [smem:[#allocation11_spill]] }
 0x6a3   : > { %2766 = vperm.xlu0 %5730, %v2632_v8  }
 0x6f0   : > { %v2683_v54 = vpop.permute.xlu0 %2682  ;;  %v2672_v22 = vpop.permute.xlu1 %2671 }
 0x6f4   : > { %v2705_v17 = vpop.permute.xlu0 %2704  ;;  %v2694_v11 = vpop.permute.xlu1 %2693 }
 0x6f8   : > { %v2727_v37 = vpop.permute.xlu0 %2726  ;;  %v2716_v3 = vpop.permute.xlu1 %2715 }
 0x6fc   : > { %v5707_v29 = vpop.permute.xlu1 %5706  ;;  %v5697_v10 = vpop.permute.xlu0 %5696 }
 0x6fd   : > { %v5699_v16 = vunpack.i.h.bf16 %v5697_v10  ;;  %v5698_v34 = vunpack.i.l.bf16 %v5697_v10  ;;  %v5709_v38 = vunpack.i.h.bf16 %v5707_v29  ;;  %v5708_v42 = vunpack.i.l.bf16 %v5707_v29 }
 0x6ff   : > { %v2677_v45 = vsel %vm1242_vm3, %v2672_v22, %v5698_v34  ;;  %v2678_v46 = vsel %vm1242_vm3, %v5698_v34, %v5699_v16  ;;  %v2699_v12 = vsel %vm1266_vm2, %v2694_v11, %v5708_v42  ;;  %v2700_v19 = vsel %vm1266_vm2, %v5708_v42, %v5709_v38  ;;  %v2650_v22 = vld [vmem:[%s8016_s25 + $0x88] sm:$0xff]  ;;  %v2545_v34 = vld [vmem:[%s7932_s12] sm:$0xff] }
 0x700   : > { %v5353_v52 = vpack.c.bf16 %v2677_v45, %v7171_v36  ;;  %v5717_v57 = vpop.permute.xlu1 %5716  ;;  %v5702_v58 = vpop.permute.xlu0 %5701  ;;  %v5351_v63 = vpack.c.bf16 %v2678_v46, %v7179_v27  ;;  %v5367_v55 = vpack.c.bf16 %v5699_v16, %v7173_v51  ;;  %v2634_v11 = vld [vmem:[%s8016_s25 + $0x8] sm:$0xff]  ;;  %vm2552_vm2 = vcmask 64512   ;;  %v2635_v45 = vld [vmem:[%s8016_s25 + $0x10] sm:$0xff]  ;;  %v2636_v46 = vld [vmem:[%s8016_s25 + $0x18] sm:$0xff] }
 0x701   : > { %v5704_v0 = vunpack.i.h.bf16 %v5702_v58  ;;  %v5703_v6 = vunpack.i.l.bf16 %v5702_v58  ;;  %v5719_v25 = vunpack.i.h.bf16 %v5717_v57  ;;  %v5718_v18 = vunpack.i.l.bf16 %v5717_v57  ;;  %v2654_v57 = vld [vmem:[%s8016_s25 + $0xa8] sm:$0xff] }
 0x702   : > { %5352 = vmatprep.subr.bf16.mxu1 %v5351_v63  ;;  %v5389_v58 = vpack.c.bf16 %v2636_v46, %v2635_v45  ;;  %vm3168_vm3 = vcmask 130048  }
 0x703   : > { %v2688_v33 = vsel %vm1254_vm4, %v2683_v54, %v5703_v6  ;;  %5354 = vmatpush1.bf16.msra.mxu1 %v5353_v52  ;;  %v2689_v41 = vsel %vm1254_vm4, %v5703_v6, %v5704_v0  ;;  %v2721_v5 = vsel %vm1290_vm5, %v2716_v3, %v5718_v18  ;;  %v2722_v13 = vsel %vm1290_vm5, %v5718_v18, %v5719_v25  ;;  %v2649_v54 = vld [vmem:[%s8016_s25 + $0x80] sm:$0xff]  ;;  %v2652_v3 = vld [vmem:[%s8016_s25 + $0x98] sm:$0xff]  ;;  %v2638_v6 = vld [vmem:[%s8016_s25 + $0x28] sm:$0xff] }
 0x704   : > { %v5357_v7 = vpack.c.bf16 %v2699_v12, %v2688_v33  ;;  %v5727_v43 = vpop.permute.xlu1 %5726  ;;  %v5355_v50 = vpack.c.bf16 %v2700_v19, %v2689_v41  ;;  %v5371_v26 = vpack.c.bf16 %v5709_v38, %v5704_v0  ;;  %v5383_v10 = vpack.c.bf16 %v2650_v22, %v2649_v54  ;;  %v2653_v52 = vld [vmem:[%s8016_s25 + $0xa0] sm:$0xff]  ;;  %v2655_v12 = vld [vmem:[%s8016_s25 + $0xb0] sm:$0xff]  ;;  %v2656_v19 = vld [vmem:[%s8016_s25 + $0xb8] sm:$0xff] }
 0x705   : > { %v5712_v53 = vpop.permute.xlu0 %5711  ;;  %v5729_v36 = vunpack.i.h.bf16 %v5727_v43  ;;  %v5728_v2 = vunpack.i.l.bf16 %v5727_v43  ;;  %v5391_v63 = vpack.c.bf16 %v2654_v57, %v2653_v52  ;;  %v2637_v0 = vld [vmem:[%s8016_s25 + $0x20] sm:$0xff]  ;;  %v5395_v18 = vpack.c.bf16 %v2656_v19, %v2655_v12  ;;  %v2639_v33 = vld [vmem:[%s8016_s25 + $0x30] sm:$0xff]  ;;  %v2640_v41 = vld [vmem:[%s8016_s25 + $0x38] sm:$0xff] }
 0x706   : > { %v5714_v60 = vunpack.i.h.bf16 %v5712_v53  ;;  %v5713_v61 = vunpack.i.l.bf16 %v5712_v53  ;;  %5356 = vmatprep.subr.bf16.mxu1 %v5355_v50  ;;  %v2658_v43 = vld [vmem:[%s8016_s25 + $0xc8] sm:$0xff]  ;;  %v5397_v50 = vpack.c.bf16 %v2640_v41, %v2639_v33  ;;  %v2668_v54 = vld [vmem:[%s8016_s25 + $0x118] sm:$0x3f]  ;;  %vm3252_vm4 = vcmask 637952  }
 0x707   : > { %5358 = vmatpush1.bf16.msra.mxu1 %v5357_v7  ;;  %v2744_v23 = vsel %vm1314_vm7, %v5728_v2, %v5729_v36  ;;  %v2657_v7 = vld [vmem:[%s8016_s25 + $0xc0] sm:$0xff]  ;;  %vm3539_vm5 = vcmask 818176  }
 0x708   : > { %v2710_v9 = vsel %vm1278_vm6, %v2705_v17, %v5713_v61  ;;  %v2738_v48 = vpop.permute.xlu1 %2737  ;;  %v2711_v27 = vsel %vm1278_vm6, %v5713_v61, %v5714_v60  ;;  %v5375_v8 = vpack.c.bf16 %v5719_v25, %v5714_v60  ;;  %v2633_v17 = vld [vmem:[%s8016_s25] sm:$0xff]  ;;  %v5393_v25 = vpack.c.bf16 %v2638_v6, %v2637_v0  ;;  %v2642_v61 = vld [vmem:[%s8016_s25 + $0x48] sm:$0xff] }
 0x709   : > { %v5361_v20 = vpack.c.bf16 %v2721_v5, %v2710_v9  ;;  %v5722_v14 = vpop.permute.xlu0 %5721  ;;  %v5359_v31 = vpack.c.bf16 %v2722_v13, %v2711_v27  ;;  %v2743_v56 = vsel %vm1314_vm7, %v2738_v48, %v5728_v2  ;;  %v5385_v38 = vpack.c.bf16 %v2634_v11, %v2633_v17  ;;  %v2641_v60 = vld [vmem:[%s8016_s25 + $0x40] sm:$0xff]  ;;  %v2659_v5 = vld [vmem:[%s8016_s25 + $0xd0] sm:$0xff]  ;;  %v2660_v13 = vld [vmem:[%s8016_s25 + $0xd8] sm:$0xff] }
 0x70a   : > { %v5724_v47 = vunpack.i.h.bf16 %v5722_v14  ;;  %v5723_v15 = vunpack.i.l.bf16 %v5722_v14  ;;  %v5399_v53 = vpack.c.bf16 %v2658_v43, %v2657_v7  ;;  %v5403_v2 = vpack.c.bf16 %v2660_v13, %v2659_v5  ;;  %v2643_v9 = vld [vmem:[%s8016_s25 + $0x50] sm:$0xff]  ;;  %v2644_v48 = vld [vmem:[%s8016_s25 + $0x58] sm:$0xff]  ;;  %v2661_v27 = vld [vmem:[%s8016_s25 + $0xe0] sm:$0xff] }
 0x70b   : > { %5360 = vmatprep.subr.bf16.mxu1 %v5359_v31  ;;  %v5405_v14 = vpack.c.bf16 %v2644_v48, %v2643_v9  ;;  %v4089_v5 = vld [vmem:[%s7941_s21 + $0x18] sm:$0xff]  ;;  %v3097_v13 = vld [vmem:[%s7937_s17 + $0x8] sm:$0xff]  ;;  %v4068_v9 = vld [vmem:[%s7939_s19] sm:$0xff] }
 0x70c   : > { %v2732_v59 = vsel %vm1302_vm8, %v2727_v37, %v5723_v15  ;;  %5362 = vmatpush1.bf16.msra.mxu1 %v5361_v20  ;;  %v2733_v28 = vsel %vm1302_vm8, %v5723_v15, %v5724_v47  ;;  %v2753_v21 = vpop.permute.xlu1 %2752  ;;  %v5379_v51 = vpack.c.bf16 %v5729_v36, %v5724_v47  ;;  %v2651_v37 = vld [vmem:[%s8016_s25 + $0x90] sm:$0xff]  ;;  %v5401_v36 = vpack.c.bf16 %v2642_v61, %v2641_v60  ;;  %v2662_v20 = vld [vmem:[%s8016_s25 + $0xe8] sm:$0xff]  ;;  %v2645_v47 = vld [vmem:[%s8016_s25 + $0x60] sm:$0xff] }
 0x70d   : > { %v5365_v1 = vpack.c.bf16 %v2743_v56, %v2732_v59  ;;  %v2751_v30 = vpop.permute.xlu0 %2750  ;;  %v5363_v40 = vpack.c.bf16 %v2744_v23, %v2733_v28  ;;  %v5387_v42 = vpack.c.bf16 %v2652_v3, %v2651_v37  ;;  %v5407_v31 = vpack.c.bf16 %v2662_v20, %v2661_v27  ;;  %v2646_v15 = vld [vmem:[%s8016_s25 + $0x68] sm:$0xff]  ;;  %v2663_v56 = vld [vmem:[%s8016_s25 + $0xf0] sm:$0xff]  ;;  %v2664_v59 = vld [vmem:[%s8016_s25 + $0xf8] sm:$0xff] }
 0x70e   : > { %v2755_v39 = vsel %vm1326_vm9, %v2751_v30, %v2753_v21  ;;  %v5409_v28 = vpack.c.bf16 %v2646_v15, %v2645_v47  ;;  %v5411_v23 = vpack.c.bf16 %v2664_v59, %v2663_v56  ;;  %v3096_v60 = vld [vmem:[%s7937_s17] sm:$0xff]  ;;  %v4088_v27 = vld [vmem:[%s7941_s21 + $0x10] sm:$0xff] }
 0x70f   : > { %5364 = vmatprep.subr.bf16.mxu1 %v5363_v40  ;;  %v2666_v40 = vld [vmem:[%s8016_s25 + $0x108] sm:$0xff]  ;;  %v2546_v61 = vld [vmem:[%s7933_s13] sm:$0xff] }
 0x710   : > { %5366 = vmatpush1.bf16.msra.mxu1 %v5365_v1  ;;  %v2647_v1 = vld [vmem:[%s8016_s25 + $0x70] sm:$0xff]  ;;  %v4086_v48 = vld [vmem:[%s7941_s21] sm:$0xff] }
 0x711   : > { %v2749_v32 = vpop.permute.xlu0 %2748  ;;  %2791 = vmatprep.subr.mxu1 %v2755_v39 }
 0x712   : > { %v2754_v44 = vsel %vm1326_vm9, %v2749_v32, %v2751_v30  ;;  %v2665_v30 = vld [vmem:[%s8016_s25 + $0x100] sm:$0xff] }
 0x713   : > { %v5415_v32 = vpack.c.bf16 %v2666_v40, %v2665_v30 }
 0x714   : > { %2792 = vmatpush1.msra.mxu1 %v2754_v44 }
 0x715   : > { %4412 = vmatmul.mubr.msk.f32.vlgmr.msra.gmra.mrb[6].mxu1 %vm1337_vm10, %v2629_v24  ;;  %5368 = vmatprep.subr.bf16.mxu1 %v5367_v55 }
 0x716   : > { %5370 = vmatpush3.bf16.msra.mxu1 %v5367_v55  ;;  %2845 = vmatprep.mubr.f32.mxu1 %v8003_v4 }
 0x717   : > { %5372 = vmatprep.subr.bf16.mxu1 %v5371_v26 }
 0x719   : > { %4413 = vmatmul.mubr.msk.f32.gmra.mrb[8].mxu1 %vm1337_vm10, %v2630_v35 }
 0x71a   : > { %5374 = vmatpush3.bf16.msra.mxu1 %v5371_v26  ;;  %4828 = vmatprep.mubr.msk.f32.mxu1 %vm1337_vm10, %v2629_v24 }
 0x71b   : > { %5376 = vmatprep.subr.bf16.mxu1 %v5375_v8 }
 0x71d   : > { %v2762_v44 = vpop.permute.xlu1 %2761 }
 0x71e   : > { %5378 = vmatpush3.bf16.msra.mxu1 %v5375_v8 }
 0x71f   : > { %5380 = vmatprep.subr.bf16.mxu1 %v5379_v51 }
 0x722   : > { %5382 = vmatpush3.bf16.msra.mxu1 %v5379_v51  ;;  %v2767_v8 = vpop.permute.xlu0 %2766  ;;  %v2667_v51 = vld [vmem:[%s8016_s25 + $0x110] sm:$0xff] }
 0x723   : > { %4826 = vmatprep.subr.mxu1 %v2753_v21 }
 0x726   : > { %4827 = vmatpush3.msra.mxu1 %v2753_v21  ;;  %v2648_v21 = vld [vmem:[%s8016_s25 + $0x78] sm:$0xff] }
 0x727   : > { %4829 = vmatmul.mubr.msk.f32.vlgmr.msra.gmra.mrb[10].mxu1 %vm1337_vm10, %v2630_v35  ;;  %v5413_v39 = vpack.c.bf16 %v2648_v21, %v2647_v1 }
 0x765   : > { %v2540_v29 = vpop.f32.mrb[20].mxu0 }
 0x766   : > { %v2542_v16 = vpop.f32.mrb[21].mxu0 }
 0x767   : > { %2556 = vmatprep.subr.mxu0 %v2542_v16 }
 0x768   : > { %2557 = vmatpush1.msra.mxu0 %v2540_v29  ;;  %v5419_v29 = vpack.c.bf16 %v2668_v54, %v2667_v51 }
 0x769   : > { %5384 = vmatprep.subr.bf16.mxu0 %v5383_v10  ;;  %4411 = vmatmul.mubr.msk.f32.vlgmr.msra.gmra.mrb[22].mxu0 %vm2552_vm2, %v2545_v34 }
 0x76a   : > { %5386 = vmatpush3.bf16.msra.mxu0 %v5385_v38 }
 0x76b   : > { %5388 = vmatprep.subr.bf16.mxu0 %v5387_v42 }
 0x76e   : > { %5390 = vmatpush3.bf16.msra.mxu0 %v5389_v58 }
 0x76f   : > { %5392 = vmatprep.subr.bf16.mxu0 %v5391_v63 }
 0x772   : > { %5394 = vmatpush3.bf16.msra.mxu0 %v5393_v25 }
 0x773   : > { %5396 = vmatprep.subr.bf16.mxu0 %v5395_v18 }
 0x776   : > { %5398 = vmatpush3.bf16.msra.mxu0 %v5397_v50 }
 0x777   : > { %5400 = vmatprep.subr.bf16.mxu0 %v5399_v53 }
 0x77a   : > { %5402 = vmatpush3.bf16.msra.mxu0 %v5401_v36  ;;  %v3093_v36 = vld [vmem:[%s7936_s16 + $0x8] sm:$0xff] }
 0x77b   : > { %5404 = vmatprep.subr.bf16.mxu0 %v5403_v2  ;;  %v4087_v2 = vld [vmem:[%s7941_s21 + $0x8] sm:$0xff] }
 0x77e   : > { %5406 = vmatpush3.bf16.msra.mxu0 %v5405_v14 }
 0x77f   : > { %5408 = vmatprep.subr.bf16.mxu0 %v5407_v31 }
 0x782   : > { %5410 = vmatpush3.bf16.msra.mxu0 %v5409_v28 }
 0x783   : > { %5412 = vmatprep.subr.bf16.mxu0 %v5411_v23 }
 0x786   : > { %5414 = vmatpush3.bf16.msra.mxu0 %v5413_v39 }
 0x787   : > { %5416 = vmatprep.subr.bf16.mxu0 %v5415_v32 }
 0x7e8   : > { %v2841_v24 = vpop.f32.mrb[6].mxu1 }
 0x7e9   : > { %v2842_v55 = vadd.f32 %v2841_v24, %v2762_v44  ;;  %v2843_v26 = vpop.f32.mrb[7].mxu1 }
 0x7ea   : > { %v2844_v35 = vadd.f32 %v2843_v26, %v2762_v44 }
 0x7eb   : > { %v2927_v11 = vmax.f32 %v2842_v55, 0.0 }
 0x7ec   : > { %v2928_v22 = vmax.f32 %v2844_v35, 0.0  ;;  %v2847_v17 = vpop.f32.mrb[8].mxu1 }
 0x7ed   : > { %v2848_v37 = vadd.f32 %v2847_v17, %v2767_v8  ;;  %v2849_v3 = vpop.f32.mrb[9].mxu1 }
 0x7ee   : > { %3006 = vmatprep.mubr.f32.mxu0 %v2928_v22  ;;  %v2850_v10 = vadd.f32 %v2849_v3, %v2767_v8 }
 0x7ef   : > { %3007 = vmatmul.mubr.f32.vlgmr.msra.gmra.mrb[24].mxu0 %v2927_v11  ;;  %v2930_v16 = vmax.f32 %v2848_v37, 0.0 }
 0x7f0   : > { %v2931_v34 = vmax.f32 %v2850_v10, 0.0  ;;  %5418 = vmatpush3.bf16.msra.mxu0 %v5415_v32 }
 0x7f1   : > { %5421 = vmatprep.subr.msk.bf16.mxu0 %vm6810_vm14, %v5419_v29 }
 0x7f2   : > { %3011 = vmatprep.mubr.f32.mxu0 %v2931_v34 }
 0x7f3   : > { %3012 = vmatmul.mubr.f32.gmra.mrb[26].mxu0 %v2930_v16 }
 0x7f4   : > { %5424 = vmatpush3.bf16.msk.msra.mxu0 %vm6810_vm14, %v5419_v29 }
 0x7f5   : > { %5425 = vmatprep.subr.bf16.mxu0 %v8002_v62 }
 0x7fa   : > { %v4830_v38 = vpop.f32.mrb[10].mxu1 }
 0x7fb   : > { %v2924_v42 = vadd.f32 %v4830_v38, %v2767_v8  ;;  %v2918_v45 = vpop.f32.mrb[11].mxu1 }
 0x7fc   : > { %v2919_v46 = vadd.f32 %v2918_v45, %v2762_v44 }
 0x7fd   : > { %v2932_v57 = vmax.f32 %v2924_v42, 0.0 }
 0x7fe   : > { %v2929_v52 = vmax.f32 %v2919_v46, 0.0 }
 0x800   : > { %4839 = vmatprep.mubr.msk.f32.mxu0 %vm1485_vm15, %v2929_v52 }
 0x801   : > { %4840 = vmatmul.mubr.msk.f32.vlgmr.msra.gmra.mrb[28].mxu0 %vm1485_vm15, %v2932_v57 }
 0x802   : > { %4419 = vmatprep.mubr.msk.f32.mxu0 %vm3168_vm3, %v3093_v36 }
 0x83c   : > { %v7403_v58 = vpop.f32.mrb[22].mxu0 }
 0x83d   : > { %v7405_v63 = vpop.f32.mrb[23].mxu0 }
 0x8c2   : > { %v4710_v0 = vpop.f32.mrb[24].mxu0 }
 0x8c3   : > { %v4711_v6 = vpop.f32.mrb[25].mxu0 }
 0x8c4   : > { %v4712_v12 = vadd.f32 %v4711_v6, %v4710_v0 }
 0x8c6   : > { %v4713_v19 = vpop.f32.mrb[26].mxu0 }
 0x8c7   : > { %v4714_v25 = vpop.f32.mrb[27].mxu0 }
 0x8c8   : > { %v4715_v18 = vadd.f32 %v4714_v25, %v4713_v19 }
 0x8d4   : > { %v4841_v33 = vpop.f32.mrb[28].mxu0 }
 0x8d5   : > { %v3089_v41 = vadd.f32 %v4841_v33, %v4715_v18  ;;  %v3083_v7 = vpop.f32.mrb[29].mxu0 }
 0x8d6   : > { %v3084_v43 = vadd.f32 %v4712_v12, %v3083_v7 }
 0x8d8   : > { %v5741_v50 = vpack.i.bf16 %v3089_v41, %v3084_v43  ;;  %v5426_v53 = vpack.c.bf16 %v3089_v41, %v3084_v43  ;;  %v3094_v43 = vld [vmem:[%s7936_s16 + $0x10] sm:$0xff] }
 0x8da   : > { %5742 = vrot.lane.b32.xlu0 %v5741_v50, %s5793_s24  ;;  %5732 = vrot.lane.b32.xlu1 %v5741_v50, %s8005_s3  ;;  %s8020_s24 = sld [smem:[#allocation17_spill]] }
 0x8db   : > { %5427 = vmatpush1.bf16.msra.mxu0 %v5426_v53 }
 0x8dc   : > { %5428 = vmatprep.subr.bf16.mxu0 %v8002_v62 }
 0x8de   : > { %5752 = vrot.lane.b32.xlu0 %v5741_v50, %s5794_s6  ;;  %5737 = vrot.lane.b32.xlu1 %v5741_v50, %s8004_s28  ;;  %s4529_s28 = sshll.u32 %s8025_s2, 4 }
 0x8df   : > { %s791_s29 = scalar_lea.vmem %s8019_s23, %s4529_s28 }
 0x8e2   : > { %5762 = vrot.lane.b32.xlu0 %v5741_v50, %s5795_s27  ;;  %5747 = vrot.lane.b32.xlu1 %v5741_v50, %s5796_s9  ;;  %s4528_s27 = sshll.u32 %s8025_s2, 5  ;;  %s8021_s9 = sshll.u32 %s8025_s2, 3 }
 0x8e3   : > { %s7476_s5 = scalar_lea.vmem %s7942_s22, %s4528_s27  ;;  %s796_s6 = scalar_lea.vmem %s8020_s24, %s4528_s27 }
 0x8e4   : > { %s801_s30 = scalar_lea.vmem %s8022_s8, %s8021_s9 }
 0x8e6   : > { %3160 = vperm.xlu0 %5730, %v3096_v60   ;;  %5757 = vrot.lane.b32.xlu1 %v5741_v50, %s8009_s1 }
 0x8ea   : > { %2549 = vperm.xlu0 %5730, %v2546_v61   ;;  %5767 = vrot.lane.b32.xlu1 %v5741_v50, %s5797_s26  ;;  %s8017_s26 = sld [smem:[#allocation10_spill]] }
 0x8ee   : > { %4107 = vperm.xlu0 %5730, %v4089_v5   ;;  %3165 = vperm.xlu1 %5659, %v3097_v13  }
 0x8f0   : > { %v3098_v20 = vld [vmem:[%s8017_s26] sm:$0xff]  ;;  %v3099_v14 = vld [vmem:[%s8017_s26 + $0x8] sm:$0xff]  ;;  %v3100_v31 = vld [vmem:[%s8017_s26 + $0x10] sm:$0xff] }
 0x8f1   : > { %v5452_v47 = vpack.c.bf16 %v3099_v14, %v3098_v20  ;;  %v3101_v15 = vld [vmem:[%s8017_s26 + $0x18] sm:$0xff]  ;;  %v3102_v59 = vld [vmem:[%s8017_s26 + $0x20] sm:$0xff]  ;;  %v3103_v28 = vld [vmem:[%s8017_s26 + $0x28] sm:$0xff] }
 0x8f2   : > { %4097 = vperm.xlu0 %5730, %v4087_v2   ;;  %4071 = vperm.xlu1 %5659, %v4068_v9   ;;  %v5456_v56 = vpack.c.bf16 %v3101_v15, %v3100_v31  ;;  %v5460_v23 = vpack.c.bf16 %v3103_v28, %v3102_v59  ;;  %v3104_v50 = vld [vmem:[%s8017_s26 + $0x30] sm:$0xff]  ;;  %v3105_v53 = vld [vmem:[%s8017_s26 + $0x38] sm:$0xff]  ;;  %v3106_v61 = vld [vmem:[%s8017_s26 + $0x40] sm:$0xff] }
 0x8f3   : > { %5453 = vmatprep.subr.bf16.mxu1 %v5452_v47  ;;  %v5464_v60 = vpack.c.bf16 %v3105_v53, %v3104_v50  ;;  %v3107_v5 = vld [vmem:[%s8017_s26 + $0x48] sm:$0x3f]  ;;  %v4428_v59 = vld [vmem:[%s8018_s4 + $0xd8] sm:$0xff]  ;;  %v4451_v50 = vld [vmem:[%s8018_s4 + $0x190] sm:$0xf] }
 0x8f4   : > { %5455 = vmatpush3.bf16.msra.mxu1 %v5452_v47  ;;  %v5468_v13 = vpack.c.bf16 %v3107_v5, %v3106_v61  ;;  %v4430_v28 = vld [vmem:[%s8018_s4 + $0xe8] sm:$0xff]  ;;  %v3411_v5 = vld [vmem:[%s8018_s4] sm:$0xff] }
 0x8f5   : > { %5457 = vmatprep.subr.bf16.mxu1 %v5456_v56  ;;  %v3412_v53 = vld [vmem:[%s8018_s4 + $0x8] sm:$0xff] }
 0x8f6   : > { %4092 = vperm.xlu1 %5659, %v4086_v48  }
 0x8f8   : > { %5459 = vmatpush3.bf16.msra.mxu1 %v5456_v56 }
 0x8f9   : > { %5461 = vmatprep.subr.bf16.mxu1 %v5460_v23 }
 0x8fa   : > { %4102 = vperm.xlu1 %5659, %v4088_v27  }
 0x8fc   : > { %5463 = vmatpush3.bf16.msra.mxu1 %v5460_v23  ;;  %v3337_v23 = vld [vmem:[%s7938_s18] sm:$0xff] }
 0x8fd   : > { %5465 = vmatprep.subr.bf16.mxu1 %v5464_v60 }
 0x900   : > { %5467 = vmatpush3.bf16.msra.mxu1 %v5464_v60  ;;  %v3414_v60 = vld [vmem:[%s8018_s4 + $0x18] sm:$0xff] }
 0x901   : > { %5470 = vmatprep.subr.msk.bf16.mxu1 %vm6810_vm14, %v5468_v13  ;;  %v5504_v61 = vpack.c.bf16 %v3414_v60, %v3412_v53 }
 0x904   : > { %5473 = vmatpush3.bf16.msk.msra.mxu1 %vm6810_vm14, %v5468_v13  ;;  %v3413_v13 = vld [vmem:[%s8018_s4 + $0x10] sm:$0xff] }
 0x905   : > { %5474 = vmatprep.subr.bf16.mxu1 %v8002_v62 }
 0x94c   : > { %v5733_v1 = vpop.permute.xlu1 %5732  ;;  %v5743_v39 = vpop.permute.xlu0 %5742 }
 0x94d   : > { %v5735_v21 = vunpack.i.h.bf16 %v5733_v1  ;;  %v5734_v30 = vunpack.i.l.bf16 %v5733_v1  ;;  %v5745_v55 = vunpack.i.h.bf16 %v5743_v39  ;;  %v5744_v26 = vunpack.i.l.bf16 %v5743_v39  ;;  %v4459_v1 = vld [vmem:[%s7938_s18 + $0x10] sm:$0xff]  ;;  %v4432_v39 = vld [vmem:[%s8018_s4 + $0xf8] sm:$0xff] }
 0x94f   : > { %v5429_v40 = vpack.c.bf16 %v5735_v21, %v5734_v30  ;;  %v5435_v51 = vpack.c.bf16 %v5745_v55, %v5744_v26  ;;  %v4427_v21 = vld [vmem:[%s8018_s4 + $0xd0] sm:$0xff]  ;;  %v4429_v30 = vld [vmem:[%s8018_s4 + $0xe0] sm:$0xff] }
 0x950   : > { %v5738_v32 = vpop.permute.xlu1 %5737  ;;  %v5753_v17 = vpop.permute.xlu0 %5752  ;;  %v4431_v26 = vld [vmem:[%s8018_s4 + $0xf0] sm:$0xff] }
 0x951   : > { %v5740_v44 = vunpack.i.h.bf16 %v5738_v32  ;;  %v5739_v24 = vunpack.i.l.bf16 %v5738_v32  ;;  %5430 = vmatpush1.bf16.msra.mxu0 %v5429_v40  ;;  %v5755_v11 = vunpack.i.h.bf16 %v5753_v17  ;;  %v5754_v37 = vunpack.i.l.bf16 %v5753_v17  ;;  %v4434_v32 = vld [vmem:[%s8018_s4 + $0x108] sm:$0xff]  ;;  %v4435_v17 = vld [vmem:[%s8018_s4 + $0x110] sm:$0xff] }
 0x952   : > { %5431 = vmatprep.subr.bf16.mxu0 %v8002_v62  ;;  %v5480_v40 = vpack.c.bf16 %v4430_v28, %v4428_v59  ;;  %v5484_v55 = vpack.c.bf16 %v4434_v32, %v4432_v39  ;;  %v3422_v59 = vld [vmem:[%s8018_s4 + $0x58] sm:$0xff]  ;;  %v3421_v39 = vld [vmem:[%s8018_s4 + $0x50] sm:$0xff]  ;;  %v3424_v32 = vld [vmem:[%s8018_s4 + $0x68] sm:$0xff] }
 0x953   : > { %v5432_v35 = vpack.c.bf16 %v5740_v44, %v5739_v24  ;;  %v5441_v10 = vpack.c.bf16 %v5755_v11, %v5754_v37  ;;  %v4490_v44 = vld [vmem:[%s7938_s18 + $0x18] sm:$0xff]  ;;  %v5482_v24 = vpack.c.bf16 %v4429_v30, %v4427_v21  ;;  %v4437_v11 = vld [vmem:[%s8018_s4 + $0x120] sm:$0xff] }
 0x954   : > { %v5748_v8 = vpop.permute.xlu1 %5747  ;;  %v5763_v38 = vpop.permute.xlu0 %5762  ;;  %v4440_v37 = vld [vmem:[%s8018_s4 + $0x138] sm:$0xff] }
 0x955   : > { %5433 = vmatpush1.bf16.msra.mxu0 %v5432_v35  ;;  %v5750_v54 = vunpack.i.h.bf16 %v5748_v8  ;;  %v5749_v22 = vunpack.i.l.bf16 %v5748_v8  ;;  %v5765_v42 = vunpack.i.h.bf16 %v5763_v38  ;;  %v5764_v45 = vunpack.i.l.bf16 %v5763_v38  ;;  %v4433_v35 = vld [vmem:[%s8018_s4 + $0x100] sm:$0xff]  ;;  %v4436_v8 = vld [vmem:[%s8018_s4 + $0x118] sm:$0xff] }
 0x956   : > { %5434 = vmatprep.subr.bf16.mxu0 %v8002_v62  ;;  %v4444_v38 = vld [vmem:[%s8018_s4 + $0x158] sm:$0xff] }
 0x957   : > { %v5438_v3 = vpack.c.bf16 %v5750_v54, %v5749_v22  ;;  %v5447_v0 = vpack.c.bf16 %v5765_v42, %v5764_v45  ;;  %v5486_v54 = vpack.c.bf16 %v4433_v35, %v4431_v26  ;;  %v4446_v42 = vld [vmem:[%s8018_s4 + $0x168] sm:$0xff]  ;;  %v3425_v26 = vld [vmem:[%s8018_s4 + $0x70] sm:$0xff] }
 0x958   : > { %v5758_v29 = vpop.permute.xlu1 %5757  ;;  %v3428_v35 = vld [vmem:[%s8018_s4 + $0x88] sm:$0xff] }
 0x959   : > { %5436 = vmatpush1.bf16.msra.mxu0 %v5435_v51  ;;  %v5760_v16 = vunpack.i.h.bf16 %v5758_v29  ;;  %v5759_v34 = vunpack.i.l.bf16 %v5758_v29  ;;  %v4438_v51 = vld [vmem:[%s8018_s4 + $0x128] sm:$0xff]  ;;  %v5490_v29 = vpack.c.bf16 %v4437_v11, %v4435_v17  ;;  %v3429_v17 = vld [vmem:[%s8018_s4 + $0x90] sm:$0xff] }
 0x95a   : > { %5437 = vmatprep.subr.bf16.mxu0 %v8002_v62  ;;  %v5488_v22 = vpack.c.bf16 %v4438_v51, %v4436_v8  ;;  %v3430_v8 = vld [vmem:[%s8018_s4 + $0x98] sm:$0xff]  ;;  %v3432_v11 = vld [vmem:[%s8018_s4 + $0xa8] sm:$0xff] }
 0x95b   : > { %v5444_v46 = vpack.c.bf16 %v5760_v16, %v5759_v34  ;;  %v4439_v16 = vld [vmem:[%s8018_s4 + $0x130] sm:$0xff]  ;;  %v4441_v34 = vld [vmem:[%s8018_s4 + $0x140] sm:$0xff] }
 0x95c   : > { %v5768_v52 = vpop.permute.xlu1 %5767  ;;  %v5494_v45 = vpack.c.bf16 %v4441_v34, %v4439_v16  ;;  %v3433_v16 = vld [vmem:[%s8018_s4 + $0xb0] sm:$0xff] }
 0x95d   : > { %5439 = vmatpush1.bf16.msra.mxu0 %v5438_v3  ;;  %v5770_v6 = vunpack.i.h.bf16 %v5768_v52  ;;  %v5769_v12 = vunpack.i.l.bf16 %v5768_v52  ;;  %v4442_v3 = vld [vmem:[%s8018_s4 + $0x148] sm:$0xff]  ;;  %v4443_v52 = vld [vmem:[%s8018_s4 + $0x150] sm:$0xff] }
 0x95e   : > { %5440 = vmatprep.subr.bf16.mxu0 %v8002_v62 }
 0x95f   : > { %v5450_v33 = vpack.c.bf16 %v5770_v6, %v5769_v12  ;;  %v4450_v6 = vld [vmem:[%s8018_s4 + $0x188] sm:$0xff] }
 0x961   : > { %5442 = vmatpush1.bf16.msra.mxu0 %v5441_v10  ;;  %v5492_v10 = vpack.c.bf16 %v4442_v3, %v4440_v37  ;;  %v3434_v37 = vld [vmem:[%s8018_s4 + $0xb8] sm:$0xff] }
 0x962   : > { %5443 = vmatprep.subr.bf16.mxu0 %v8002_v62 }
 0x965   : > { %v3161_v57 = vpop.permute.xlu0 %3160  ;;  %5445 = vmatpush1.bf16.msra.mxu0 %v5444_v46  ;;  %v5496_v46 = vpack.c.bf16 %v4446_v42, %v4444_v38  ;;  %v3436_v38 = vld [vmem:[%s8018_s4 + $0xc8] sm:$0xf] }
 0x966   : > { %5446 = vmatprep.subr.bf16.mxu0 %v8002_v62  ;;  %v4462_v42 = vld [vmem:[%s8018_s4 + $0x1a8] sm:$0xff] }
 0x969   : > { %v2550_v19 = vpop.permute.xlu0 %2549  ;;  %5448 = vmatpush1.bf16.msra.mxu0 %v5447_v0  ;;  %v4448_v0 = vld [vmem:[%s8018_s4 + $0x178] sm:$0xff] }
 0x96a   : > { %v7465_v25 = vadd.f32 %v7403_v58, %v2550_v19  ;;  %v7468_v18 = vadd.f32 %v7405_v63, %v2550_v19  ;;  %5449 = vmatprep.subr.bf16.mxu0 %v8002_v62  ;;  %v3092_v58 = vld [vmem:[%s7936_s16] sm:$0xff]  ;;  %v3095_v63 = vld [vmem:[%s7936_s16 + $0x18] sm:$0xff]  ;;  %v5500_v19 = vpack.c.bf16 %v4450_v6, %v4448_v0 }
 0x96b   : > { %v4468_v0 = vld [vmem:[%s8018_s4 + $0x1d8] sm:$0xff]  ;;  %v3435_v6 = vld [vmem:[%s8018_s4 + $0xc0] sm:$0xf] }
 0x96c   : > { %v2627_v41 = vmax.f32 %v7465_v25, 0.0  ;;  %v2628_v7 = vmax.f32 %v7468_v18, 0.0  ;;  %v4084_v25 = vld [vmem:[%s7940_s20 + $0x10] sm:$0xff]  ;;  %v4085_v18 = vld [vmem:[%s7940_s20 + $0x18] sm:$0xff] }
 0x96d   : > { %5451 = vmatpush1.bf16.msra.mxu0 %v5450_v33  ;;  %v3166_v27 = vpop.permute.xlu1 %3165  ;;  %v4447_v33 = vld [vmem:[%s8018_s4 + $0x170] sm:$0xff] }
 0x96e   : > { %4078 = vst [vmem:[%s7476_s5] sm:$0xff] %v2627_v41  ;;  %4079 = vst [vmem:[%s7476_s5 + $0x8] sm:$0xff] %v2628_v7  ;;  %5528 = vmatprep.subr.bf16.mxu0 %v8002_v62 }
 0x970   : > { %3240 = vmatmul.mubr.f32.vlgmr.msra.gmra.mrb[30].mxu0 %v3092_v58  ;;  %v4449_v58 = vld [vmem:[%s8018_s4 + $0x180] sm:$0xff] }
 0x971   : > { %4420 = vmatprep.mubr.msk.f32.mxu0 %vm3168_vm3, %v3095_v63  ;;  %v5502_v63 = vpack.c.bf16 %v4449_v58, %v4447_v33  ;;  %v4465_v58 = vld [vmem:[%s8018_s4 + $0x1c0] sm:$0xff] }
 0x974   : > { %3245 = vmatmul.mubr.f32.gmra.mrb[32].mxu0 %v3094_v43  ;;  %v4452_v43 = vld [vmem:[%s8018_s4 + $0x198] sm:$0xf] }
 0x975   : > { %4883 = vmatprep.mubr.msk.f32.mxu0 %vm5791_vm11, %v8003_v4 }
 0xa43   : > { %v3241_v36 = vpop.f32.mrb[30].mxu0 }
 0xa44   : > { %v3242_v2 = vadd.f32 %v3241_v36, %v3161_v57  ;;  %v3243_v9 = vpop.f32.mrb[31].mxu0  ;;  %v4445_v57 = vld [vmem:[%s8018_s4 + $0x160] sm:$0xff] }
 0xa45   : > { %v5498_v12 = vpack.c.bf16 %v4445_v57, %v4443_v52  ;;  %v3418_v9 = vld [vmem:[%s8018_s4 + $0x38] sm:$0xff]  ;;  %v4463_v52 = vld [vmem:[%s8018_s4 + $0x1b0] sm:$0xff]  ;;  %v4466_v57 = vld [vmem:[%s8018_s4 + $0x1c8] sm:$0xff] }
 0xa46   : > { %v3250_v48 = vmax.f32 %v3242_v2, 0.0  ;;  %v3416_v2 = vld [vmem:[%s8018_s4 + $0x28] sm:$0xff]  ;;  %v5535_v33 = vpack.c.bf16 %v4468_v0, %v4466_v57  ;;  %v4509_v57 = vld [vmem:[%s8018_s4 + $0x2f8] sm:$0xff] }
 0xa47   : > { %v3246_v20 = vpop.f32.mrb[32].mxu0  ;;  %v4511_v0 = vld [vmem:[%s8018_s4 + $0x308] sm:$0xff] }
 0xa48   : > { %v3247_v14 = vadd.f32 %v3246_v20, %v3166_v27  ;;  %v3248_v31 = vpop.f32.mrb[33].mxu0  ;;  %4862 = vmatprep.mubr.msk.f32.mxu1 %vm3252_vm4, %v3250_v48 }
 0xa49   : > { %v5508_v31 = vpack.c.bf16 %v3418_v9, %v3416_v2 }
 0xa4a   : > { %v3251_v47 = vmax.f32 %v3247_v14, 0.0  ;;  %v5506_v14 = vpack.c.bf16 %v3413_v13, %v3411_v5  ;;  %v4471_v5 = vld [vmem:[%s8018_s4 + $0x1f0] sm:$0xff]  ;;  %v4474_v13 = vld [vmem:[%s8018_s4 + $0x208] sm:$0xff] }
 0xa4c   : > { %4863 = vmatmul.mubr.msk.f32.vlgmr.msra.gmra.mrb[12].mxu1 %vm3252_vm4, %v3251_v47  ;;  %v3415_v47 = vld [vmem:[%s8018_s4 + $0x20] sm:$0xff] }
 0xa4d   : > { %4869 = vmatprep.mubr.msk.f32.mxu1 %vm5791_vm11, %v8003_v4 }
 0xb1f   : > { %v4864_v15 = vpop.f32.mrb[12].mxu1 }
 0xb20   : > { %v3328_v49 = vpop.f32.mrb[13].mxu1 }
 0xb21   : > { %v5475_v56 = vpack.c.bf16 %v4864_v15, %v3328_v49  ;;  %v3417_v15 = vld [vmem:[%s8018_s4 + $0x30] sm:$0xff] }
 0xb22   : > { %v5510_v21 = vpack.c.bf16 %v3417_v15, %v3415_v47 }
 0xb23   : > { %5476 = vmatpush3.bf16.msra.mxu1 %v5475_v56  ;;  %5530 = vmatpush3.bf16.msra.mxu0 %v5475_v56 }
 0xb24   : > { %5477 = vmatprep.subr.bf16.mxu1 %v8002_v62  ;;  %5555 = vmatprep.subr.bf16.mxu0 %v8002_v62  ;;  %v4425_v62 = vld [vmem:[%s7938_s18 + $0x8] sm:$0xff] }
 0xb26   : > { %4870 = vmatmul.mubr.msk.f32.vlgmr.msra.gmra.mrb[14].mxu1 %vm3168_vm3, %v3337_v23  ;;  %4884 = vmatmul.mubr.msk.f32.vlgmr.msra.gmra.mrb[34].mxu0 %vm3168_vm3, %v4459_v1 }
 0xb27   : > { %5479 = vmatpush3.bf16.msra.mxu1 %v5475_v56  ;;  %5557 = vmatpush3.bf16.msra.mxu0 %v5475_v56  ;;  %v3420_v56 = vld [vmem:[%s8018_s4 + $0x48] sm:$0xff] }
 0xb28   : > { %4876 = vmatprep.mubr.msk.f32.mxu1 %vm5791_vm11, %v8003_v4  ;;  %4890 = vmatprep.mubr.msk.f32.mxu0 %vm5791_vm11, %v8003_v4  ;;  %v5512_v30 = vpack.c.bf16 %v3422_v59, %v3420_v56  ;;  %v4479_v56 = vld [vmem:[%s8018_s4 + $0x230] sm:$0xff]  ;;  %v4482_v59 = vld [vmem:[%s8018_s4 + $0x248] sm:$0xff] }
 0xb29   : > { %5481 = vmatprep.subr.bf16.mxu1 %v5480_v40  ;;  %v3419_v40 = vld [vmem:[%s8018_s4 + $0x40] sm:$0xff] }
 0xb2a   : > { %4877 = vmatmul.mubr.msk.f32.vlgmr.msra.gmra.mrb[16].mxu1 %vm3168_vm3, %v4425_v62  ;;  %4891 = vmatmul.mubr.msk.f32.vlgmr.msra.gmra.mrb[36].mxu0 %vm3168_vm3, %v4490_v44  ;;  %v3426_v62 = vld [vmem:[%s8018_s4 + $0x78] sm:$0xff]  ;;  %v5514_v44 = vpack.c.bf16 %v3421_v39, %v3419_v40  ;;  %v4483_v40 = vld [vmem:[%s8018_s4 + $0x250] sm:$0xff] }
 0xb2b   : > { %5483 = vmatpush1.bf16.msra.mxu1 %v5482_v24  ;;  %3613 = vmatprep.mubr.f32.mxu1 %v8003_v4  ;;  %v5516_v24 = vpack.c.bf16 %v3426_v62, %v3424_v32  ;;  %v4486_v32 = vld [vmem:[%s8018_s4 + $0x268] sm:$0xf]  ;;  %v4493_v62 = vld [vmem:[%s8018_s4 + $0x278] sm:$0xff] }
 0xb2c   : > { %5485 = vmatprep.subr.bf16.mxu1 %v5484_v55  ;;  %4186 = vmatprep.mubr.f32.mxu0 %v8003_v4  ;;  %v3423_v55 = vld [vmem:[%s8018_s4 + $0x60] sm:$0xff] }
 0xb2d   : > { %v5518_v51 = vpack.c.bf16 %v3425_v26, %v3423_v55  ;;  %v4494_v55 = vld [vmem:[%s8018_s4 + $0x280] sm:$0xff]  ;;  %v4497_v26 = vld [vmem:[%s8018_s4 + $0x298] sm:$0xff] }
 0xb2f   : > { %5487 = vmatpush1.bf16.msra.mxu1 %v5486_v54  ;;  %v5520_v54 = vpack.c.bf16 %v3430_v8, %v3428_v35  ;;  %v4499_v35 = vld [vmem:[%s8018_s4 + $0x2a8] sm:$0xff]  ;;  %v4485_v8 = vld [vmem:[%s8018_s4 + $0x260] sm:$0xf] }
 0xb30   : > { %5489 = vmatprep.subr.bf16.mxu1 %v5488_v22  ;;  %v3427_v22 = vld [vmem:[%s8018_s4 + $0x80] sm:$0xff] }
 0xb31   : > { %v5522_v3 = vpack.c.bf16 %v3429_v17, %v3427_v22  ;;  %v5562_v22 = vpack.c.bf16 %v4499_v35, %v4497_v26  ;;  %v4496_v17 = vld [vmem:[%s8018_s4 + $0x290] sm:$0xff] }
 0xb33   : > { %5491 = vmatpush1.bf16.msra.mxu1 %v5490_v29  ;;  %v5524_v29 = vpack.c.bf16 %v3434_v37, %v3432_v11  ;;  %v4498_v11 = vld [vmem:[%s8018_s4 + $0x2a0] sm:$0xff]  ;;  %v4501_v37 = vld [vmem:[%s8018_s4 + $0x2b8] sm:$0xff] }
 0xb34   : > { %5493 = vmatprep.subr.bf16.mxu1 %v5492_v10  ;;  %v3431_v10 = vld [vmem:[%s8018_s4 + $0xa0] sm:$0xff] }
 0xb35   : > { %v5526_v34 = vpack.c.bf16 %v3433_v16, %v3431_v10  ;;  %v4500_v16 = vld [vmem:[%s8018_s4 + $0x2b0] sm:$0xff] }
 0xb37   : > { %5495 = vmatpush1.bf16.msra.mxu1 %v5494_v45  ;;  %v4464_v45 = vld [vmem:[%s8018_s4 + $0x1b8] sm:$0xff] }
 0xb38   : > { %5497 = vmatprep.subr.bf16.mxu1 %v5496_v46  ;;  %v4461_v46 = vld [vmem:[%s8018_s4 + $0x1a0] sm:$0xff] }
 0xb3b   : > { %5499 = vmatpush1.bf16.msra.mxu1 %v5498_v12  ;;  %v5531_v12 = vpack.c.bf16 %v4464_v45, %v4462_v42 }
 0xb3c   : > { %5501 = vmatprep.subr.bf16.mxu1 %v5500_v19  ;;  %v5533_v19 = vpack.c.bf16 %v4463_v52, %v4461_v46  ;;  %v4504_v46 = vld [vmem:[%s8018_s4 + $0x2d0] sm:$0xff]  ;;  %v4506_v52 = vld [vmem:[%s8018_s4 + $0x2e0] sm:$0xff] }
 0xb3f   : > { %5503 = vmatpush1.bf16.msra.mxu1 %v5502_v63  ;;  %v4467_v63 = vld [vmem:[%s8018_s4 + $0x1d0] sm:$0xff] }
 0xb40   : > { %4453 = vmatprep.subr.msk.mxu1 %vm810_vm0, %v4452_v43  ;;  %v4470_v43 = vld [vmem:[%s8018_s4 + $0x1e8] sm:$0xff]  ;;  %v5537_v53 = vpack.c.bf16 %v4467_v63, %v4465_v58  ;;  %v4513_v58 = vld [vmem:[%s8018_s4 + $0x318] sm:$0xff] }
 0xb41   : > { %v4515_v63 = vld [vmem:[%s8018_s4 + $0x328] sm:$0xff] }
 0xb43   : > { %4454 = vmatpush1.msk.msra.mxu1 %vm810_vm0, %v4451_v50  ;;  %v4472_v50 = vld [vmem:[%s8018_s4 + $0x1f8] sm:$0xff] }
 0xb44   : > { %5505 = vmatprep.subr.bf16.mxu1 %v5504_v61  ;;  %v5539_v60 = vpack.c.bf16 %v4472_v50, %v4470_v43  ;;  %v4469_v61 = vld [vmem:[%s8018_s4 + $0x1e0] sm:$0xff]  ;;  %v5578_v50 = vpack.c.bf16 %v4515_v63, %v4513_v58 }
 0xb45   : > { %v5541_v2 = vpack.c.bf16 %v4471_v5, %v4469_v61  ;;  %v4517_v5 = vld [vmem:[%s8018_s4 + $0x338] sm:$0xf] }
 0xbf9   : > { %v7634_v36 = vpop.f32.mrb[14].mxu1  ;;  %v7642_v48 = vpop.f32.mrb[34].mxu0 }
 0xbfa   : > { %v4871_v27 = vpop.f32.mrb[15].mxu1  ;;  %v4885_v20 = vpop.f32.mrb[35].mxu0 }
 0xbfb   : > { %v4473_v27 = vld [vmem:[%s8018_s4 + $0x200] sm:$0xff]  ;;  %v4475_v20 = vld [vmem:[%s8018_s4 + $0x210] sm:$0xff] }
 0xbfc   : > { %v5545_v47 = vpack.c.bf16 %v4475_v20, %v4473_v27 }
 0xbfd   : > { %v3508_v49 = vpop.f32.mrb[16].mxu1  ;;  %v7656_v28 = vpop.f32.mrb[36].mxu0 }
 0xbfe   : > { %v4878_v23 = vpop.f32.mrb[17].mxu1  ;;  %4455 = vmatmul.mubr.msk.f32.vlgmr.msra.gmra.mrb[18].mxu1 %vm3539_vm5, %v3508_v49  ;;  %v4892_v1 = vpop.f32.mrb[37].mxu0  ;;  %v4477_v49 = vld [vmem:[%s8018_s4 + $0x220] sm:$0xff] }
 0xbff   : > { %5507 = vmatpush1.bf16.msra.mxu1 %v5506_v14  ;;  %3693 = vmatprep.mubr.f32.mxu1 %v8003_v4  ;;  %v4478_v14 = vld [vmem:[%s8018_s4 + $0x228] sm:$0xff]  ;;  %v4484_v23 = vld [vmem:[%s8018_s4 + $0x258] sm:$0xff]  ;;  %v5549_v1 = vpack.c.bf16 %v4479_v56, %v4477_v49 }
 0xc00   : > { %5509 = vmatprep.subr.bf16.mxu1 %v5508_v31  ;;  %v4480_v31 = vld [vmem:[%s8018_s4 + $0x238] sm:$0xff]  ;;  %v4083_v49 = vld [vmem:[%s7940_s20 + $0x8] sm:$0xff] }
 0xc01   : > { %v5547_v15 = vpack.c.bf16 %v4480_v31, %v4478_v14 }
 0xc03   : > { %5511 = vmatpush1.bf16.msra.mxu1 %v5510_v21  ;;  %v5551_v21 = vpack.c.bf16 %v4484_v23, %v4482_v59 }
 0xc04   : > { %5513 = vmatprep.subr.bf16.mxu1 %v5512_v30  ;;  %v4481_v30 = vld [vmem:[%s8018_s4 + $0x240] sm:$0xff] }
 0xc05   : > { %v5553_v39 = vpack.c.bf16 %v4483_v40, %v4481_v30 }
 0xc07   : > { %5515 = vmatpush1.bf16.msra.mxu1 %v5514_v44  ;;  %v4495_v44 = vld [vmem:[%s8018_s4 + $0x288] sm:$0xff] }
 0xc08   : > { %5517 = vmatprep.subr.bf16.mxu1 %v5516_v24  ;;  %v4492_v24 = vld [vmem:[%s8018_s4 + $0x270] sm:$0xff] }
 0xc0b   : > { %5519 = vmatpush1.bf16.msra.mxu1 %v5518_v51  ;;  %v5558_v51 = vpack.c.bf16 %v4495_v44, %v4493_v62 }
 0xc0c   : > { %5521 = vmatprep.subr.bf16.mxu1 %v5520_v54  ;;  %v5560_v54 = vpack.c.bf16 %v4494_v55, %v4492_v24 }
 0xc0f   : > { %5523 = vmatpush1.bf16.msra.mxu1 %v5522_v3  ;;  %v4503_v3 = vld [vmem:[%s8018_s4 + $0x2c8] sm:$0xff] }
 0xc10   : > { %5525 = vmatprep.subr.bf16.mxu1 %v5524_v29  ;;  %v5564_v29 = vpack.c.bf16 %v4498_v11, %v4496_v17  ;;  %v5566_v10 = vpack.c.bf16 %v4503_v3, %v4501_v37 }
 0xc13   : > { %5527 = vmatpush1.bf16.msra.mxu1 %v5526_v34  ;;  %v4502_v34 = vld [vmem:[%s8018_s4 + $0x2c0] sm:$0xff] }
 0xc14   : > { %4456 = vmatprep.subr.msk.mxu1 %vm810_vm0, %v3436_v38  ;;  %v4505_v38 = vld [vmem:[%s8018_s4 + $0x2d8] sm:$0xff]  ;;  %v5568_v42 = vpack.c.bf16 %v4502_v34, %v4500_v16 }
 0xc17   : > { %4457 = vmatpush1.msk.msra.mxu1 %vm810_vm0, %v3435_v6  ;;  %v5572_v6 = vpack.c.bf16 %v4506_v52, %v4504_v46 }
 0xc18   : > { %4458 = vmatmul.mubr.msk.f32.vlgmr.msra.gmra.mrb[18].mxu1 %vm3539_vm5, %v7634_v36  ;;  %5532 = vmatprep.subr.bf16.mxu1 %v5531_v12  ;;  %v4476_v36 = vld [vmem:[%s8018_s4 + $0x218] sm:$0xff]  ;;  %v5574_v12 = vpack.c.bf16 %v4511_v0, %v4509_v57 }
 0xc19   : > { %5534 = vmatpush1.bf16.msra.mxu1 %v5533_v19  ;;  %3875 = vmatprep.mubr.f32.mxu1 %v8003_v4  ;;  %v5543_v9 = vpack.c.bf16 %v4476_v36, %v4474_v13  ;;  %v4508_v19 = vld [vmem:[%s8018_s4 + $0x2f0] sm:$0xff]  ;;  %v4072_v36 = vpop.permute.xlu1 %4071 }
 0xc1a   : > { %5536 = vmatprep.subr.bf16.mxu1 %v5535_v33  ;;  %v4510_v33 = vld [vmem:[%s8018_s4 + $0x300] sm:$0xff]  ;;  %v4516_v13 = vld [vmem:[%s8018_s4 + $0x330] sm:$0xf] }
 0xc1b   : > { %v5576_v43 = vpack.c.bf16 %v4510_v33, %v4508_v19 }
 0xc1d   : > { %5538 = vmatpush1.bf16.msra.mxu1 %v5537_v53  ;;  %v4512_v53 = vld [vmem:[%s8018_s4 + $0x310] sm:$0xff] }
 0xc1e   : > { %5540 = vmatprep.subr.bf16.mxu1 %v5539_v60  ;;  %v4514_v60 = vld [vmem:[%s8018_s4 + $0x320] sm:$0xff] }
 0xc1f   : > { %v5580_v61 = vpack.c.bf16 %v4514_v60, %v4512_v53 }
 0xc21   : > { %5542 = vmatpush1.bf16.msra.mxu1 %v5541_v2 }
 0xc22   : > { %5544 = vmatprep.subr.bf16.mxu1 %v5543_v9 }
 0xc25   : > { %5546 = vmatpush1.bf16.msra.mxu1 %v5545_v47 }
 0xc26   : > { %5548 = vmatprep.subr.bf16.mxu1 %v5547_v15 }
 0xc29   : > { %5550 = vmatpush1.bf16.msra.mxu1 %v5549_v1 }
 0xc2a   : > { %5552 = vmatprep.subr.bf16.mxu1 %v5551_v21 }
 0xc2d   : > { %5554 = vmatpush1.bf16.msra.mxu1 %v5553_v39 }
 0xc2e   : > { %4487 = vmatprep.subr.msk.mxu1 %vm810_vm0, %v4486_v32 }
 0xc31   : > { %4488 = vmatpush1.msk.msra.mxu1 %vm810_vm0, %v4485_v8 }
 0xc32   : > { %5559 = vmatprep.subr.bf16.mxu1 %v5558_v51  ;;  %4489 = vmatmul.mubr.msk.f32.vlgmr.msra.gmra.mrb[18].mxu1 %vm3539_vm5, %v7642_v48  ;;  %v4507_v48 = vld [vmem:[%s8018_s4 + $0x2e8] sm:$0xff] }
 0xc33   : > { %5561 = vmatpush1.bf16.msra.mxu1 %v5560_v54  ;;  %4059 = vmatprep.mubr.f32.mxu1 %v8003_v4  ;;  %v5570_v45 = vpack.c.bf16 %v4507_v48, %v4505_v38 }
 0xc34   : > { %5563 = vmatprep.subr.bf16.mxu1 %v5562_v22 }
 0xc37   : > { %5565 = vmatpush1.bf16.msra.mxu1 %v5564_v29 }
 0xc38   : > { %5567 = vmatprep.subr.bf16.mxu1 %v5566_v10 }
 0xc3b   : > { %5569 = vmatpush1.bf16.msra.mxu1 %v5568_v42 }
 0xc3c   : > { %5571 = vmatprep.subr.bf16.mxu1 %v5570_v45 }
 0xc3f   : > { %5573 = vmatpush1.bf16.msra.mxu1 %v5572_v6 }
 0xc40   : > { %5575 = vmatprep.subr.bf16.mxu1 %v5574_v12 }
 0xc43   : > { %5577 = vmatpush1.bf16.msra.mxu1 %v5576_v43 }
 0xc44   : > { %5579 = vmatprep.subr.bf16.mxu1 %v5578_v50 }
 0xc47   : > { %5581 = vmatpush1.bf16.msra.mxu1 %v5580_v61 }
 0xc48   : > { %4518 = vmatprep.subr.msk.mxu1 %vm810_vm0, %v4517_v5 }
 0xc4b   : > { %4519 = vmatpush1.msk.msra.mxu1 %vm810_vm0, %v4516_v13 }
 0xc4c   : > { %4520 = vmatmul.mubr.msk.f32.vlgmr.msra.gmra.mrb[18].mxu1 %vm3539_vm5, %v7656_v28  ;;  %v4082_v28 = vld [vmem:[%s7940_s20] sm:$0xff] }
 0xd1f   : > { %v4061_v2 = vpop.f32.mrb[18].mxu1 }
 0xd20   : > { %v4074_v9 = vadd.f32 %v4072_v36, %v4061_v2  ;;  %v4063_v27 = vpop.f32.mrb[19].mxu1 }
 0xd21   : > { %v4075_v20 = vadd.f32 %v4072_v36, %v4063_v27 }
 0xd22   : > { %v4076_v14 = vmax.f32 %v4074_v9, 0.0 }
 0xd23   : > { %v4077_v31 = vmax.f32 %v4075_v20, 0.0 }
 0xd24   : > { %4080 = vst [vmem:[%s7476_s5 + $0x10] sm:$0xff] %v4076_v14  ;;  %v5584_v15 = vpack.c.bf16 %v4076_v14, %v2627_v41  ;;  %v4108_v41 = vpop.permute.xlu0 %4107 }
 0xd25   : > { %4081 = vst [vmem:[%s7476_s5 + $0x18] sm:$0xff] %v4077_v31  ;;  %v5582_v47 = vpack.c.bf16 %v4077_v31, %v2628_v7  ;;  %v4093_v7 = vpop.permute.xlu1 %4092 }
 0xd27   : > { %5583 = vmatprep.subr.bf16.mxu0 %v5582_v47 }
 0xd28   : > { %5585 = vmatpush1.bf16.msra.mxu0 %v5584_v15  ;;  %v4098_v21 = vpop.permute.xlu0 %4097 }
 0xd29   : > { %v4103_v32 = vpop.permute.xlu1 %4102 }
 0xd2b   : > { %4521 = vmatmul.mubr.msk.f32.vlgmr.msra.gmra.mrb[38].mxu0 %vm3168_vm3, %v4082_v28 }
 0xd2c   : > { %4192 = vmatprep.mubr.f32.mxu0 %v8003_v4 }
 0xd2f   : > { %4522 = vmatmul.mubr.msk.f32.gmra.mrb[40].mxu0 %vm3168_vm3, %v4083_v49 }
 0xd30   : > { %4198 = vmatprep.mubr.f32.mxu0 %v8003_v4 }
 0xd33   : > { %4523 = vmatmul.mubr.msk.f32.gmra.mrb[42].mxu0 %vm3168_vm3, %v4084_v25 }
 0xd34   : > { %4204 = vmatprep.mubr.f32.mxu0 %v8003_v4 }
 0xd37   : > { %4524 = vmatmul.mubr.msk.f32.gmra.mrb[44].mxu0 %vm3168_vm3, %v4085_v18 }
 0xdfe   : > { %v4188_v56 = vpop.f32.mrb[38].mxu0 }
 0xdff   : > { %v4189_v59 = vadd.f32 %v4188_v56, %v4093_v7  ;;  %v4190_v23 = vpop.f32.mrb[39].mxu0 }
 0xe00   : > { %v4191_v1 = vadd.f32 %v4190_v23, %v4093_v7 }
 0xe01   : > { %4211 = vst [vmem:[%s791_s29] sm:$0x3f] %v4189_v59 }
 0xe02   : > { %4212 = vst [vmem:[%s791_s29 + $0x8] sm:$0x3f] %v4191_v1  ;;  %v4194_v4 = vpop.f32.mrb[40].mxu0 }
 0xe03   : > { %v4195_v30 = vadd.f32 %v4194_v4, %v4098_v21  ;;  %v4196_v40 = vpop.f32.mrb[41].mxu0 }
 0xe04   : > { %v4197_v39 = vadd.f32 %v4196_v40, %v4098_v21 }
 0xe05   : > { %4213 = vst [vmem:[%s796_s6] sm:$0xff] %v4195_v30 }
 0xe06   : > { %4214 = vst [vmem:[%s796_s6 + $0x8] sm:$0xff] %v4197_v39  ;;  %v4200_v62 = vpop.f32.mrb[42].mxu0 }
 0xe07   : > { %v4201_v44 = vadd.f32 %v4200_v62, %v4103_v32  ;;  %v4202_v24 = vpop.f32.mrb[43].mxu0 }
 0xe08   : > { %v4203_v55 = vadd.f32 %v4202_v24, %v4103_v32 }
 0xe09   : > { %4215 = vst [vmem:[%s796_s6 + $0x10] sm:$0x3f] %v4201_v44 }
 0xe0a   : > { %4216 = vst [vmem:[%s796_s6 + $0x18] sm:$0x3f] %v4203_v55  ;;  %v4206_v26 = vpop.f32.mrb[44].mxu0 }
 0xe0b   : > { %v4207_v35 = vadd.f32 %v4206_v26, %v4108_v41  ;;  %v4208_v8 = vpop.f32.mrb[45].mxu0 }
 0xe0c   : > { %v4209_v51 = vadd.f32 %v4208_v8, %v4108_v41 }
 0xe0e   : > { %v4219_v54 = vcombine.low %v4207_v35, %v4209_v51 }
 0xe10   : > { %4221 = vst [vmem:[%s801_s30] sm:$0xff] %v4219_v54 }
 0xe11 PF: > { %s8023_s3 = sld [smem:[#allocation2_spill]] }
 0xe17   : > { %s36_s29 = sadd.s32 1, %s8023_s3  }
 0xe18   : > { %p33_p4 = scmp.ge.s32.totalorder %s36_s29, 4  }
 0xe1a   :  { %35 = sbr.rel (!%p33_p4) target bundleno = 16 (0x10), region = 180 }

</bundles_post_ra>
